<compile_context>
chip_gen: v6e
topology: v6e:2x2x1
jax: 0.10.0
libtpu: 0.0.40
codegen_flags: <defaults>
</compile_context>

<pallas_src>
import functools

import jax
import jax.numpy as jnp
from jax.experimental import pallas as pl
from jax.experimental.pallas import tpu as pltpu


def _round_up(x, m):
    return (x + m - 1) // m * m


@functools.lru_cache(maxsize=None)
def _vmem_limit_bytes():
    # v5e/v6e: 128 MiB physical VMEM -> ~90 MiB scoped is safe.
    # v7x: 64 MiB physical -> stay closer to the 32 MiB default.
    try:
        cap = pltpu.get_tpu_info().vmem_capacity_bytes
    except Exception:  # older jax / info unavailable: conservative default
        return 48 * 1024 * 1024
    return int(min(96 * 1024 * 1024, max(32 * 1024 * 1024, 0.7 * cap)))


@functools.lru_cache(maxsize=None)
def _default_tile_m():
    # Bigger M tiles on 128-MiB chips (v5e/v6e), smaller on v7x.
    return 1024 if _vmem_limit_bytes() >= 64 * 1024 * 1024 else 512


# ----------------------------------------------------------------------------
# Pallas kernels
# ----------------------------------------------------------------------------
def _matmul_bias_act_kernel(x_ref, w_ref, b_ref, o_ref, *, negative_slope):
    # x: (TILE_M, K) bf16 patches, w: (K, Coutp) bf16 (VMEM-resident across the
    # grid), b: (1, Coutp) f32.  bf16 MXU matmul, f32 accumulate / epilogue.
    acc = jnp.dot(x_ref[...], w_ref[...], preferred_element_type=jnp.float32)
    acc = acc + b_ref[...]
    if negative_slope is not None:
        acc = jnp.where(acc >= 0, acc, negative_slope * acc)
    o_ref[...] = acc.astype(o_ref.dtype)


def _conv_inorm_lrelu_kernel(x_ref, w_ref, b_ref, o_ref, *, bblk, eps,
                             negative_slope):
    # x: (bblk, HW, K) bf16 patches, w: (K, Coutp) bf16, b: (1, Coutp) f32.
    # Fused Conv (matmul + bias) + InstanceNorm2d (affine=False, biased var
    # over H*W, one-pass sum/sumsq stats) + LeakyReLU; conv output never
    # leaves VMEM.  Zero-padded output channels stay exactly 0.
    w = w_ref[...]
    bias = b_ref[...]
    hw = x_ref.shape[1]
    inv_hw = 1.0 / hw
    for s in range(bblk):  # static unroll: per-sample 2D matmul + stats
        y = jnp.dot(x_ref[s], w, preferred_element_type=jnp.float32)
        y = y + bias                                        # (HW, Coutp) f32
        mean = jnp.sum(y, axis=0, keepdims=True) * inv_hw   # (1, Coutp)
        msq = jnp.sum(y * y, axis=0, keepdims=True) * inv_hw
        var = jnp.maximum(msq - mean * mean, 0.0)
        yn = (y - mean) * jax.lax.rsqrt(var + eps)
        o_ref[s] = jnp.where(yn >= 0, yn, negative_slope * yn).astype(o_ref.dtype)


# ----------------------------------------------------------------------------
# Glue (padding / im2col / reshape stay in plain JAX)
# ----------------------------------------------------------------------------
def _extract_patches(x_nhwc, kh, kw, stride):
    # Returns (N, Ho, Wo, kh*kw*Cin); K ordered (kh, kw, cin) with cin fastest.
    N, H, W, C = x_nhwc.shape
    Ho = (H - kh) // stride + 1
    Wo = (W - kw) // stride + 1
    cols = []
    for i in range(kh):
        for j in range(kw):
            cols.append(
                x_nhwc[:, i:i + stride * Ho:stride, j:j + stride * Wo:stride, :]
            )
    return jnp.concatenate(cols, axis=-1)


def _prep_conv_inputs(x_nhwc, w_pt, stride, padding):
    """bf16 im2col patches + matmul-layout bf16 weights, Cin lane-padded."""
    Cout, Cin, KH, KW = w_pt.shape
    # Cast to bf16 BEFORE pad/im2col: the 4-16x duplicated patch tensor is the
    # largest HBM intermediate, halving its bytes is a pure bandwidth win.
    x_nhwc = x_nhwc.astype(jnp.bfloat16)
    cin_p = _round_up(Cin, 8)                 # lane-friendly K (layer 1: 3->8)
    if cin_p != Cin:
        x_nhwc = jnp.pad(x_nhwc, ((0, 0), (0, 0), (0, 0), (0, cin_p - Cin)))
        w_pt = jnp.pad(w_pt, ((0, 0), (0, cin_p - Cin), (0, 0), (0, 0)))
    xp = jnp.pad(x_nhwc, ((0, 0), (padding, padding), (padding, padding), (0, 0)))
    patches = _extract_patches(xp, KH, KW, stride)          # (N, Ho, Wo, K)
    K = KH * KW * cin_p
    # (Cout, Cin, KH, KW) -> (KH, KW, Cin, Cout) -> (K, Cout); matches patches.
    wm = jnp.transpose(w_pt, (2, 3, 1, 0)).reshape(K, Cout).astype(jnp.bfloat16)
    return patches, wm


def _pad_cout(wm, b, cout):
    """Zero-pad Cout to a multiple of 128 -> lane-dense, unmasked stores."""
    cout_p = _round_up(cout, 128)
    if cout_p != cout:
        wm = jnp.pad(wm, ((0, 0), (0, cout_p - cout)))
        b = jnp.pad(b, ((0, cout_p - cout),))
    return wm, b.reshape(1, cout_p).astype(jnp.float32), cout_p


def _itemsize(dtype):
    return 2 if dtype == jnp.bfloat16 else 4


# ----------------------------------------------------------------------------
# Conv wrappers
# ----------------------------------------------------------------------------
def conv2d_pallas(x_nhwc, w_pt, b, *, stride, padding, negative_slope=None,
                  out_dtype=jnp.bfloat16, tile_m=None):
    """Conv2d (PyTorch layout Cout,Cin,KH,KW) + bias + optional LeakyReLU."""
    if tile_m is None:
        tile_m = _default_tile_m()
    N = x_nhwc.shape[0]
    Cout = w_pt.shape[0]
    patches, wm = _prep_conv_inputs(x_nhwc, w_pt, stride, padding)
    _, Ho, Wo, K = patches.shape
    M = N * Ho * Wo
    xm = patches.reshape(M, K)

    wm, bm, cout_p = _pad_cout(wm, b, Cout)

    tm = min(tile_m, _round_up(M, 8))
    if M >= 16 and _round_up(M, tm) // tm < 2:
        # Keep >= 2 grid steps when possible (v7x megacore sharding).
        tm = _round_up((M + 1) // 2, 8)
    Mp = _round_up(M, tm)
    if Mp != M:
        xm = jnp.pad(xm, ((0, Mp - M), (0, 0)))

    flops = 2 * Mp * K * cout_p
    bytes_accessed = (Mp * K * 2 + K * cout_p * 2
                      + Mp * cout_p * _itemsize(out_dtype))
    out = pl.pallas_call(
        functools.partial(_matmul_bias_act_kernel, negative_slope=negative_slope),
        out_shape=jax.ShapeDtypeStruct((Mp, cout_p), out_dtype),
        grid=(Mp // tm,),
        in_specs=[
            pl.BlockSpec((tm, K), lambda i: (i, 0)),        # pipelined M tiles
            pl.BlockSpec((K, cout_p), lambda i: (0, 0)),    # weights resident
            pl.BlockSpec((1, cout_p), lambda i: (0, 0)),    # bias resident
        ],
        out_specs=pl.BlockSpec((tm, cout_p), lambda i: (i, 0)),
        compiler_params=pltpu.CompilerParams(
            dimension_semantics=("parallel",),
            vmem_limit_bytes=_vmem_limit_bytes()),
        cost_estimate=pl.CostEstimate(flops=flops, transcendentals=0,
                                      bytes_accessed=bytes_accessed),
    )(xm, wm, bm)
    out = out[:M, :Cout]
    return out.reshape(N, Ho, Wo, Cout)


def _pick_sample_block(n, hw, k, cout_p):
    """Largest divisor of N that fits the VMEM budget, keeps grid >= 2 when
    possible, and targets a few hundred MXU rows per step."""
    budget = 8 * 1024 * 1024
    best = 1
    for b in range(1, n + 1):
        if n % b:
            continue
        patch_bytes = 2 * b * hw * k * 2        # double-buffered bf16 patches
        temp_bytes = 3 * b * hw * cout_p * 4    # f32 y / y^2 / normalized
        if patch_bytes + temp_bytes > budget:
            continue
        if n >= 2 and n // b < 2:
            continue
        if b * hw <= 512:
            best = b
    return best


def conv2d_inorm_lrelu_pallas(x_nhwc, w_pt, b, *, stride, padding, eps=1e-5,
                              negative_slope=0.2, out_dtype=jnp.bfloat16):
    """Conv2d + InstanceNorm2d(affine=False) + LeakyReLU fused in one kernel."""
    N = x_nhwc.shape[0]
    Cout = w_pt.shape[0]
    patches, wm = _prep_conv_inputs(x_nhwc, w_pt, stride, padding)
    _, Ho, Wo, K = patches.shape
    HW = Ho * Wo
    x3 = patches.reshape(N, HW, K)

    wm, bm, cout_p = _pad_cout(wm, b, Cout)

    bblk = _pick_sample_block(N, HW, K, cout_p)
    grid = N // bblk

    flops = 2 * N * HW * K * cout_p
    bytes_accessed = (N * HW * K * 2 + K * cout_p * 2
                      + N * HW * cout_p * _itemsize(out_dtype))
    out = pl.pallas_call(
        functools.partial(_conv_inorm_lrelu_kernel, bblk=bblk, eps=eps,
                          negative_slope=negative_slope),
        out_shape=jax.ShapeDtypeStruct((N, HW, cout_p), out_dtype),
        grid=(grid,),
        in_specs=[
            pl.BlockSpec((bblk, HW, K), lambda n: (n, 0, 0)),   # sample block
            pl.BlockSpec((K, cout_p), lambda n: (0, 0)),        # weights resident
            pl.BlockSpec((1, cout_p), lambda n: (0, 0)),        # bias resident
        ],
        out_specs=pl.BlockSpec((bblk, HW, cout_p), lambda n: (n, 0, 0)),
        compiler_params=pltpu.CompilerParams(
            dimension_semantics=("parallel",),
            vmem_limit_bytes=_vmem_limit_bytes()),
        cost_estimate=pl.CostEstimate(flops=flops, transcendentals=N * cout_p,
                                      bytes_accessed=bytes_accessed),
    )(x3, wm, bm)
    out = out[..., :Cout]
    return out.reshape(N, Ho, Wo, Cout)


# ----------------------------------------------------------------------------
# Discriminator forward
# ----------------------------------------------------------------------------
def init_params(key):
    """Deterministic synthetic parameters (PyTorch layout: Cout,Cin,KH,KW)."""
    layer_defs = [(32, 3), (64, 32), (128, 64), (256, 128), (1, 256)]
    params = {}
    keys = jax.random.split(key, len(layer_defs))
    for idx, ((cout, cin), k) in enumerate(zip(layer_defs, keys), start=1):
        kw_, kb = jax.random.split(k)
        params[f"w{idx}"] = 0.05 * jax.random.normal(
            kw_, (cout, cin, 4, 4), jnp.float32)
        params[f"b{idx}"] = 0.01 * jax.random.normal(kb, (cout,), jnp.float32)
    return params


def discriminator_forward(x_nchw, params):
    # NCHW (PyTorch) -> NHWC for the Pallas conv kernels.
    x = jnp.transpose(x_nchw, (0, 2, 3, 1)).astype(jnp.float32)

    # Conv(3->32, s2, p1) + LeakyReLU(0.2)           -> bf16 inter-layer output
    x = conv2d_pallas(x, params["w1"], params["b1"], stride=2, padding=1,
                      negative_slope=0.2, out_dtype=jnp.bfloat16)
    # Conv(32->64, s2, p1) + InstanceNorm + LeakyReLU  (fused)
    x = conv2d_inorm_lrelu_pallas(x, params["w2"], params["b2"],
                                  stride=2, padding=1)
    # Conv(64->128, s2, p1) + InstanceNorm + LeakyReLU (fused)
    x = conv2d_inorm_lrelu_pallas(x, params["w3"], params["b3"],
                                  stride=2, padding=1)
    # Conv(128->256, s1, p1) + InstanceNorm + LeakyReLU (fused)
    x = conv2d_inorm_lrelu_pallas(x, params["w4"], params["b4"],
                                  stride=1, padding=1)
    # Conv(256->1, s1, p1) -- lane-dense output block, column 0 sliced back.
    x = conv2d_pallas(x, params["w5"], params["b5"], stride=1, padding=1,
                      negative_slope=None, out_dtype=jnp.float32)

    # x: (N, Ho, Wo, 1). PyTorch result is (N, 1, Ho, Wo).view(-1,1).squeeze(1);
    # flattening (N, Ho, Wo, 1) row-major gives the identical element order.
    return x.reshape(-1)


if __name__ == "__main__":
    key = jax.random.PRNGKey(0)
    pkey, xkey = jax.random.split(key)
    params = init_params(pkey)

    # Small input consistent with the module: batch=2, 3 channels, 32x32.
    x = jax.random.normal(xkey, (2, 3, 32, 32), jnp.float32)

    fwd = jax.jit(discriminator_forward)
    out = jax.block_until_ready(fwd(x, params))

    # 32 -> 16 -> 8 -> 4 -> 3 -> 2 spatial, Cout=1 => N*1*2*2 elements.
    assert out.shape == (2 * 1 * 2 * 2,), out.shape
    assert bool(jnp.all(jnp.isfinite(out)))
    print("KERNEL_OK")
</pallas_src>

<mosaic_0001>
module attributes {stable_mosaic.version = 11 : i64} {
  func.func @_matmul_bias_act_kernel(%arg0: i32, %arg1: memref<256x128xbf16, #tpu.memory_space<vmem>>, %arg2: memref<128x128xbf16, #tpu.memory_space<vmem>>, %arg3: memref<1x128xf32, #tpu.memory_space<vmem>>, %arg4: memref<256x128xbf16, #tpu.memory_space<vmem>>) attributes {dimension_semantics = [#tpu.dimension_semantics<parallel>], iteration_bounds = array<i64: 2>, scalar_prefetch = 0 : i64, scratch_operands = 0 : i64, tpu.core_type = #tpu.core_type<tc>, window_params = [{transform_indices = @transform_0, window_bounds = array<i64: 256, 128>}, {pipeline_mode = #tpu.pipeline_mode<synchronous>, transform_indices = @transform_1, window_bounds = array<i64: 128, 128>}, {pipeline_mode = #tpu.pipeline_mode<synchronous>, transform_indices = @transform_2, window_bounds = array<i64: 1, 128>}, {transform_indices = @transform_3, window_bounds = array<i64: 256, 128>}]} {
    %c0 = arith.constant 0 : index
    %c0_0 = arith.constant 0 : index
    %0 = vector.load %arg1[%c0, %c0_0] : memref<256x128xbf16, #tpu.memory_space<vmem>>, vector<256x128xbf16>
    %c0_1 = arith.constant 0 : index
    %c0_2 = arith.constant 0 : index
    %1 = vector.load %arg2[%c0_1, %c0_2] : memref<128x128xbf16, #tpu.memory_space<vmem>>, vector<128x128xbf16>
    %cst = arith.constant dense<0.000000e+00> : vector<256x128xf32>
    %2 = tpu.matmul %0, %1, %cst {dimension_numbers = #tpu.dot_dimension_numbers<[1], [0], [0], [1], [0, 0, 1, 1], [], []>} : vector<256x128xbf16>, vector<128x128xbf16>, vector<256x128xf32> -> vector<256x128xf32>
    %c0_3 = arith.constant 0 : index
    %c0_4 = arith.constant 0 : index
    %3 = vector.load %arg3[%c0_3, %c0_4] : memref<1x128xf32, #tpu.memory_space<vmem>>, vector<1x128xf32>
    %4 = vector.broadcast %3 : vector<1x128xf32> to vector<256x128xf32>
    %5 = arith.addf %2, %4 : vector<256x128xf32>
    %cst_5 = arith.constant 0.000000e+00 : f32
    %6 = vector.broadcast %cst_5 : f32 to vector<256x128xf32>
    %7 = arith.cmpf oge, %5, %6 : vector<256x128xf32>
    %cst_6 = arith.constant 2.000000e-01 : f32
    %8 = vector.broadcast %cst_6 : f32 to vector<256x128xf32>
    %9 = arith.mulf %8, %5 : vector<256x128xf32>
    %10 = arith.select %7, %5, %9 : vector<256x128xi1>, vector<256x128xf32>
    %11 = arith.truncf %10 : vector<256x128xf32> to vector<256x128xbf16>
    %c0_7 = arith.constant 0 : index
    %c0_8 = arith.constant 0 : index
    %12 = vector.load %arg4[%c0_7, %c0_8] : memref<256x128xbf16, #tpu.memory_space<vmem>>, vector<256x128xbf16>
    tpu.vector_store %arg4[%c0_7, %c0_8], %11 {strides = array<i32>} : memref<256x128xbf16, #tpu.memory_space<vmem>>, vector<256x128xbf16>,
    return
  }
  func.func @transform_0(%arg0: i32) -> (i32, i32) {
    %c0_i32 = arith.constant 0 : i32
    %c0_i32_0 = arith.constant 0 : i32
    return %arg0, %c0_i32 : i32, i32
  }
  func.func @transform_1(%arg0: i32) -> (i32, i32) {
    %c0_i32 = arith.constant 0 : i32
    %c0_i32_0 = arith.constant 0 : i32
    %c0_i32_1 = arith.constant 0 : i32
    return %c0_i32, %c0_i32_0 : i32, i32
  }
  func.func @transform_2(%arg0: i32) -> (i32, i32) {
    %c0_i32 = arith.constant 0 : i32
    %c0_i32_0 = arith.constant 0 : i32
    %c0_i32_1 = arith.constant 0 : i32
    return %c0_i32, %c0_i32_0 : i32, i32
  }
  func.func @transform_3(%arg0: i32) -> (i32, i32) {
    %c0_i32 = arith.constant 0 : i32
    %c0_i32_0 = arith.constant 0 : i32
    return %arg0, %c0_i32 : i32, i32
  }
}

module attributes {stable_mosaic.version = 11 : i64} {
  func.func @_conv_inorm_lrelu_kernel(%arg0: i32, %arg1: memref<1x64x512xbf16, #tpu.memory_space<vmem>>, %arg2: memref<512x128xbf16, #tpu.memory_space<vmem>>, %arg3: memref<1x128xf32, #tpu.memory_space<vmem>>, %arg4: memref<1x64x128xbf16, #tpu.memory_space<vmem>>) attributes {dimension_semantics = [#tpu.dimension_semantics<parallel>], iteration_bounds = array<i64: 2>, scalar_prefetch = 0 : i64, scratch_operands = 0 : i64, tpu.core_type = #tpu.core_type<tc>, window_params = [{transform_indices = @transform_0, window_bounds = array<i64: 1, 64, 512>}, {pipeline_mode = #tpu.pipeline_mode<synchronous>, transform_indices = @transform_1, window_bounds = array<i64: 512, 128>}, {pipeline_mode = #tpu.pipeline_mode<synchronous>, transform_indices = @transform_2, window_bounds = array<i64: 1, 128>}, {transform_indices = @transform_3, window_bounds = array<i64: 1, 64, 128>}]} {
    %c0 = arith.constant 0 : index
    %c0_0 = arith.constant 0 : index
    %0 = vector.load %arg2[%c0, %c0_0] : memref<512x128xbf16, #tpu.memory_space<vmem>>, vector<512x128xbf16>
    %c0_1 = arith.constant 0 : index
    %c0_2 = arith.constant 0 : index
    %1 = vector.load %arg3[%c0_1, %c0_2] : memref<1x128xf32, #tpu.memory_space<vmem>>, vector<1x128xf32>
    %c0_3 = arith.constant 0 : index
    %c0_4 = arith.constant 0 : index
    %c0_5 = arith.constant 0 : index
    %2 = vector.load %arg1[%c0_3, %c0_4, %c0_5] : memref<1x64x512xbf16, #tpu.memory_space<vmem>>, vector<1x64x512xbf16>
    %3 = vector.shape_cast %2 : vector<1x64x512xbf16> to vector<64x512xbf16>
    %cst = arith.constant dense<0.000000e+00> : vector<64x128xf32>
    %4 = tpu.matmul %3, %0, %cst {dimension_numbers = #tpu.dot_dimension_numbers<[1], [0], [0], [1], [0, 0, 1, 1], [], []>} : vector<64x512xbf16>, vector<512x128xbf16>, vector<64x128xf32> -> vector<64x128xf32>
    %5 = vector.broadcast %1 : vector<1x128xf32> to vector<64x128xf32>
    %6 = arith.addf %4, %5 : vector<64x128xf32>
    %cst_6 = arith.constant dense<0.000000e+00> : vector<128xf32>
    %7 = vector.multi_reduction <add>, %6, %cst_6 [0] : vector<64x128xf32> to vector<128xf32>
    %8 = vector.shape_cast %7 : vector<128xf32> to vector<1x128xf32>
    %cst_7 = arith.constant 1.562500e-02 : f32
    %9 = vector.broadcast %cst_7 : f32 to vector<1x128xf32>
    %10 = arith.mulf %8, %9 : vector<1x128xf32>
    %11 = arith.mulf %6, %6 : vector<64x128xf32>
    %cst_8 = arith.constant dense<0.000000e+00> : vector<128xf32>
    %12 = vector.multi_reduction <add>, %11, %cst_8 [0] : vector<64x128xf32> to vector<128xf32>
    %13 = vector.shape_cast %12 : vector<128xf32> to vector<1x128xf32>
    %cst_9 = arith.constant 1.562500e-02 : f32
    %14 = vector.broadcast %cst_9 : f32 to vector<1x128xf32>
    %15 = arith.mulf %13, %14 : vector<1x128xf32>
    %16 = arith.mulf %10, %10 : vector<1x128xf32>
    %17 = arith.subf %15, %16 : vector<1x128xf32>
    %cst_10 = arith.constant 0.000000e+00 : f32
    %18 = vector.broadcast %cst_10 : f32 to vector<1x128xf32>
    %19 = arith.maximumf %17, %18 : vector<1x128xf32>
    %20 = vector.broadcast %10 : vector<1x128xf32> to vector<64x128xf32>
    %21 = arith.subf %6, %20 : vector<64x128xf32>
    %cst_11 = arith.constant 9.99999974E-6 : f32
    %22 = vector.broadcast %cst_11 : f32 to vector<1x128xf32>
    %23 = arith.addf %19, %22 : vector<1x128xf32>
    %24 = math.rsqrt %23 : vector<1x128xf32>
    %25 = vector.broadcast %24 : vector<1x128xf32> to vector<64x128xf32>
    %26 = arith.mulf %21, %25 : vector<64x128xf32>
    %cst_12 = arith.constant 0.000000e+00 : f32
    %27 = vector.broadcast %cst_12 : f32 to vector<64x128xf32>
    %28 = arith.cmpf oge, %26, %27 : vector<64x128xf32>
    %cst_13 = arith.constant 2.000000e-01 : f32
    %29 = vector.broadcast %cst_13 : f32 to vector<64x128xf32>
    %30 = arith.mulf %29, %26 : vector<64x128xf32>
    %31 = arith.select %28, %26, %30 : vector<64x128xi1>, vector<64x128xf32>
    %32 = arith.truncf %31 : vector<64x128xf32> to vector<64x128xbf16>
    %c0_14 = arith.constant 0 : index
    %c0_15 = arith.constant 0 : index
    %c0_16 = arith.constant 0 : index
    %33 = vector.load %arg4[%c0_14, %c0_15, %c0_16] : memref<1x64x128xbf16, #tpu.memory_space<vmem>>, vector<1x64x128xbf16>
    %34 = vector.shape_cast %33 : vector<1x64x128xbf16> to vector<64x128xbf16>
    %35 = vector.shape_cast %32 : vector<64x128xbf16> to vector<1x64x128xbf16>
    tpu.vector_store %arg4[%c0_14, %c0_15, %c0_16], %35 {strides = array<i32>} : memref<1x64x128xbf16, #tpu.memory_space<vmem>>, vector<1x64x128xbf16>,
    return
  }
  func.func @transform_0(%arg0: i32) -> (i32, i32, i32) {
    %c0_i32 = arith.constant 0 : i32
    %c0_i32_0 = arith.constant 0 : i32
    %c0_i32_1 = arith.constant 0 : i32
    return %arg0, %c0_i32, %c0_i32_0 : i32, i32, i32
  }
  func.func @transform_1(%arg0: i32) -> (i32, i32) {
    %c0_i32 = arith.constant 0 : i32
    %c0_i32_0 = arith.constant 0 : i32
    %c0_i32_1 = arith.constant 0 : i32
    return %c0_i32, %c0_i32_0 : i32, i32
  }
  func.func @transform_2(%arg0: i32) -> (i32, i32) {
    %c0_i32 = arith.constant 0 : i32
    %c0_i32_0 = arith.constant 0 : i32
    %c0_i32_1 = arith.constant 0 : i32
    return %c0_i32, %c0_i32_0 : i32, i32
  }
  func.func @transform_3(%arg0: i32) -> (i32, i32, i32) {
    %c0_i32 = arith.constant 0 : i32
    %c0_i32_0 = arith.constant 0 : i32
    %c0_i32_1 = arith.constant 0 : i32
    return %arg0, %c0_i32, %c0_i32_0 : i32, i32, i32
  }
}

module attributes {stable_mosaic.version = 11 : i64} {
  func.func @_conv_inorm_lrelu_kernel(%arg0: i32, %arg1: memref<1x16x1024xbf16, #tpu.memory_space<vmem>>, %arg2: memref<1024x128xbf16, #tpu.memory_space<vmem>>, %arg3: memref<1x128xf32, #tpu.memory_space<vmem>>, %arg4: memref<1x16x128xbf16, #tpu.memory_space<vmem>>) attributes {dimension_semantics = [#tpu.dimension_semantics<parallel>], iteration_bounds = array<i64: 2>, scalar_prefetch = 0 : i64, scratch_operands = 0 : i64, tpu.core_type = #tpu.core_type<tc>, window_params = [{transform_indices = @transform_0, window_bounds = array<i64: 1, 16, 1024>}, {pipeline_mode = #tpu.pipeline_mode<synchronous>, transform_indices = @transform_1, window_bounds = array<i64: 1024, 128>}, {pipeline_mode = #tpu.pipeline_mode<synchronous>, transform_indices = @transform_2, window_bounds = array<i64: 1, 128>}, {transform_indices = @transform_3, window_bounds = array<i64: 1, 16, 128>}]} {
    %c0 = arith.constant 0 : index
    %c0_0 = arith.constant 0 : index
    %0 = vector.load %arg2[%c0, %c0_0] : memref<1024x128xbf16, #tpu.memory_space<vmem>>, vector<1024x128xbf16>
    %c0_1 = arith.constant 0 : index
    %c0_2 = arith.constant 0 : index
    %1 = vector.load %arg3[%c0_1, %c0_2] : memref<1x128xf32, #tpu.memory_space<vmem>>, vector<1x128xf32>
    %c0_3 = arith.constant 0 : index
    %c0_4 = arith.constant 0 : index
    %c0_5 = arith.constant 0 : index
    %2 = vector.load %arg1[%c0_3, %c0_4, %c0_5] : memref<1x16x1024xbf16, #tpu.memory_space<vmem>>, vector<1x16x1024xbf16>
    %3 = vector.shape_cast %2 : vector<1x16x1024xbf16> to vector<16x1024xbf16>
    %cst = arith.constant dense<0.000000e+00> : vector<16x128xf32>
    %4 = tpu.matmul %3, %0, %cst {dimension_numbers = #tpu.dot_dimension_numbers<[1], [0], [0], [1], [0, 0, 1, 1], [], []>} : vector<16x1024xbf16>, vector<1024x128xbf16>, vector<16x128xf32> -> vector<16x128xf32>
    %5 = vector.broadcast %1 : vector<1x128xf32> to vector<16x128xf32>
    %6 = arith.addf %4, %5 : vector<16x128xf32>
    %cst_6 = arith.constant dense<0.000000e+00> : vector<128xf32>
    %7 = vector.multi_reduction <add>, %6, %cst_6 [0] : vector<16x128xf32> to vector<128xf32>
    %8 = vector.shape_cast %7 : vector<128xf32> to vector<1x128xf32>
    %cst_7 = arith.constant 6.250000e-02 : f32
    %9 = vector.broadcast %cst_7 : f32 to vector<1x128xf32>
    %10 = arith.mulf %8, %9 : vector<1x128xf32>
    %11 = arith.mulf %6, %6 : vector<16x128xf32>
    %cst_8 = arith.constant dense<0.000000e+00> : vector<128xf32>
    %12 = vector.multi_reduction <add>, %11, %cst_8 [0] : vector<16x128xf32> to vector<128xf32>
    %13 = vector.shape_cast %12 : vector<128xf32> to vector<1x128xf32>
    %cst_9 = arith.constant 6.250000e-02 : f32
    %14 = vector.broadcast %cst_9 : f32 to vector<1x128xf32>
    %15 = arith.mulf %13, %14 : vector<1x128xf32>
    %16 = arith.mulf %10, %10 : vector<1x128xf32>
    %17 = arith.subf %15, %16 : vector<1x128xf32>
    %cst_10 = arith.constant 0.000000e+00 : f32
    %18 = vector.broadcast %cst_10 : f32 to vector<1x128xf32>
    %19 = arith.maximumf %17, %18 : vector<1x128xf32>
    %20 = vector.broadcast %10 : vector<1x128xf32> to vector<16x128xf32>
    %21 = arith.subf %6, %20 : vector<16x128xf32>
    %cst_11 = arith.constant 9.99999974E-6 : f32
    %22 = vector.broadcast %cst_11 : f32 to vector<1x128xf32>
    %23 = arith.addf %19, %22 : vector<1x128xf32>
    %24 = math.rsqrt %23 : vector<1x128xf32>
    %25 = vector.broadcast %24 : vector<1x128xf32> to vector<16x128xf32>
    %26 = arith.mulf %21, %25 : vector<16x128xf32>
    %cst_12 = arith.constant 0.000000e+00 : f32
    %27 = vector.broadcast %cst_12 : f32 to vector<16x128xf32>
    %28 = arith.cmpf oge, %26, %27 : vector<16x128xf32>
    %cst_13 = arith.constant 2.000000e-01 : f32
    %29 = vector.broadcast %cst_13 : f32 to vector<16x128xf32>
    %30 = arith.mulf %29, %26 : vector<16x128xf32>
    %31 = arith.select %28, %26, %30 : vector<16x128xi1>, vector<16x128xf32>
    %32 = arith.truncf %31 : vector<16x128xf32> to vector<16x128xbf16>
    %c0_14 = arith.constant 0 : index
    %c0_15 = arith.constant 0 : index
    %c0_16 = arith.constant 0 : index
    %33 = vector.load %arg4[%c0_14, %c0_15, %c0_16] : memref<1x16x128xbf16, #tpu.memory_space<vmem>>, vector<1x16x128xbf16>
    %34 = vector.shape_cast %33 : vector<1x16x128xbf16> to vector<16x128xbf16>
    %35 = vector.shape_cast %32 : vector<16x128xbf16> to vector<1x16x128xbf16>
    tpu.vector_store %arg4[%c0_14, %c0_15, %c0_16], %35 {strides = array<i32>} : memref<1x16x128xbf16, #tpu.memory_space<vmem>>, vector<1x16x128xbf16>,
    return
  }
  func.func @transform_0(%arg0: i32) -> (i32, i32, i32) {
    %c0_i32 = arith.constant 0 : i32
    %c0_i32_0 = arith.constant 0 : i32
    %c0_i32_1 = arith.constant 0 : i32
    return %arg0, %c0_i32, %c0_i32_0 : i32, i32, i32
  }
  func.func @transform_1(%arg0: i32) -> (i32, i32) {
    %c0_i32 = arith.constant 0 : i32
    %c0_i32_0 = arith.constant 0 : i32
    %c0_i32_1 = arith.constant 0 : i32
    return %c0_i32, %c0_i32_0 : i32, i32
  }
  func.func @transform_2(%arg0: i32) -> (i32, i32) {
    %c0_i32 = arith.constant 0 : i32
    %c0_i32_0 = arith.constant 0 : i32
    %c0_i32_1 = arith.constant 0 : i32
    return %c0_i32, %c0_i32_0 : i32, i32
  }
  func.func @transform_3(%arg0: i32) -> (i32, i32, i32) {
    %c0_i32 = arith.constant 0 : i32
    %c0_i32_0 = arith.constant 0 : i32
    %c0_i32_1 = arith.constant 0 : i32
    return %arg0, %c0_i32, %c0_i32_0 : i32, i32, i32
  }
}

module attributes {stable_mosaic.version = 11 : i64} {
  func.func @_conv_inorm_lrelu_kernel(%arg0: i32, %arg1: memref<1x9x2048xbf16, #tpu.memory_space<vmem>>, %arg2: memref<2048x256xbf16, #tpu.memory_space<vmem>>, %arg3: memref<1x256xf32, #tpu.memory_space<vmem>>, %arg4: memref<1x9x256xbf16, #tpu.memory_space<vmem>>) attributes {dimension_semantics = [#tpu.dimension_semantics<parallel>], iteration_bounds = array<i64: 2>, scalar_prefetch = 0 : i64, scratch_operands = 0 : i64, tpu.core_type = #tpu.core_type<tc>, window_params = [{transform_indices = @transform_0, window_bounds = array<i64: 1, 9, 2048>}, {pipeline_mode = #tpu.pipeline_mode<synchronous>, transform_indices = @transform_1, window_bounds = array<i64: 2048, 256>}, {pipeline_mode = #tpu.pipeline_mode<synchronous>, transform_indices = @transform_2, window_bounds = array<i64: 1, 256>}, {transform_indices = @transform_3, window_bounds = array<i64: 1, 9, 256>}]} {
    %c0 = arith.constant 0 : index
    %c0_0 = arith.constant 0 : index
    %0 = vector.load %arg2[%c0, %c0_0] : memref<2048x256xbf16, #tpu.memory_space<vmem>>, vector<2048x256xbf16>
    %c0_1 = arith.constant 0 : index
    %c0_2 = arith.constant 0 : index
    %1 = vector.load %arg3[%c0_1, %c0_2] : memref<1x256xf32, #tpu.memory_space<vmem>>, vector<1x256xf32>
    %c0_3 = arith.constant 0 : index
    %c0_4 = arith.constant 0 : index
    %c0_5 = arith.constant 0 : index
    %2 = vector.load %arg1[%c0_3, %c0_4, %c0_5] : memref<1x9x2048xbf16, #tpu.memory_space<vmem>>, vector<1x9x2048xbf16>
    %3 = vector.shape_cast %2 : vector<1x9x2048xbf16> to vector<9x2048xbf16>
    %cst = arith.constant dense<0.000000e+00> : vector<9x256xf32>
    %4 = tpu.matmul %3, %0, %cst {dimension_numbers = #tpu.dot_dimension_numbers<[1], [0], [0], [1], [0, 0, 1, 1], [], []>} : vector<9x2048xbf16>, vector<2048x256xbf16>, vector<9x256xf32> -> vector<9x256xf32>
    %5 = vector.broadcast %1 : vector<1x256xf32> to vector<9x256xf32>
    %6 = arith.addf %4, %5 : vector<9x256xf32>
    %cst_6 = arith.constant dense<0.000000e+00> : vector<256xf32>
    %7 = vector.multi_reduction <add>, %6, %cst_6 [0] : vector<9x256xf32> to vector<256xf32>
    %8 = vector.shape_cast %7 : vector<256xf32> to vector<1x256xf32>
    %cst_7 = arith.constant 0.111111112 : f32
    %9 = vector.broadcast %cst_7 : f32 to vector<1x256xf32>
    %10 = arith.mulf %8, %9 : vector<1x256xf32>
    %11 = arith.mulf %6, %6 : vector<9x256xf32>
    %cst_8 = arith.constant dense<0.000000e+00> : vector<256xf32>
    %12 = vector.multi_reduction <add>, %11, %cst_8 [0] : vector<9x256xf32> to vector<256xf32>
    %13 = vector.shape_cast %12 : vector<256xf32> to vector<1x256xf32>
    %cst_9 = arith.constant 0.111111112 : f32
    %14 = vector.broadcast %cst_9 : f32 to vector<1x256xf32>
    %15 = arith.mulf %13, %14 : vector<1x256xf32>
    %16 = arith.mulf %10, %10 : vector<1x256xf32>
    %17 = arith.subf %15, %16 : vector<1x256xf32>
    %cst_10 = arith.constant 0.000000e+00 : f32
    %18 = vector.broadcast %cst_10 : f32 to vector<1x256xf32>
    %19 = arith.maximumf %17, %18 : vector<1x256xf32>
    %20 = vector.broadcast %10 : vector<1x256xf32> to vector<9x256xf32>
    %21 = arith.subf %6, %20 : vector<9x256xf32>
    %cst_11 = arith.constant 9.99999974E-6 : f32
    %22 = vector.broadcast %cst_11 : f32 to vector<1x256xf32>
    %23 = arith.addf %19, %22 : vector<1x256xf32>
    %24 = math.rsqrt %23 : vector<1x256xf32>
    %25 = vector.broadcast %24 : vector<1x256xf32> to vector<9x256xf32>
    %26 = arith.mulf %21, %25 : vector<9x256xf32>
    %cst_12 = arith.constant 0.000000e+00 : f32
    %27 = vector.broadcast %cst_12 : f32 to vector<9x256xf32>
    %28 = arith.cmpf oge, %26, %27 : vector<9x256xf32>
    %cst_13 = arith.constant 2.000000e-01 : f32
    %29 = vector.broadcast %cst_13 : f32 to vector<9x256xf32>
    %30 = arith.mulf %29, %26 : vector<9x256xf32>
    %31 = arith.select %28, %26, %30 : vector<9x256xi1>, vector<9x256xf32>
    %32 = arith.truncf %31 : vector<9x256xf32> to vector<9x256xbf16>
    %c0_14 = arith.constant 0 : index
    %c0_15 = arith.constant 0 : index
    %c0_16 = arith.constant 0 : index
    %33 = vector.load %arg4[%c0_14, %c0_15, %c0_16] : memref<1x9x256xbf16, #tpu.memory_space<vmem>>, vector<1x9x256xbf16>
    %34 = vector.shape_cast %33 : vector<1x9x256xbf16> to vector<9x256xbf16>
    %35 = vector.shape_cast %32 : vector<9x256xbf16> to vector<1x9x256xbf16>
    tpu.vector_store %arg4[%c0_14, %c0_15, %c0_16], %35 {strides = array<i32>} : memref<1x9x256xbf16, #tpu.memory_space<vmem>>, vector<1x9x256xbf16>,
    return
  }
  func.func @transform_0(%arg0: i32) -> (i32, i32, i32) {
    %c0_i32 = arith.constant 0 : i32
    %c0_i32_0 = arith.constant 0 : i32
    %c0_i32_1 = arith.constant 0 : i32
    return %arg0, %c0_i32, %c0_i32_0 : i32, i32, i32
  }
  func.func @transform_1(%arg0: i32) -> (i32, i32) {
    %c0_i32 = arith.constant 0 : i32
    %c0_i32_0 = arith.constant 0 : i32
    %c0_i32_1 = arith.constant 0 : i32
    return %c0_i32, %c0_i32_0 : i32, i32
  }
  func.func @transform_2(%arg0: i32) -> (i32, i32) {
    %c0_i32 = arith.constant 0 : i32
    %c0_i32_0 = arith.constant 0 : i32
    %c0_i32_1 = arith.constant 0 : i32
    return %c0_i32, %c0_i32_0 : i32, i32
  }
  func.func @transform_3(%arg0: i32) -> (i32, i32, i32) {
    %c0_i32 = arith.constant 0 : i32
    %c0_i32_0 = arith.constant 0 : i32
    %c0_i32_1 = arith.constant 0 : i32
    return %arg0, %c0_i32, %c0_i32_0 : i32, i32, i32
  }
}

module attributes {stable_mosaic.version = 11 : i64} {
  func.func @_matmul_bias_act_kernel(%arg0: i32, %arg1: memref<8x4096xbf16, #tpu.memory_space<vmem>>, %arg2: memref<4096x128xbf16, #tpu.memory_space<vmem>>, %arg3: memref<1x128xf32, #tpu.memory_space<vmem>>, %arg4: memref<8x128xf32, #tpu.memory_space<vmem>>) attributes {dimension_semantics = [#tpu.dimension_semantics<parallel>], iteration_bounds = array<i64: 1>, scalar_prefetch = 0 : i64, scratch_operands = 0 : i64, tpu.core_type = #tpu.core_type<tc>, window_params = [{transform_indices = @transform_0, window_bounds = array<i64: 8, 4096>}, {pipeline_mode = #tpu.pipeline_mode<synchronous>, transform_indices = @transform_1, window_bounds = array<i64: 4096, 128>}, {pipeline_mode = #tpu.pipeline_mode<synchronous>, transform_indices = @transform_2, window_bounds = array<i64: 1, 128>}, {transform_indices = @transform_3, window_bounds = array<i64: 8, 128>}]} {
    %c0 = arith.constant 0 : index
    %c0_0 = arith.constant 0 : index
    %0 = vector.load %arg1[%c0, %c0_0] : memref<8x4096xbf16, #tpu.memory_space<vmem>>, vector<8x4096xbf16>
    %c0_1 = arith.constant 0 : index
    %c0_2 = arith.constant 0 : index
    %1 = vector.load %arg2[%c0_1, %c0_2] : memref<4096x128xbf16, #tpu.memory_space<vmem>>, vector<4096x128xbf16>
    %cst = arith.constant dense<0.000000e+00> : vector<8x128xf32>
    %2 = tpu.matmul %0, %1, %cst {dimension_numbers = #tpu.dot_dimension_numbers<[1], [0], [0], [1], [0, 0, 1, 1], [], []>} : vector<8x4096xbf16>, vector<4096x128xbf16>, vector<8x128xf32> -> vector<8x128xf32>
    %c0_3 = arith.constant 0 : index
    %c0_4 = arith.constant 0 : index
    %3 = vector.load %arg3[%c0_3, %c0_4] : memref<1x128xf32, #tpu.memory_space<vmem>>, vector<1x128xf32>
    %4 = vector.broadcast %3 : vector<1x128xf32> to vector<8x128xf32>
    %5 = arith.addf %2, %4 : vector<8x128xf32>
    %c0_5 = arith.constant 0 : index
    %c0_6 = arith.constant 0 : index
    %6 = vector.load %arg4[%c0_5, %c0_6] : memref<8x128xf32, #tpu.memory_space<vmem>>, vector<8x128xf32>
    tpu.vector_store %arg4[%c0_5, %c0_6], %5 {strides = array<i32>} : memref<8x128xf32, #tpu.memory_space<vmem>>, vector<8x128xf32>,
    return
  }
  func.func @transform_0(%arg0: i32) -> (i32, i32) {
    %c0_i32 = arith.constant 0 : i32
    %c0_i32_0 = arith.constant 0 : i32
    return %arg0, %c0_i32 : i32, i32
  }
  func.func @transform_1(%arg0: i32) -> (i32, i32) {
    %c0_i32 = arith.constant 0 : i32
    %c0_i32_0 = arith.constant 0 : i32
    %c0_i32_1 = arith.constant 0 : i32
    return %c0_i32, %c0_i32_0 : i32, i32
  }
  func.func @transform_2(%arg0: i32) -> (i32, i32) {
    %c0_i32 = arith.constant 0 : i32
    %c0_i32_0 = arith.constant 0 : i32
    %c0_i32_1 = arith.constant 0 : i32
    return %c0_i32, %c0_i32_0 : i32, i32
  }
  func.func @transform_3(%arg0: i32) -> (i32, i32) {
    %c0_i32 = arith.constant 0 : i32
    %c0_i32_0 = arith.constant 0 : i32
    return %arg0, %c0_i32 : i32, i32
  }
}

</mosaic_0001>

<bundles_post_ra>
// kernel: discriminator_forward.5
= control target key start
LH: loop header
LB: loop body
LE: loop exit
PB: predicated region body
PF: predicated region fallthrough
CT: control target
= control target key end

     0   :  { %s1190_s12 = smov 0   ;;  %s1315_s0 = inlined_call_operand.vmem [shape: bf16[512,128], index: 0, kind: input, shape index: {}]   ;;  %s1316_s1 = inlined_call_operand.vmem [shape: bf16[128,128], index: 1, kind: input, shape index: {}]   ;;  %s1317_s2 = inlined_call_operand.vmem [shape: f32[1,128], index: 2, kind: input, shape index: {}]   ;;  %s1318_s3 = inlined_call_operand.vmem [shape: bf16[512,128], index: 3, kind: output, shape index: {}]  }
   0x1 LB: > { %s847_s13 = sadd.s32 4294967295, %s1168_s12   ;;  %p851_p0 = scmp.ge.s32.totalorder %s1168_s12, 1  ;;  %s1168_s12 = sphi %s1190_s12, %s13_s12  }
   0x2   : > { %p138_p1 = scmp.lt.s32.totalorder %s1168_s12, 3 }
   0x4   : > { %p139_p2 = pnand %p851_p0, %p138_p1 }
   0x5   : > { %s852_s16 = sshll.u32 (!%p139_p2), %s847_s13, 5 }
   0x6   : > { %142 = sbr.rel (%p139_p2) target bundleno = 279 (0x117), region = 32  ;;  %p163_p3 = scmp.lt.s32.totalorder (!%p139_p2), %s852_s16, 63 }
   0xb   : > { %v1138_v0 = vld [vmem:[%s1316_s1 + $0x38] sm:$0xff]   ;;  %v1139_v1 = vld [vmem:[%s1316_s1 + $0x30] sm:$0xff]   ;;  %s1320_s16 = smov (!%p163_p3, %s852_s16), 63  ;;  %v1140_v2 = vld [vmem:[%s1316_s1 + $0x28] sm:$0xff]  }
   0xc   : > { %1066 = vmatprep.subr.bf16.mxu0 %v1138_v0  ;;  %1114 = vmatprep.subr.bf16.mxu1 %v1138_v0  ;;  %s853_s21 = sshll.u32 %s1320_s16, 2  ;;  %v1141_v3 = vld [vmem:[%s1316_s1 + $0x20] sm:$0xff]   ;;  %v1142_v6 = vld [vmem:[%s1316_s1 + $0x18] sm:$0xff]   ;;  %v1143_v7 = vld [vmem:[%s1316_s1 + $0x10] sm:$0xff]  }
   0xd   : > { %1067 = vmatpush3.bf16.msra.mxu0 %v1138_v0  ;;  %1122 = vmatpush3.bf16.msra.mxu1 %v1138_v0  ;;  %s1215_s24 = scalar_lea.vmem %s1315_s0, %s853_s21  ;;  %v1144_v8 = vld [vmem:[%s1316_s1 + $0x8] sm:$0xff]   ;;  %v1145_v9 = vld [vmem:[%s1316_s1] sm:$0xff]   ;;  %s1266_s13 = scalar_lea.vmem %s1318_s3, %s853_s21 }
   0xe   : > { %1068 = vmatprep.subr.bf16.mxu0 %v1139_v1  ;;  %1115 = vmatprep.subr.bf16.mxu1 %v1139_v1  ;;  %v1146_v4 = vld [vmem:[%s1215_s24] sm:$0xff]   ;;  %v1148_v10 = vld [vmem:[%s1215_s24 + $0x8] sm:$0xff]   ;;  %v1150_v12 = vld [vmem:[%s1215_s24 + $0x10] sm:$0xff]  }
   0xf   : > { %v1147_v5 = vld [vmem:[%s1215_s24 + $0x40] sm:$0xff]   ;;  %1082 = vmatprep.mubr.bf16.mxu0 %v1146_v4  ;;  %v1149_v11 = vld [vmem:[%s1215_s24 + $0x48] sm:$0xff]   ;;  %v1151_v13 = vld [vmem:[%s1215_s24 + $0x50] sm:$0xff]  }
  0x10   : > { %1098 = vmatprep.mubr.bf16.mxu1 %v1147_v5  ;;  %v1152_v14 = vld [vmem:[%s1215_s24 + $0x18] sm:$0xff]   ;;  %v1154_v16 = vld [vmem:[%s1215_s24 + $0x20] sm:$0xff]   ;;  %v1156_v18 = vld [vmem:[%s1215_s24 + $0x28] sm:$0xff]  }
  0x11   : > { %1069 = vmatpush3.bf16.msra.mxu0 %v1139_v1  ;;  %1123 = vmatpush3.bf16.msra.mxu1 %v1139_v1  ;;  %v1153_v15 = vld [vmem:[%s1215_s24 + $0x58] sm:$0xff]   ;;  %v1155_v17 = vld [vmem:[%s1215_s24 + $0x60] sm:$0xff]   ;;  %v1157_v19 = vld [vmem:[%s1215_s24 + $0x68] sm:$0xff]  }
  0x12   : > { %1070 = vmatprep.subr.bf16.mxu0 %v1140_v2  ;;  %1116 = vmatprep.subr.bf16.mxu1 %v1140_v2  ;;  %v1158_v20 = vld [vmem:[%s1215_s24 + $0x30] sm:$0xff]   ;;  %v1160_v22 = vld [vmem:[%s1215_s24 + $0x38] sm:$0xff]   ;;  %v1251_v24 = vld [vmem:[%s1317_s2] ss:$0 sm:$0xff] }
  0x13   : > { %v1159_v21 = vld [vmem:[%s1215_s24 + $0x70] sm:$0xff]   ;;  %v1161_v23 = vld [vmem:[%s1215_s24 + $0x78] sm:$0xff]  }
  0x15   : > { %1071 = vmatpush3.bf16.msra.mxu0 %v1140_v2  ;;  %1124 = vmatpush3.bf16.msra.mxu1 %v1140_v2 }
  0x16   : > { %1072 = vmatprep.subr.bf16.mxu0 %v1141_v3  ;;  %1117 = vmatprep.subr.bf16.mxu1 %v1141_v3 }
  0x19   : > { %1073 = vmatpush3.bf16.msra.mxu0 %v1141_v3  ;;  %1125 = vmatpush3.bf16.msra.mxu1 %v1141_v3 }
  0x1a   : > { %1074 = vmatprep.subr.bf16.mxu0 %v1142_v6  ;;  %1118 = vmatprep.subr.bf16.mxu1 %v1142_v6 }
  0x1d   : > { %1075 = vmatpush3.bf16.msra.mxu0 %v1142_v6  ;;  %1126 = vmatpush3.bf16.msra.mxu1 %v1142_v6 }
  0x1e   : > { %1076 = vmatprep.subr.bf16.mxu0 %v1143_v7  ;;  %1119 = vmatprep.subr.bf16.mxu1 %v1143_v7 }
  0x21   : > { %1077 = vmatpush3.bf16.msra.mxu0 %v1143_v7  ;;  %1127 = vmatpush3.bf16.msra.mxu1 %v1143_v7 }
  0x22   : > { %1078 = vmatprep.subr.bf16.mxu0 %v1144_v8  ;;  %1120 = vmatprep.subr.bf16.mxu1 %v1144_v8 }
  0x25   : > { %1079 = vmatpush3.bf16.msra.mxu0 %v1144_v8  ;;  %1128 = vmatpush3.bf16.msra.mxu1 %v1144_v8 }
  0x26   : > { %1080 = vmatprep.subr.bf16.mxu0 %v1145_v9  ;;  %1121 = vmatprep.subr.bf16.mxu1 %v1145_v9 }
  0x29   : > { %1081 = vmatpush3.bf16.msra.mxu0 %v1145_v9  ;;  %1129 = vmatpush3.bf16.msra.mxu1 %v1145_v9 }
  0x2c   : > { %1083 = vmatmul.mubr.bf16.vlgmr.msra.gmra.mxu0 %v1148_v10  ;;  %1099 = vmatmul.mubr.bf16.vlgmr.msra.gmra.mxu1 %v1149_v11 }
  0x2d   : > { %1086 = vmatprep.mubr.bf16.mxu0 %v1150_v12  ;;  %1102 = vmatprep.mubr.bf16.mxu1 %v1151_v13 }
  0x34   : > { %1087 = vmatmul.mubr.bf16.gmra.mxu0 %v1152_v14  ;;  %1103 = vmatmul.mubr.bf16.gmra.mxu1 %v1153_v15 }
  0x35   : > { %1090 = vmatprep.mubr.bf16.mxu0 %v1154_v16  ;;  %1106 = vmatprep.mubr.bf16.mxu1 %v1155_v17 }
  0x3c   : > { %1091 = vmatmul.mubr.bf16.gmra.mxu0 %v1156_v18  ;;  %1107 = vmatmul.mubr.bf16.gmra.mxu1 %v1157_v19 }
  0x3d   : > { %1094 = vmatprep.mubr.bf16.mxu0 %v1158_v20  ;;  %1110 = vmatprep.mubr.bf16.mxu1 %v1159_v21 }
  0x44   : > { %1095 = vmatmul.mubr.bf16.gmra.mxu0 %v1160_v22  ;;  %1111 = vmatmul.mubr.bf16.gmra.mxu1 %v1161_v23 }
  0xec   : > { %v1084_v25 = vpop.f32.mrf.mxu0  ;;  %v1100_v26 = vpop.f32.mrf.mxu1 }
  0xed   : > { %v417_v27 = vadd.f32 %v1084_v25, %v1251_v24  ;;  %v481_v28 = vadd.f32 %v1100_v26, %v1251_v24 }
  0xee   : > { %v408_v29 = vpop.f32.mrf.mxu0  ;;  %v472_v30 = vpop.f32.mrf.mxu1 }
  0xef   : > { %vm537_vm0 = vcmp.ge.f32.partialorder %v417_v27, 0.0  ;;  %v569_v31 = vmul.f32 0.2, %v417_v27  ;;  %vm553_vm1 = vcmp.ge.f32.partialorder %v481_v28, 0.0  ;;  %v585_v32 = vmul.f32 0.2, %v481_v28 }
  0xf0   : > { %v409_v33 = vadd.f32 %v1251_v24, %v408_v29  ;;  %v473_v34 = vadd.f32 %v1251_v24, %v472_v30  ;;  %v1085_v35 = vpop.f32.mrf.mxu0  ;;  %v1101_v36 = vpop.f32.mrf.mxu1 }
  0xf1   : > { %v601_v37 = vsel %vm537_vm0, %v417_v27, %v569_v31  ;;  %v420_v38 = vadd.f32 %v1085_v35, %v1251_v24  ;;  %v484_v39 = vadd.f32 %v1101_v36, %v1251_v24  ;;  %v617_v40 = vsel %vm553_vm1, %v481_v28, %v585_v32 }
  0xf2   : > { %vm535_vm2 = vcmp.ge.f32.partialorder %v409_v33, 0.0  ;;  %v567_v41 = vmul.f32 0.2, %v409_v33  ;;  %vm551_vm3 = vcmp.ge.f32.partialorder %v473_v34, 0.0  ;;  %v411_v42 = vpop.f32.mrf.mxu0  ;;  %v475_v43 = vpop.f32.mrf.mxu1  ;;  %v583_v47 = vmul.f32 0.2, %v473_v34 }
  0xf3   : > { %vm538_vm4 = vcmp.ge.f32.partialorder %v420_v38, 0.0  ;;  %v570_v44 = vmul.f32 0.2, %v420_v38  ;;  %vm554_vm5 = vcmp.ge.f32.partialorder %v484_v39, 0.0  ;;  %v586_v45 = vmul.f32 0.2, %v484_v39 }
  0xf4   : > { %v599_v46 = vsel %vm535_vm2, %v409_v33, %v567_v41  ;;  %v412_v48 = vadd.f32 %v1251_v24, %v411_v42  ;;  %v476_v49 = vadd.f32 %v1251_v24, %v475_v43  ;;  %v1088_v50 = vpop.f32.mrf.mxu0  ;;  %v1104_v51 = vpop.f32.mrf.mxu1  ;;  %v615_v63 = vsel %vm551_vm3, %v473_v34, %v583_v47 }
  0xf5   : > { %v602_v52 = vsel %vm538_vm4, %v420_v38, %v570_v44  ;;  %v618_v53 = vsel %vm554_vm5, %v484_v39, %v586_v45  ;;  %v433_v54 = vadd.f32 %v1088_v50, %v1251_v24  ;;  %v497_v55 = vadd.f32 %v1104_v51, %v1251_v24 }
  0xf6   : > { %v955_v56 = vpack.c.bf16 %v602_v52, %v601_v37  ;;  %v995_v57 = vpack.c.bf16 %v618_v53, %v617_v40  ;;  %vm536_vm6 = vcmp.ge.f32.partialorder %v412_v48, 0.0  ;;  %v568_v58 = vmul.f32 0.2, %v412_v48  ;;  %v424_v59 = vpop.f32.mrf.mxu0  ;;  %v488_v60 = vpop.f32.mrf.mxu1 }
  0xf7   : > { %vm552_vm7 = vcmp.ge.f32.partialorder %v476_v49, 0.0  ;;  %v584_v61 = vmul.f32 0.2, %v476_v49  ;;  %vm541_vm8 = vcmp.ge.f32.partialorder %v433_v54, 0.0  ;;  %v573_v62 = vmul.f32 0.2, %v433_v54 }
  0xf8   : > { %1027 = vst [vmem:[%s1266_s13 + $0x8] sm:$0xff] %v955_v56   ;;  %1035 = vst [vmem:[%s1266_s13 + $0x48] sm:$0xff] %v995_v57   ;;  %v600_v0 = vsel %vm536_vm6, %v412_v48, %v568_v58  ;;  %v589_v1 = vmul.f32 0.2, %v497_v55  ;;  %v425_v2 = vadd.f32 %v1251_v24, %v424_v59  ;;  %v1089_v3 = vpop.f32.mrf.mxu0  ;;  %v1105_v4 = vpop.f32.mrf.mxu1  ;;  %vm557_vm9 = vcmp.ge.f32.partialorder %v497_v55, 0.0 }
  0xf9   : > { %v950_v5 = vpack.c.bf16 %v600_v0, %v599_v46  ;;  %v616_v6 = vsel %vm552_vm7, %v476_v49, %v584_v61  ;;  %v489_v7 = vadd.f32 %v1251_v24, %v488_v60  ;;  %v605_v9 = vsel %vm541_vm8, %v433_v54, %v573_v62 }
  0xfa   : > { %v990_v8 = vpack.c.bf16 %v616_v6, %v615_v63  ;;  %vm539_vm10 = vcmp.ge.f32.partialorder %v425_v2, 0.0  ;;  %v571_v10 = vmul.f32 0.2, %v425_v2  ;;  %v427_v11 = vpop.f32.mrf.mxu0  ;;  %v491_v12 = vpop.f32.mrf.mxu1  ;;  %v436_v14 = vadd.f32 %v1089_v3, %v1251_v24 }
  0xfb   : > { %951 = vst [vmem:[%s1266_s13] sm:$0xff] %v950_v5   ;;  %vm555_vm11 = vcmp.ge.f32.partialorder %v489_v7, 0.0  ;;  %v587_v13 = vmul.f32 0.2, %v489_v7  ;;  %v500_v15 = vadd.f32 %v1105_v4, %v1251_v24  ;;  %v621_v16 = vsel %vm557_vm9, %v497_v55, %v589_v1 }
  0xfc   : > { %1034 = vst [vmem:[%s1266_s13 + $0x40] sm:$0xff] %v990_v8   ;;  %v603_v17 = vsel %vm539_vm10, %v425_v2, %v571_v10  ;;  %v428_v18 = vadd.f32 %v1251_v24, %v427_v11  ;;  %v492_v19 = vadd.f32 %v1251_v24, %v491_v12  ;;  %v1092_v20 = vpop.f32.mrf.mxu0  ;;  %v1108_v21 = vpop.f32.mrf.mxu1  ;;  %vm542_vm12 = vcmp.ge.f32.partialorder %v436_v14, 0.0 }
  0xfd   : > { %v619_v22 = vsel %vm555_vm11, %v489_v7, %v587_v13  ;;  %v574_v23 = vmul.f32 0.2, %v436_v14  ;;  %vm558_vm13 = vcmp.ge.f32.partialorder %v500_v15, 0.0  ;;  %v590_v25 = vmul.f32 0.2, %v500_v15 }
  0xfe   : > { %vm540_vm14 = vcmp.ge.f32.partialorder %v428_v18, 0.0  ;;  %v572_v26 = vmul.f32 0.2, %v428_v18  ;;  %vm556_vm15 = vcmp.ge.f32.partialorder %v492_v19, 0.0  ;;  %v440_v27 = vpop.f32.mrf.mxu0  ;;  %v504_v28 = vpop.f32.mrf.mxu1  ;;  %v588_v30 = vmul.f32 0.2, %v492_v19 }
  0xff   : > { %v606_v29 = vsel %vm542_vm12, %v436_v14, %v574_v23  ;;  %v449_v31 = vadd.f32 %v1092_v20, %v1251_v24  ;;  %v513_v32 = vadd.f32 %v1108_v21, %v1251_v24  ;;  %v622_v34 = vsel %vm558_vm13, %v500_v15, %v590_v25 }
 0x100   : > { %v965_v33 = vpack.c.bf16 %v606_v29, %v605_v9  ;;  %v604_v35 = vsel %vm540_vm14, %v428_v18, %v572_v26  ;;  %v441_v36 = vadd.f32 %v1251_v24, %v440_v27  ;;  %v1093_v37 = vpop.f32.mrf.mxu0  ;;  %v1109_v38 = vpop.f32.mrf.mxu1  ;;  %v1005_v39 = vpack.c.bf16 %v622_v34, %v621_v16 }
 0x101   : > { %v960_v40 = vpack.c.bf16 %v604_v35, %v603_v17  ;;  %v620_v41 = vsel %vm556_vm15, %v492_v19, %v588_v30  ;;  %vm545_vm0 = vcmp.ge.f32.partialorder %v449_v31, 0.0  ;;  %v577_v43 = vmul.f32 0.2, %v449_v31 }
 0x102   : > { %1029 = vst [vmem:[%s1266_s13 + $0x18] sm:$0xff] %v965_v33   ;;  %v1000_v42 = vpack.c.bf16 %v620_v41, %v619_v22  ;;  %vm561_vm1 = vcmp.ge.f32.partialorder %v513_v32, 0.0  ;;  %v593_v44 = vmul.f32 0.2, %v513_v32  ;;  %v443_v45 = vpop.f32.mrf.mxu0  ;;  %v507_v46 = vpop.f32.mrf.mxu1  ;;  %1037 = vst [vmem:[%s1266_s13 + $0x58] sm:$0xff] %v1005_v39   ;;  %vm543_vm2 = vcmp.ge.f32.partialorder %v441_v36, 0.0 }
 0x103   : > { %1028 = vst [vmem:[%s1266_s13 + $0x10] sm:$0xff] %v960_v40   ;;  %v575_v47 = vmul.f32 0.2, %v441_v36  ;;  %v505_v48 = vadd.f32 %v1251_v24, %v504_v28  ;;  %v452_v49 = vadd.f32 %v1093_v37, %v1251_v24  ;;  %v609_v50 = vsel %vm545_vm0, %v449_v31, %v577_v43 }
 0x104   : > { %1036 = vst [vmem:[%s1266_s13 + $0x50] sm:$0xff] %v1000_v42   ;;  %v516_v51 = vadd.f32 %v1109_v38, %v1251_v24  ;;  %v444_v52 = vadd.f32 %v1251_v24, %v443_v45  ;;  %v1096_v53 = vpop.f32.mrf.mxu0  ;;  %v1112_v54 = vpop.f32.mrf.mxu1  ;;  %v625_v55 = vsel %vm561_vm1, %v513_v32, %v593_v44  ;;  %v508_v63 = vadd.f32 %v1251_v24, %v507_v46 }
 0x105   : > { %v607_v56 = vsel %vm543_vm2, %v441_v36, %v575_v47  ;;  %vm559_vm3 = vcmp.ge.f32.partialorder %v505_v48, 0.0  ;;  %vm546_vm4 = vcmp.ge.f32.partialorder %v452_v49, 0.0  ;;  %v578_v57 = vmul.f32 0.2, %v452_v49 }
 0x106   : > { %vm562_vm5 = vcmp.ge.f32.partialorder %v516_v51, 0.0  ;;  %v594_v58 = vmul.f32 0.2, %v516_v51  ;;  %vm544_vm6 = vcmp.ge.f32.partialorder %v444_v52, 0.0  ;;  %v456_v59 = vpop.f32.mrf.mxu0  ;;  %v520_v60 = vpop.f32.mrf.mxu1  ;;  %v591_v61 = vmul.f32 0.2, %v505_v48 }
 0x107   : > { %v576_v62 = vmul.f32 0.2, %v444_v52  ;;  %v465_v0 = vadd.f32 %v1096_v53, %v1251_v24  ;;  %v610_v1 = vsel %vm546_vm4, %v452_v49, %v578_v57  ;;  %v529_v3 = vadd.f32 %v1112_v54, %v1251_v24 }
 0x108   : > { %v626_v2 = vsel %vm562_vm5, %v516_v51, %v594_v58  ;;  %v457_v4 = vadd.f32 %v1251_v24, %v456_v59  ;;  %v1097_v5 = vpop.f32.mrf.mxu0  ;;  %v1113_v6 = vpop.f32.mrf.mxu1  ;;  %v975_v7 = vpack.c.bf16 %v610_v1, %v609_v50  ;;  %vm560_vm7 = vcmp.ge.f32.partialorder %v508_v63, 0.0 }
 0x109   : > { %v1015_v8 = vpack.c.bf16 %v626_v2, %v625_v55  ;;  %v608_v9 = vsel %vm544_vm6, %v444_v52, %v576_v62  ;;  %v592_v11 = vmul.f32 0.2, %v508_v63  ;;  %v581_v12 = vmul.f32 0.2, %v465_v0 }
 0x10a   : > { %v970_v10 = vpack.c.bf16 %v608_v9, %v607_v56  ;;  %v623_v13 = vsel %vm559_vm3, %v505_v48, %v591_v61  ;;  %1031 = vst [vmem:[%s1266_s13 + $0x28] sm:$0xff] %v975_v7   ;;  %vm549_vm8 = vcmp.ge.f32.partialorder %v465_v0, 0.0  ;;  %v597_v15 = vmul.f32 0.2, %v529_v3  ;;  %v459_v18 = vpop.f32.mrf.mxu0  ;;  %v523_v19 = vpop.f32.mrf.mxu1 }
 0x10b   : > { %1039 = vst [vmem:[%s1266_s13 + $0x68] sm:$0xff] %v1015_v8   ;;  %v624_v14 = vsel %vm560_vm7, %v508_v63, %v592_v11  ;;  %v521_v16 = vadd.f32 %v1251_v24, %v520_v60  ;;  %v468_v17 = vadd.f32 %v1097_v5, %v1251_v24  ;;  %vm565_vm9 = vcmp.ge.f32.partialorder %v529_v3, 0.0 }
 0x10c   : > { %1030 = vst [vmem:[%s1266_s13 + $0x20] sm:$0xff] %v970_v10   ;;  %v1010_v20 = vpack.c.bf16 %v624_v14, %v623_v13  ;;  %vm547_vm10 = vcmp.ge.f32.partialorder %v457_v4, 0.0  ;;  %v532_v21 = vadd.f32 %v1113_v6, %v1251_v24  ;;  %v613_v22 = vsel %vm549_vm8, %v465_v0, %v581_v12 }
 0x10d   : > { %v579_v23 = vmul.f32 0.2, %v457_v4  ;;  %vm550_vm11 = vcmp.ge.f32.partialorder %v468_v17, 0.0  ;;  %v582_v25 = vmul.f32 0.2, %v468_v17  ;;  %v460_v27 = vadd.f32 %v1251_v24, %v459_v18 }
 0x10e   : > { %1038 = vst [vmem:[%s1266_s13 + $0x60] sm:$0xff] %v1010_v20   ;;  %vm566_vm12 = vcmp.ge.f32.partialorder %v532_v21, 0.0  ;;  %v598_v26 = vmul.f32 0.2, %v532_v21  ;;  %v524_v28 = vadd.f32 %v1251_v24, %v523_v19  ;;  %v629_v29 = vsel %vm565_vm9, %v529_v3, %v597_v15 }
 0x10f   : > { %vm563_vm13 = vcmp.ge.f32.partialorder %v521_v16, 0.0  ;;  %v595_v30 = vmul.f32 0.2, %v521_v16  ;;  %v614_v31 = vsel %vm550_vm11, %v468_v17, %v582_v25  ;;  %vm548_vm14 = vcmp.ge.f32.partialorder %v460_v27, 0.0 }
 0x110   : > { %v985_v32 = vpack.c.bf16 %v614_v31, %v613_v22  ;;  %v630_v33 = vsel %vm566_vm12, %v532_v21, %v598_v26  ;;  %v580_v34 = vmul.f32 0.2, %v460_v27  ;;  %vm564_vm15 = vcmp.ge.f32.partialorder %v524_v28, 0.0 }
 0x111   : > { %v1025_v35 = vpack.c.bf16 %v630_v33, %v629_v29  ;;  %v596_v36 = vmul.f32 0.2, %v524_v28  ;;  %v611_v37 = vsel %vm547_vm10, %v457_v4, %v579_v23  ;;  %v627_v39 = vsel %vm563_vm13, %v521_v16, %v595_v30 }
 0x112   : > { %1033 = vst [vmem:[%s1266_s13 + $0x38] sm:$0xff] %v985_v32   ;;  %v612_v38 = vsel %vm548_vm14, %v460_v27, %v580_v34 }
 0x113   : > { %1041 = vst [vmem:[%s1266_s13 + $0x78] sm:$0xff] %v1025_v35   ;;  %v980_v24 = vpack.c.bf16 %v612_v38, %v611_v37  ;;  %v628_v40 = vsel %vm564_vm15, %v524_v28, %v596_v36 }
 0x114   : > { %v1020_v41 = vpack.c.bf16 %v628_v40, %v627_v39 }
 0x115   : > { %1032 = vst [vmem:[%s1266_s13 + $0x30] sm:$0xff] %v980_v24  }
 0x116   : > { %1040 = vst [vmem:[%s1266_s13 + $0x70] sm:$0xff] %v1020_v41  }
 0x117 PF: > { %s13_s12 = sadd.s32 1, %s1168_s12  }
 0x118   : > { %p10_p4 = scmp.ge.s32.totalorder %s13_s12, 4  }
 0x11a   :  { %12 = sbr.rel (!%p10_p4) target bundleno = 1 (0x1), region = 62 }

// kernel: discriminator_forward.6
= control target key start
LH: loop header
LB: loop body
LE: loop exit
PB: predicated region body
PF: predicated region fallthrough
CT: control target
= control target key end

     0   :  { %s1112_s12 = smov 0   ;;  %s1298_s0 = inlined_call_operand.vmem [shape: bf16[2,64,512], index: 0, kind: input, shape index: {}]   ;;  %s1299_s1 = inlined_call_operand.vmem [shape: bf16[512,128], index: 1, kind: input, shape index: {}]   ;;  %s1300_s2 = inlined_call_operand.vmem [shape: f32[1,128], index: 2, kind: input, shape index: {}]   ;;  %s1301_s3 = inlined_call_operand.vmem [shape: bf16[2,64,128], index: 3, kind: output, shape index: {}]  }
   0x1 LB: > { %s837_s13 = sadd.s32 4294967295, %s1090_s12   ;;  %p841_p0 = scmp.ge.s32.totalorder %s1090_s12, 1  ;;  %s1090_s12 = sphi %s1112_s12, %s13_s12  }
   0x2   : > { %p137_p1 = scmp.lt.s32.totalorder %s1090_s12, 3 }
   0x4   : > { %p138_p2 = pnand %p841_p0, %p137_p1 }
   0x5   : > { %p161_p3 = scmp.lt.s32.totalorder (!%p138_p2), %s837_s13, 1 }
   0x6   : > { %141 = sbr.rel (%p138_p2) target bundleno = 324 (0x144), region = 32 }
   0xb   : > { %v1026_v0 = vld [vmem:[%s1299_s1 + $0x78] sm:$0xff]   ;;  %v1030_v4 = vld [vmem:[%s1299_s1 + $0x70] sm:$0xff]   ;;  %v1034_v8 = vld [vmem:[%s1299_s1 + $0x68] sm:$0xff]   ;;  %s1303_s13 = smov (!%p161_p3, %s837_s13), 1 }
   0xc   : > { %v1027_v1 = vld [vmem:[%s1299_s1 + $0xf8] sm:$0xff]   ;;  %938 = vmatprep.subr.bf16.mxu0 %v1026_v0  ;;  %v1031_v5 = vld [vmem:[%s1299_s1 + $0xf0] sm:$0xff]   ;;  %v1035_v9 = vld [vmem:[%s1299_s1 + $0xe8] sm:$0xff]   ;;  %s905_s18 = sshll.u32 %s1303_s13, 7  ;;  %s906_s7 = sshll.u32 %s1303_s13, 5 }
   0xd   : > { %v1028_v2 = vld [vmem:[%s1299_s1 + $0x38] sm:$0xff]   ;;  %978 = vmatprep.subr.bf16.mxu1 %v1027_v1  ;;  %v1032_v6 = vld [vmem:[%s1299_s1 + $0x30] sm:$0xff]   ;;  %v1036_v10 = vld [vmem:[%s1299_s1 + $0x28] sm:$0xff]   ;;  %s1220_s27 = scalar_lea.vmem %s1298_s0, %s905_s18  ;;  %s170_s13 = scalar_lea.vmem %s1301_s3, %s906_s7 }
   0xe   : > { %v1029_v3 = vld [vmem:[%s1299_s1 + $0xb8] sm:$0xff]   ;;  %939 = vmatpush3.bf16.msra.mxu0 %v1028_v2  ;;  %v1033_v7 = vld [vmem:[%s1299_s1 + $0xb0] sm:$0xff]   ;;  %v1037_v11 = vld [vmem:[%s1299_s1 + $0xa8] sm:$0xff]  }
   0xf   : > { %979 = vmatpush3.bf16.msra.mxu1 %v1029_v3  ;;  %940 = vmatprep.subr.bf16.mxu0 %v1030_v4  ;;  %v1038_v12 = vld [vmem:[%s1299_s1 + $0x60] sm:$0xff]   ;;  %v1042_v16 = vld [vmem:[%s1299_s1 + $0x58] sm:$0xff]   ;;  %v1046_v20 = vld [vmem:[%s1299_s1 + $0x50] sm:$0xff]  }
  0x10   : > { %980 = vmatprep.subr.bf16.mxu1 %v1031_v5  ;;  %v1039_v13 = vld [vmem:[%s1299_s1 + $0xe0] sm:$0xff]   ;;  %v1043_v17 = vld [vmem:[%s1299_s1 + $0xd8] sm:$0xff]   ;;  %v1047_v21 = vld [vmem:[%s1299_s1 + $0xd0] sm:$0xff]  }
  0x11   : > { %v1040_v14 = vld [vmem:[%s1299_s1 + $0x20] sm:$0xff]   ;;  %v1044_v18 = vld [vmem:[%s1299_s1 + $0x18] sm:$0xff]   ;;  %v1048_v22 = vld [vmem:[%s1299_s1 + $0x10] sm:$0xff]  }
  0x12   : > { %941 = vmatpush3.bf16.msra.mxu0 %v1032_v6  ;;  %v1041_v15 = vld [vmem:[%s1299_s1 + $0xa0] sm:$0xff]   ;;  %v1045_v19 = vld [vmem:[%s1299_s1 + $0x98] sm:$0xff]   ;;  %v1049_v23 = vld [vmem:[%s1299_s1 + $0x90] sm:$0xff]  }
  0x13   : > { %981 = vmatpush3.bf16.msra.mxu1 %v1033_v7  ;;  %942 = vmatprep.subr.bf16.mxu0 %v1034_v8  ;;  %v1050_v24 = vld [vmem:[%s1299_s1 + $0x48] sm:$0xff]   ;;  %v1054_v28 = vld [vmem:[%s1299_s1 + $0x40] sm:$0xff]  }
  0x14   : > { %982 = vmatprep.subr.bf16.mxu1 %v1035_v9  ;;  %v1051_v25 = vld [vmem:[%s1299_s1 + $0xc8] sm:$0xff]   ;;  %v1055_v29 = vld [vmem:[%s1299_s1 + $0xc0] sm:$0xff]  }
  0x15   : > { %v1052_v26 = vld [vmem:[%s1299_s1 + $0x8] sm:$0xff]   ;;  %v1056_v30 = vld [vmem:[%s1299_s1] sm:$0xff]  }
  0x16   : > { %943 = vmatpush3.bf16.msra.mxu0 %v1036_v10  ;;  %v1053_v27 = vld [vmem:[%s1299_s1 + $0x88] sm:$0xff]   ;;  %v1057_v31 = vld [vmem:[%s1299_s1 + $0x80] sm:$0xff]  }
  0x17   : > { %983 = vmatpush3.bf16.msra.mxu1 %v1037_v11  ;;  %944 = vmatprep.subr.bf16.mxu0 %v1038_v12  ;;  %v1058_v32 = vld [vmem:[%s1220_s27] ss:$16 sps:$4 sm:$0xff]   ;;  %v1060_v33 = vld [vmem:[%s1220_s27 + $0x4] ss:$16 sps:$4 sm:$0xff]   ;;  %v1061_v34 = vld [vmem:[%s1220_s27 + $0x8] ss:$16 sps:$4 sm:$0xff]  }
  0x18   : > { %984 = vmatprep.subr.bf16.mxu1 %v1039_v13  ;;  %v1063_v35 = vld [vmem:[%s1220_s27 + $0xc] ss:$16 sps:$4 sm:$0xff]   ;;  %563 = vmatprep.mubr.bf16.mxu0 %v1060_v33  ;;  %v1064_v36 = vld [vmem:[%s1220_s27 + $0x24] ss:$16 sps:$4 sm:$0xff]   ;;  %v1068_v38 = vld [vmem:[%s1220_s27 + $0x20] ss:$16 sps:$4 sm:$0xff]  }
  0x19   : > { %628 = vmatprep.mubr.bf16.mxu1 %v1063_v35  ;;  %v1066_v37 = vld [vmem:[%s1220_s27 + $0x2c] ss:$16 sps:$4 sm:$0xff]   ;;  %v1069_v39 = vld [vmem:[%s1220_s27 + $0x28] ss:$16 sps:$4 sm:$0xff]   ;;  %v1070_v40 = vld [vmem:[%s1220_s27 + $0x44] ss:$16 sps:$4 sm:$0xff]  }
  0x1a   : > { %945 = vmatpush3.bf16.msra.mxu0 %v1040_v14  ;;  %v1072_v41 = vld [vmem:[%s1220_s27 + $0x4c] ss:$16 sps:$4 sm:$0xff]   ;;  %v1074_v42 = vld [vmem:[%s1220_s27 + $0x40] ss:$16 sps:$4 sm:$0xff]   ;;  %v1075_v43 = vld [vmem:[%s1220_s27 + $0x48] ss:$16 sps:$4 sm:$0xff]  }
  0x1b   : > { %985 = vmatpush3.bf16.msra.mxu1 %v1041_v15  ;;  %946 = vmatprep.subr.bf16.mxu0 %v1042_v16  ;;  %v1076_v44 = vld [vmem:[%s1220_s27 + $0x64] ss:$16 sps:$4 sm:$0xff]   ;;  %v1078_v45 = vld [vmem:[%s1220_s27 + $0x6c] ss:$16 sps:$4 sm:$0xff]   ;;  %v1080_v46 = vld [vmem:[%s1220_s27 + $0x60] ss:$16 sps:$4 sm:$0xff]  }
  0x1c   : > { %986 = vmatprep.subr.bf16.mxu1 %v1043_v17  ;;  %v1081_v47 = vld [vmem:[%s1220_s27 + $0x68] ss:$16 sps:$4 sm:$0xff]   ;;  %v846_v0 = vld [vmem:[%s1300_s2] ss:$0 sm:$0xff] }
  0x1e   : > { %947 = vmatpush3.bf16.msra.mxu0 %v1044_v18 }
  0x1f   : > { %987 = vmatpush3.bf16.msra.mxu1 %v1045_v19  ;;  %948 = vmatprep.subr.bf16.mxu0 %v1046_v20 }
  0x20   : > { %988 = vmatprep.subr.bf16.mxu1 %v1047_v21 }
  0x22   : > { %949 = vmatpush3.bf16.msra.mxu0 %v1048_v22 }
  0x23   : > { %989 = vmatpush3.bf16.msra.mxu1 %v1049_v23  ;;  %950 = vmatprep.subr.bf16.mxu0 %v1050_v24 }
  0x24   : > { %990 = vmatprep.subr.bf16.mxu1 %v1051_v25 }
  0x26   : > { %951 = vmatpush3.bf16.msra.mxu0 %v1052_v26 }
  0x27   : > { %991 = vmatpush3.bf16.msra.mxu1 %v1053_v27  ;;  %952 = vmatprep.subr.bf16.mxu0 %v1054_v28 }
  0x28   : > { %992 = vmatprep.subr.bf16.mxu1 %v1055_v29 }
  0x2a   : > { %953 = vmatpush3.bf16.msra.mxu0 %v1056_v30 }
  0x2b   : > { %993 = vmatpush3.bf16.msra.mxu1 %v1057_v31 }
  0x2d   : > { %564 = vmatmul.mubr.bf16.vlgmr.msra.gmra.mxu0 %v1058_v32 }
  0x2e   : > { %629 = vmatmul.mubr.bf16.vlgmr.msra.gmra.mxu1 %v1061_v34  ;;  %571 = vmatprep.mubr.bf16.mxu0 %v1064_v36 }
  0x2f   : > { %636 = vmatprep.mubr.bf16.mxu1 %v1066_v37 }
  0x35   : > { %572 = vmatmul.mubr.bf16.gmra.mxu0 %v1068_v38 }
  0x36   : > { %637 = vmatmul.mubr.bf16.gmra.mxu1 %v1069_v39  ;;  %579 = vmatprep.mubr.bf16.mxu0 %v1070_v40 }
  0x37   : > { %644 = vmatprep.mubr.bf16.mxu1 %v1072_v41 }
  0x3d   : > { %580 = vmatmul.mubr.bf16.gmra.mxu0 %v1074_v42 }
  0x3e   : > { %645 = vmatmul.mubr.bf16.gmra.mxu1 %v1075_v43  ;;  %587 = vmatprep.mubr.bf16.mxu0 %v1076_v44 }
  0x3f   : > { %652 = vmatprep.mubr.bf16.mxu1 %v1078_v45 }
  0x45   : > { %588 = vmatmul.mubr.bf16.gmra.mxu0 %v1080_v46 }
  0x46   : > { %653 = vmatmul.mubr.bf16.gmra.mxu1 %v1081_v47 }
  0xed   : > { %v954_v48 = vpop.f32.mrf.mxu0 }
  0xee   : > { %v994_v49 = vpop.f32.mrf.mxu1 }
  0xef   : > { %v955_v50 = vpop.f32.mrf.mxu0 }
  0xf0   : > { %v995_v51 = vpop.f32.mrf.mxu1  ;;  %v956_v61 = vadd.f32 %v955_v50, %v954_v48 }
  0xf1   : > { %v957_v52 = vpop.f32.mrf.mxu0  ;;  %v996_v11 = vadd.f32 %v995_v51, %v994_v49 }
  0xf2   : > { %v997_v53 = vpop.f32.mrf.mxu1  ;;  %v566_v6 = vadd.f32 %v956_v61, %v846_v0 }
  0xf3   : > { %v958_v54 = vpop.f32.mrf.mxu0 }
  0xf4   : > { %v998_v55 = vpop.f32.mrf.mxu1  ;;  %v959_v58 = vadd.f32 %v958_v54, %v957_v52  ;;  %v1249_v18 = vadd.f32 %v996_v11, %v566_v6 }
  0xf5   : > { %v960_v56 = vpop.f32.mrf.mxu0  ;;  %v999_v7 = vadd.f32 %v998_v55, %v997_v53 }
  0xf6   : > { %v1000_v57 = vpop.f32.mrf.mxu1  ;;  %v569_v2 = vadd.f32 %v959_v58, %v846_v0  ;;  %v675_v30 = vmul.f32 %v1249_v18, %v1249_v18 }
  0xf7   : > { %v961_v59 = vpop.f32.mrf.mxu0 }
  0xf8   : > { %v1001_v60 = vpop.f32.mrf.mxu1  ;;  %v962_v62 = vadd.f32 %v961_v59, %v960_v56  ;;  %v1247_v12 = vadd.f32 %v999_v7, %v569_v2 }
  0xf9   : > { %v963_v63 = vpop.f32.mrf.mxu0  ;;  %v1002_v13 = vadd.f32 %v1001_v60, %v1000_v57 }
  0xfa   : > { %v1003_v1 = vpop.f32.mrf.mxu1  ;;  %v574_v8 = vadd.f32 %v962_v62, %v846_v0  ;;  %v676_v24 = vmul.f32 %v1247_v12, %v1247_v12  ;;  %v661_v34 = vadd.f32 %v1247_v12, %v1249_v18 }
  0xfb   : > { %v964_v3 = vpop.f32.mrf.mxu0 }
  0xfc   : > { %v965_v4 = vadd.f32 %v964_v3, %v963_v63  ;;  %v1004_v5 = vpop.f32.mrf.mxu1  ;;  %v1251_v19 = vadd.f32 %v1002_v13, %v574_v8  ;;  %v683_v38 = vadd.f32 %v676_v24, %v675_v30 }
  0xfd   : > { %v966_v9 = vpop.f32.mrf.mxu0  ;;  %v1005_v20 = vadd.f32 %v1004_v5, %v1003_v1 }
  0xfe   : > { %v1006_v10 = vpop.f32.mrf.mxu1  ;;  %v577_v14 = vadd.f32 %v965_v4, %v846_v0  ;;  %v677_v31 = vmul.f32 %v1251_v19, %v1251_v19  ;;  %v662_v41 = vadd.f32 %v661_v34, %v1251_v19 }
  0xff   : > { %v967_v15 = vpop.f32.mrf.mxu0 }
 0x100   : > { %v968_v16 = vadd.f32 %v967_v15, %v966_v9  ;;  %v1007_v17 = vpop.f32.mrf.mxu1  ;;  %v1255_v25 = vadd.f32 %v1005_v20, %v577_v14  ;;  %v684_v45 = vadd.f32 %v683_v38, %v677_v31 }
 0x101   : > { %v969_v21 = vpop.f32.mrf.mxu0  ;;  %v1008_v26 = vadd.f32 %v1007_v17, %v1006_v10 }
 0x102   : > { %v582_v22 = vadd.f32 %v968_v16, %v846_v0  ;;  %v1009_v23 = vpop.f32.mrf.mxu1  ;;  %v678_v39 = vmul.f32 %v1255_v25, %v1255_v25  ;;  %v663_v48 = vadd.f32 %v662_v41, %v1255_v25 }
 0x103   : > { %v970_v27 = vpop.f32.mrf.mxu0 }
 0x104   : > { %v971_v28 = vadd.f32 %v970_v27, %v969_v21  ;;  %v1010_v29 = vpop.f32.mrf.mxu1  ;;  %v1261_v32 = vadd.f32 %v1008_v26, %v582_v22  ;;  %v685_v52 = vadd.f32 %v684_v45, %v678_v39 }
 0x105   : > { %v972_v33 = vpop.f32.mrf.mxu0  ;;  %v1011_v36 = vadd.f32 %v1010_v29, %v1009_v23 }
 0x106   : > { %v585_v35 = vadd.f32 %v971_v28, %v846_v0  ;;  %v1012_v37 = vpop.f32.mrf.mxu1  ;;  %v679_v46 = vmul.f32 %v1261_v32, %v1261_v32  ;;  %v664_v54 = vadd.f32 %v663_v48, %v1261_v32 }
 0x107   : > { %v973_v40 = vpop.f32.mrf.mxu0 }
 0x108   : > { %v1268_v42 = vadd.f32 %v1011_v36, %v585_v35  ;;  %v974_v43 = vadd.f32 %v973_v40, %v972_v33  ;;  %v1013_v44 = vpop.f32.mrf.mxu1  ;;  %v686_v59 = vadd.f32 %v685_v52, %v679_v46 }
 0x109   : > { %v975_v47 = vpop.f32.mrf.mxu0  ;;  %v1014_v50 = vadd.f32 %v1013_v44, %v1012_v37 }
 0x10a   : > { %v590_v49 = vadd.f32 %v974_v43, %v846_v0  ;;  %v1015_v51 = vpop.f32.mrf.mxu1  ;;  %v680_v55 = vmul.f32 %v1268_v42, %v1268_v42  ;;  %v665_v60 = vadd.f32 %v664_v54, %v1268_v42 }
 0x10b   : > { %v976_v53 = vpop.f32.mrf.mxu0 }
 0x10c   : > { %v655_v56 = vadd.f32 %v1014_v50, %v590_v49  ;;  %v977_v57 = vadd.f32 %v976_v53, %v975_v47  ;;  %v1016_v58 = vpop.f32.mrf.mxu1  ;;  %v687_v1 = vadd.f32 %v686_v59, %v680_v55 }
 0x10d   : > { %v1017_v63 = vadd.f32 %v1016_v58, %v1015_v51 }
 0x10e   : > { %v681_v61 = vmul.f32 %v655_v56, %v655_v56  ;;  %v593_v62 = vadd.f32 %v977_v57, %v846_v0  ;;  %v666_v2 = vadd.f32 %v665_v60, %v655_v56 }
 0x110   : > { %v658_v3 = vadd.f32 %v1017_v63, %v593_v62  ;;  %v688_v4 = vadd.f32 %v687_v1, %v681_v61 }
 0x112   : > { %v667_v5 = vadd.f32 %v666_v2, %v658_v3  ;;  %v682_v6 = vmul.f32 %v658_v3, %v658_v3 }
 0x114   : > { %v668_v7 = vrot.slane %v667_v5, 4  ;;  %v689_v8 = vadd.f32 %v688_v4, %v682_v6 }
 0x116   : > { %v669_v9 = vadd.f32 %v668_v7, %v667_v5  ;;  %v690_v10 = vrot.slane %v689_v8, 4 }
 0x118   : > { %v670_v11 = vrot.slane %v669_v9, 2  ;;  %v691_v13 = vadd.f32 %v690_v10, %v689_v8 }
 0x11a   : > { %v671_v14 = vadd.f32 %v670_v11, %v669_v9  ;;  %v692_v15 = vrot.slane %v691_v13, 2 }
 0x11c   : > { %v672_v16 = vrot.slane %v671_v14, 1  ;;  %v693_v17 = vadd.f32 %v692_v15, %v691_v13 }
 0x11e   : > { %v673_v20 = vadd.f32 %v672_v16, %v671_v14  ;;  %v694_v21 = vrot.slane %v693_v17, 1 }
 0x120   : > { %v674_v0 = vmul.f32 0.015625, %v673_v20  ;;  %v695_v22 = vadd.f32 %v694_v21, %v693_v17 }
 0x122   : > { %v696_v23 = vmul.f32 0.015625, %v695_v22  ;;  %v697_v24 = vmul.f32 %v674_v0, %v674_v0  ;;  %v700_v29 = vsub.f32 %v1249_v18, %v674_v0  ;;  %v701_v30 = vsub.f32 %v1247_v12, %v674_v0 }
 0x123   : > { %v702_v31 = vsub.f32 %v1251_v19, %v674_v0  ;;  %v703_v33 = vsub.f32 %v1255_v25, %v674_v0  ;;  %v704_v35 = vsub.f32 %v1261_v32, %v674_v0  ;;  %v705_v36 = vsub.f32 %v1268_v42, %v674_v0 }
 0x124   : > { %v698_v26 = vsub.f32 %v696_v23, %v697_v24  ;;  %v706_v37 = vsub.f32 %v655_v56, %v674_v0  ;;  %v707_v38 = vsub.f32 %v658_v3, %v674_v0 }
 0x126   : > { %v699_v27 = vmax.f32 %v698_v26, 0.0 }
 0x128   : > { %v708_v28 = vadd.f32 1e-05, %v699_v27 }
 0x12a   : > { %1082 = vrsqrt.f32 %v708_v28 }
 0x137   : > { %v1083_v34 = vpop.eup %1082 }
 0x138   : > { %v710_v39 = vmul.f32 %v1083_v34, %v700_v29  ;;  %v711_v40 = vmul.f32 %v1083_v34, %v701_v30  ;;  %v712_v41 = vmul.f32 %v1083_v34, %v702_v31  ;;  %v713_v43 = vmul.f32 %v1083_v34, %v703_v33 }
 0x139   : > { %v714_v44 = vmul.f32 %v1083_v34, %v704_v35  ;;  %v715_v18 = vmul.f32 %v1083_v34, %v705_v36  ;;  %v716_v45 = vmul.f32 %v1083_v34, %v706_v37  ;;  %v717_v12 = vmul.f32 %v1083_v34, %v707_v38 }
 0x13a   : > { %vm718_vm0 = vcmp.ge.f32.partialorder %v710_v39, 0.0  ;;  %vm719_vm1 = vcmp.ge.f32.partialorder %v711_v40, 0.0  ;;  %vm720_vm2 = vcmp.ge.f32.partialorder %v712_v41, 0.0  ;;  %vm721_vm3 = vcmp.ge.f32.partialorder %v713_v43, 0.0 }
 0x13b   : > { %vm722_vm4 = vcmp.ge.f32.partialorder %v714_v44, 0.0  ;;  %vm723_vm5 = vcmp.ge.f32.partialorder %v715_v18, 0.0  ;;  %vm724_vm6 = vcmp.ge.f32.partialorder %v716_v45, 0.0  ;;  %vm725_vm7 = vcmp.ge.f32.partialorder %v717_v12, 0.0 }
 0x13c   : > { %v726_v19 = vmul.f32 0.2, %v710_v39  ;;  %v727_v25 = vmul.f32 0.2, %v711_v40  ;;  %v728_v32 = vmul.f32 0.2, %v712_v41 }
 0x13d   : > { %v729_v42 = vmul.f32 0.2, %v713_v43  ;;  %v730_v46 = vmul.f32 0.2, %v714_v44  ;;  %v731_v47 = vmul.f32 0.2, %v715_v18 }
 0x13e   : > { %v732_v48 = vmul.f32 0.2, %v716_v45  ;;  %v733_v49 = vmul.f32 0.2, %v717_v12  ;;  %v734_v50 = vsel %vm718_vm0, %v710_v39, %v726_v19  ;;  %v735_v51 = vsel %vm719_vm1, %v711_v40, %v727_v25 }
 0x13f   : > { %v736_v52 = vsel %vm720_vm2, %v712_v41, %v728_v32  ;;  %v737_v53 = vsel %vm721_vm3, %v713_v43, %v729_v42  ;;  %v738_v54 = vsel %vm722_vm4, %v714_v44, %v730_v46  ;;  %v739_v55 = vsel %vm723_vm5, %v715_v18, %v731_v47 }
 0x140   : > { %v740_v56 = vsel %vm724_vm6, %v716_v45, %v732_v48  ;;  %v741_v57 = vsel %vm725_vm7, %v717_v12, %v733_v49  ;;  %v918_v58 = vpack.c.bf16 %v735_v51, %v734_v50  ;;  %v923_v59 = vpack.c.bf16 %v737_v53, %v736_v52 }
 0x141   : > { %v928_v60 = vpack.c.bf16 %v739_v55, %v738_v54  ;;  %v933_v61 = vpack.c.bf16 %v741_v57, %v740_v56 }
 0x142   : > { %919 = vst [vmem:[%s170_s13] sm:$0xff] %v918_v58   ;;  %935 = vst [vmem:[%s170_s13 + $0x8] sm:$0xff] %v923_v59  }
 0x143   : > { %936 = vst [vmem:[%s170_s13 + $0x10] sm:$0xff] %v928_v60   ;;  %937 = vst [vmem:[%s170_s13 + $0x18] sm:$0xff] %v933_v61  }
 0x144 PF: > { %s13_s12 = sadd.s32 1, %s1090_s12  }
 0x145   : > { %p10_p4 = scmp.ge.s32.totalorder %s13_s12, 4  }
 0x147   :  { %12 = sbr.rel (!%p10_p4) target bundleno = 1 (0x1), region = 62 }

// kernel: discriminator_forward.7
= control target key start
LH: loop header
LB: loop body
LE: loop exit
PB: predicated region body
PF: predicated region fallthrough
CT: control target
= control target key end

     0   :  { %s1286_s12 = smov 0   ;;  %s1516_s0 = inlined_call_operand.vmem [shape: bf16[2,16,1024], index: 0, kind: input, shape index: {}]   ;;  %s1517_s1 = inlined_call_operand.vmem [shape: bf16[1024,128], index: 1, kind: input, shape index: {}]   ;;  %s1518_s2 = inlined_call_operand.vmem [shape: f32[1,128], index: 2, kind: input, shape index: {}]   ;;  %s1519_s3 = inlined_call_operand.vmem [shape: bf16[2,16,128], index: 3, kind: output, shape index: {}]  }
   0x1 LB: > { %s1001_s13 = sadd.s32 4294967295, %s1264_s12   ;;  %p1005_p0 = scmp.ge.s32.totalorder %s1264_s12, 1  ;;  %s1264_s12 = sphi %s1286_s12, %s13_s12  }
   0x2   : > { %p137_p1 = scmp.lt.s32.totalorder %s1264_s12, 3 }
   0x4   : > { %p138_p2 = pnand %p1005_p0, %p137_p1 }
   0x5   : > { %p161_p3 = scmp.lt.s32.totalorder (!%p138_p2), %s1001_s13, 1 }
   0x6   : > { %141 = sbr.rel (%p138_p2) target bundleno = 328 (0x148), region = 32 }
   0xb   : > { %v1192_v0 = vld [vmem:[%s1517_s1 + $0x78] sm:$0xff]   ;;  %v1196_v4 = vld [vmem:[%s1517_s1 + $0x70] sm:$0xff]   ;;  %v1200_v8 = vld [vmem:[%s1517_s1 + $0x68] sm:$0xff]   ;;  %s1521_s13 = smov (!%p161_p3, %s1001_s13), 1 }
   0xc   : > { %v1193_v1 = vld [vmem:[%s1517_s1 + $0xf8] sm:$0xff]   ;;  %1096 = vmatprep.subr.bf16.mxu0 %v1192_v0  ;;  %v1197_v5 = vld [vmem:[%s1517_s1 + $0xf0] sm:$0xff]   ;;  %v1201_v9 = vld [vmem:[%s1517_s1 + $0xe8] sm:$0xff]   ;;  %s1087_s18 = sshll.u32 %s1521_s13, 6 }
   0xd   : > { %v1194_v2 = vld [vmem:[%s1517_s1 + $0x38] sm:$0xff]   ;;  %1118 = vmatprep.subr.bf16.mxu1 %v1193_v1  ;;  %v1198_v6 = vld [vmem:[%s1517_s1 + $0x30] sm:$0xff]   ;;  %v1202_v10 = vld [vmem:[%s1517_s1 + $0x28] sm:$0xff]   ;;  %s1394_s27 = scalar_lea.vmem %s1516_s0, %s1087_s18 }
   0xe   : > { %v1195_v3 = vld [vmem:[%s1517_s1 + $0xb8] sm:$0xff]   ;;  %1097 = vmatpush3.bf16.msra.mxu0 %v1194_v2  ;;  %v1199_v7 = vld [vmem:[%s1517_s1 + $0xb0] sm:$0xff]   ;;  %v1203_v11 = vld [vmem:[%s1517_s1 + $0xa8] sm:$0xff]  }
   0xf   : > { %1119 = vmatpush3.bf16.msra.mxu1 %v1195_v3  ;;  %1098 = vmatprep.subr.bf16.mxu0 %v1196_v4  ;;  %v1204_v12 = vld [vmem:[%s1517_s1 + $0x60] sm:$0xff]   ;;  %v1208_v16 = vld [vmem:[%s1517_s1 + $0x58] sm:$0xff]   ;;  %v1212_v20 = vld [vmem:[%s1517_s1 + $0x50] sm:$0xff]  }
  0x10   : > { %1120 = vmatprep.subr.bf16.mxu1 %v1197_v5  ;;  %v1205_v13 = vld [vmem:[%s1517_s1 + $0xe0] sm:$0xff]   ;;  %v1209_v17 = vld [vmem:[%s1517_s1 + $0xd8] sm:$0xff]   ;;  %v1213_v21 = vld [vmem:[%s1517_s1 + $0xd0] sm:$0xff]  }
  0x11   : > { %v1206_v14 = vld [vmem:[%s1517_s1 + $0x20] sm:$0xff]   ;;  %v1210_v18 = vld [vmem:[%s1517_s1 + $0x18] sm:$0xff]   ;;  %v1214_v22 = vld [vmem:[%s1517_s1 + $0x10] sm:$0xff]  }
  0x12   : > { %1099 = vmatpush3.bf16.msra.mxu0 %v1198_v6  ;;  %v1207_v15 = vld [vmem:[%s1517_s1 + $0xa0] sm:$0xff]   ;;  %v1211_v19 = vld [vmem:[%s1517_s1 + $0x98] sm:$0xff]   ;;  %v1215_v23 = vld [vmem:[%s1517_s1 + $0x90] sm:$0xff]  }
  0x13   : > { %1121 = vmatpush3.bf16.msra.mxu1 %v1199_v7  ;;  %1100 = vmatprep.subr.bf16.mxu0 %v1200_v8  ;;  %v1216_v24 = vld [vmem:[%s1517_s1 + $0x48] sm:$0xff]   ;;  %v1220_v28 = vld [vmem:[%s1517_s1 + $0x40] sm:$0xff]   ;;  %v1224_v40 = vld [vmem:[%s1517_s1 + $0x178] sm:$0xff]  }
  0x14   : > { %1122 = vmatprep.subr.bf16.mxu1 %v1201_v9  ;;  %v1217_v25 = vld [vmem:[%s1517_s1 + $0xc8] sm:$0xff]   ;;  %v1221_v29 = vld [vmem:[%s1517_s1 + $0xc0] sm:$0xff]   ;;  %v1225_v41 = vld [vmem:[%s1517_s1 + $0x1f8] sm:$0xff]  }
  0x15   : > { %v1218_v26 = vld [vmem:[%s1517_s1 + $0x8] sm:$0xff]   ;;  %v1222_v30 = vld [vmem:[%s1517_s1] sm:$0xff]   ;;  %v1226_v42 = vld [vmem:[%s1517_s1 + $0x138] sm:$0xff]  }
  0x16   : > { %1101 = vmatpush3.bf16.msra.mxu0 %v1202_v10  ;;  %v1219_v27 = vld [vmem:[%s1517_s1 + $0x88] sm:$0xff]   ;;  %v1223_v31 = vld [vmem:[%s1517_s1 + $0x80] sm:$0xff]   ;;  %v1227_v43 = vld [vmem:[%s1517_s1 + $0x1b8] sm:$0xff]  }
  0x17   : > { %1123 = vmatpush3.bf16.msra.mxu1 %v1203_v11  ;;  %1102 = vmatprep.subr.bf16.mxu0 %v1204_v12  ;;  %v301_v32 = vld [vmem:[%s1394_s27] sm:$0xff]  ;;  %v302_v34 = vld [vmem:[%s1394_s27 + $0x8] sm:$0xff]  ;;  %v1228_v44 = vld [vmem:[%s1517_s1 + $0x170] sm:$0xff]  }
  0x18   : > { %1124 = vmatprep.subr.bf16.mxu1 %v1205_v13  ;;  %v305_v33 = vld [vmem:[%s1394_s27 + $0x20] sm:$0xff]  ;;  %v306_v37 = vld [vmem:[%s1394_s27 + $0x28] sm:$0xff]  ;;  %v1229_v45 = vld [vmem:[%s1517_s1 + $0x1f0] sm:$0xff]  }
  0x19   : > { %v1011_v35 = vcombine.low %v301_v32, %v305_v33  ;;  %v1012_v36 = vcombine.high %v301_v32, %v305_v33  ;;  %v1013_v38 = vcombine.low %v302_v34, %v306_v37  ;;  %v1014_v39 = vcombine.high %v302_v34, %v306_v37  ;;  %v1230_v46 = vld [vmem:[%s1517_s1 + $0x130] sm:$0xff]   ;;  %v1232_v48 = vld [vmem:[%s1517_s1 + $0x168] sm:$0xff]   ;;  %v1236_v52 = vld [vmem:[%s1517_s1 + $0x160] sm:$0xff]  }
  0x1a   : > { %1103 = vmatpush3.bf16.msra.mxu0 %v1206_v14  ;;  %v1231_v47 = vld [vmem:[%s1517_s1 + $0x1b0] sm:$0xff]   ;;  %v1233_v49 = vld [vmem:[%s1517_s1 + $0x1e8] sm:$0xff]   ;;  %v1237_v53 = vld [vmem:[%s1517_s1 + $0x1e0] sm:$0xff]  }
  0x1b   : > { %1125 = vmatpush3.bf16.msra.mxu1 %v1207_v15  ;;  %1104 = vmatprep.subr.bf16.mxu0 %v1208_v16  ;;  %v1234_v50 = vld [vmem:[%s1517_s1 + $0x128] sm:$0xff]   ;;  %v1238_v54 = vld [vmem:[%s1517_s1 + $0x120] sm:$0xff]   ;;  %v1240_v56 = vld [vmem:[%s1517_s1 + $0x158] sm:$0xff]  }
  0x1c   : > { %1126 = vmatprep.subr.bf16.mxu1 %v1209_v17  ;;  %771 = vmatprep.mubr.bf16.mxu0 %v1012_v36  ;;  %v1235_v51 = vld [vmem:[%s1517_s1 + $0x1a8] sm:$0xff]   ;;  %v1239_v55 = vld [vmem:[%s1517_s1 + $0x1a0] sm:$0xff]   ;;  %v1241_v57 = vld [vmem:[%s1517_s1 + $0x1d8] sm:$0xff]  }
  0x1d   : > { %812 = vmatprep.mubr.bf16.mxu1 %v1014_v39  ;;  %v1242_v58 = vld [vmem:[%s1517_s1 + $0x118] sm:$0xff]   ;;  %v1244_v60 = vld [vmem:[%s1517_s1 + $0x150] sm:$0xff]   ;;  %v1248_v0 = vld [vmem:[%s1517_s1 + $0x148] sm:$0xff]  }
  0x1e   : > { %1105 = vmatpush3.bf16.msra.mxu0 %v1210_v18  ;;  %v1243_v59 = vld [vmem:[%s1517_s1 + $0x198] sm:$0xff]   ;;  %v1245_v61 = vld [vmem:[%s1517_s1 + $0x1d0] sm:$0xff]   ;;  %v1249_v1 = vld [vmem:[%s1517_s1 + $0x1c8] sm:$0xff]  }
  0x1f   : > { %1127 = vmatpush3.bf16.msra.mxu1 %v1211_v19  ;;  %1106 = vmatprep.subr.bf16.mxu0 %v1212_v20  ;;  %v1246_v62 = vld [vmem:[%s1517_s1 + $0x110] sm:$0xff]   ;;  %v1250_v2 = vld [vmem:[%s1517_s1 + $0x108] sm:$0xff]   ;;  %v1252_v4 = vld [vmem:[%s1517_s1 + $0x140] sm:$0xff]  }
  0x20   : > { %1128 = vmatprep.subr.bf16.mxu1 %v1213_v21  ;;  %v1247_v63 = vld [vmem:[%s1517_s1 + $0x190] sm:$0xff]   ;;  %v1251_v3 = vld [vmem:[%s1517_s1 + $0x188] sm:$0xff]   ;;  %v1253_v5 = vld [vmem:[%s1517_s1 + $0x1c0] sm:$0xff]  }
  0x21   : > { %v1254_v6 = vld [vmem:[%s1517_s1 + $0x100] sm:$0xff]   ;;  %v303_v8 = vld [vmem:[%s1394_s27 + $0x10] sm:$0xff]  ;;  %v304_v12 = vld [vmem:[%s1394_s27 + $0x18] sm:$0xff] }
  0x22   : > { %1107 = vmatpush3.bf16.msra.mxu0 %v1214_v22  ;;  %v1255_v7 = vld [vmem:[%s1517_s1 + $0x180] sm:$0xff]   ;;  %v307_v9 = vld [vmem:[%s1394_s27 + $0x30] sm:$0xff]  ;;  %v308_v13 = vld [vmem:[%s1394_s27 + $0x38] sm:$0xff]  ;;  %s1088_s27 = sshll.u32 %s1521_s13, 3 }
  0x23   : > { %1129 = vmatpush3.bf16.msra.mxu1 %v1215_v23  ;;  %1108 = vmatprep.subr.bf16.mxu0 %v1216_v24  ;;  %v1015_v10 = vcombine.low %v303_v8, %v307_v9  ;;  %v1016_v11 = vcombine.high %v303_v8, %v307_v9  ;;  %v1017_v14 = vcombine.low %v304_v12, %v308_v13  ;;  %v1010_v23 = vld [vmem:[%s1518_s2] ss:$0 sm:$0xff]  ;;  %s170_s28 = scalar_lea.vmem %s1519_s3, %s1088_s27 }
  0x24   : > { %1130 = vmatprep.subr.bf16.mxu1 %v1217_v25  ;;  %v1018_v15 = vcombine.high %v304_v12, %v308_v13 }
  0x26   : > { %1109 = vmatpush3.bf16.msra.mxu0 %v1218_v26 }
  0x27   : > { %1131 = vmatpush3.bf16.msra.mxu1 %v1219_v27  ;;  %1110 = vmatprep.subr.bf16.mxu0 %v1220_v28 }
  0x28   : > { %1132 = vmatprep.subr.bf16.mxu1 %v1221_v29 }
  0x2a   : > { %1111 = vmatpush3.bf16.msra.mxu0 %v1222_v30 }
  0x2b   : > { %1133 = vmatpush3.bf16.msra.mxu1 %v1223_v31  ;;  %1140 = vmatprep.subr.bf16.mxu0 %v1224_v40 }
  0x2c   : > { %1162 = vmatprep.subr.bf16.mxu1 %v1225_v41 }
  0x2d   : > { %772 = vmatmul.mubr.bf16.vlgmr.msra.gmra.mxu0 %v1011_v35 }
  0x2e   : > { %813 = vmatmul.mubr.bf16.vlgmr.msra.gmra.mxu1 %v1013_v38  ;;  %1141 = vmatpush3.bf16.msra.mxu0 %v1226_v42 }
  0x2f   : > { %1163 = vmatpush3.bf16.msra.mxu1 %v1227_v43  ;;  %1142 = vmatprep.subr.bf16.mxu0 %v1228_v44 }
  0x30   : > { %1164 = vmatprep.subr.bf16.mxu1 %v1229_v45  ;;  %853 = vmatprep.mubr.bf16.mxu0 %v1016_v11 }
  0x31   : > { %894 = vmatprep.mubr.bf16.mxu1 %v1018_v15 }
  0x32   : > { %1143 = vmatpush3.bf16.msra.mxu0 %v1230_v46 }
  0x33   : > { %1165 = vmatpush3.bf16.msra.mxu1 %v1231_v47  ;;  %1144 = vmatprep.subr.bf16.mxu0 %v1232_v48 }
  0x34   : > { %1166 = vmatprep.subr.bf16.mxu1 %v1233_v49 }
  0x36   : > { %1145 = vmatpush3.bf16.msra.mxu0 %v1234_v50 }
  0x37   : > { %1167 = vmatpush3.bf16.msra.mxu1 %v1235_v51  ;;  %1146 = vmatprep.subr.bf16.mxu0 %v1236_v52 }
  0x38   : > { %1168 = vmatprep.subr.bf16.mxu1 %v1237_v53 }
  0x3a   : > { %1147 = vmatpush3.bf16.msra.mxu0 %v1238_v54 }
  0x3b   : > { %1169 = vmatpush3.bf16.msra.mxu1 %v1239_v55  ;;  %1148 = vmatprep.subr.bf16.mxu0 %v1240_v56 }
  0x3c   : > { %1170 = vmatprep.subr.bf16.mxu1 %v1241_v57 }
  0x3e   : > { %1149 = vmatpush3.bf16.msra.mxu0 %v1242_v58 }
  0x3f   : > { %1171 = vmatpush3.bf16.msra.mxu1 %v1243_v59  ;;  %1150 = vmatprep.subr.bf16.mxu0 %v1244_v60 }
  0x40   : > { %1172 = vmatprep.subr.bf16.mxu1 %v1245_v61 }
  0x42   : > { %1151 = vmatpush3.bf16.msra.mxu0 %v1246_v62 }
  0x43   : > { %1173 = vmatpush3.bf16.msra.mxu1 %v1247_v63  ;;  %1152 = vmatprep.subr.bf16.mxu0 %v1248_v0 }
  0x44   : > { %1174 = vmatprep.subr.bf16.mxu1 %v1249_v1 }
  0x46   : > { %1153 = vmatpush3.bf16.msra.mxu0 %v1250_v2 }
  0x47   : > { %1175 = vmatpush3.bf16.msra.mxu1 %v1251_v3  ;;  %1154 = vmatprep.subr.bf16.mxu0 %v1252_v4 }
  0x48   : > { %1176 = vmatprep.subr.bf16.mxu1 %v1253_v5 }
  0x4a   : > { %1155 = vmatpush3.bf16.msra.mxu0 %v1254_v6 }
  0x4b   : > { %1177 = vmatpush3.bf16.msra.mxu1 %v1255_v7 }
  0x4d   : > { %854 = vmatmul.mubr.bf16.vlgmr.msra.gmra.mxu0 %v1015_v10 }
  0x4e   : > { %895 = vmatmul.mubr.bf16.vlgmr.msra.gmra.mxu1 %v1017_v14 }
  0xed   : > { %v1112_v16 = vpop.f32.mrf.mxu0 }
  0xee   : > { %v1134_v17 = vpop.f32.mrf.mxu1 }
  0xef   : > { %v1113_v18 = vpop.f32.mrf.mxu0 }
  0xf0   : > { %v1135_v19 = vpop.f32.mrf.mxu1  ;;  %v1114_v21 = vadd.f32 %v1113_v18, %v1112_v16 }
  0xf1   : > { %v1115_v20 = vpop.f32.mrf.mxu0  ;;  %v1136_v26 = vadd.f32 %v1135_v19, %v1134_v17 }
  0xf2   : > { %v1137_v22 = vpop.f32.mrf.mxu1  ;;  %v774_v25 = vadd.f32 %v1114_v21, %v1010_v23 }
  0xf3   : > { %v1116_v24 = vpop.f32.mrf.mxu0 }
  0xf4   : > { %v1117_v27 = vadd.f32 %v1116_v24, %v1115_v20  ;;  %v1138_v28 = vpop.f32.mrf.mxu1  ;;  %v815_v32 = vadd.f32 %v1136_v26, %v774_v25 }
  0xf5   : > { %v1139_v37 = vadd.f32 %v1138_v28, %v1137_v22 }
  0xf6   : > { %v777_v33 = vadd.f32 %v1117_v27, %v1010_v23 }
  0xf8   : > { %v818_v41 = vadd.f32 %v1139_v37, %v777_v33 }
 0x10d   : > { %v1156_v29 = vpop.f32.mrf.mxu0 }
 0x10e   : > { %v1178_v30 = vpop.f32.mrf.mxu1 }
 0x10f   : > { %v1157_v31 = vpop.f32.mrf.mxu0 }
 0x110   : > { %v1158_v34 = vadd.f32 %v1157_v31, %v1156_v29  ;;  %v1179_v35 = vpop.f32.mrf.mxu1 }
 0x111   : > { %v1159_v36 = vpop.f32.mrf.mxu0  ;;  %v1180_v42 = vadd.f32 %v1179_v35, %v1178_v30 }
 0x112   : > { %v856_v38 = vadd.f32 %v1158_v34, %v815_v32  ;;  %v1181_v39 = vpop.f32.mrf.mxu1 }
 0x113   : > { %v1160_v40 = vpop.f32.mrf.mxu0 }
 0x114   : > { %v1161_v43 = vadd.f32 %v1160_v40, %v1159_v36  ;;  %v1182_v44 = vpop.f32.mrf.mxu1  ;;  %v897_v45 = vadd.f32 %v1180_v42, %v856_v38 }
 0x115   : > { %v1183_v47 = vadd.f32 %v1182_v44, %v1181_v39 }
 0x116   : > { %v859_v46 = vadd.f32 %v1161_v43, %v818_v41  ;;  %v911_v49 = vmul.f32 %v897_v45, %v897_v45 }
 0x118   : > { %v900_v48 = vadd.f32 %v1183_v47, %v859_v46 }
 0x11a   : > { %v903_v50 = vadd.f32 %v900_v48, %v897_v45  ;;  %v912_v51 = vmul.f32 %v900_v48, %v900_v48 }
 0x11c   : > { %v904_v52 = vrot.slane %v903_v50, 4  ;;  %v913_v53 = vadd.f32 %v912_v51, %v911_v49 }
 0x11e   : > { %v905_v54 = vadd.f32 %v904_v52, %v903_v50  ;;  %v914_v55 = vrot.slane %v913_v53, 4 }
 0x120   : > { %v906_v56 = vrot.slane %v905_v54, 2  ;;  %v915_v57 = vadd.f32 %v914_v55, %v913_v53 }
 0x122   : > { %v907_v58 = vadd.f32 %v906_v56, %v905_v54  ;;  %v916_v59 = vrot.slane %v915_v57, 2 }
 0x124   : > { %v908_v60 = vrot.slane %v907_v58, 1  ;;  %v917_v61 = vadd.f32 %v916_v59, %v915_v57 }
 0x126   : > { %v909_v62 = vadd.f32 %v908_v60, %v907_v58  ;;  %v918_v63 = vrot.slane %v917_v61, 1 }
 0x128   : > { %v910_v0 = vmul.f32 0.0625, %v909_v62  ;;  %v919_v1 = vadd.f32 %v918_v63, %v917_v61 }
 0x12a   : > { %v920_v2 = vmul.f32 0.0625, %v919_v1  ;;  %v921_v3 = vmul.f32 %v910_v0, %v910_v0  ;;  %v924_v7 = vsub.f32 %v897_v45, %v910_v0  ;;  %v925_v8 = vsub.f32 %v900_v48, %v910_v0 }
 0x12c   : > { %v922_v4 = vsub.f32 %v920_v2, %v921_v3 }
 0x12e   : > { %v923_v5 = vmax.f32 %v922_v4, 0.0 }
 0x130   : > { %v926_v6 = vadd.f32 1e-05, %v923_v5 }
 0x132   : > { %1256 = vrsqrt.f32 %v926_v6 }
 0x13f   : > { %v1257_v9 = vpop.eup %1256 }
 0x140   : > { %v928_v10 = vmul.f32 %v1257_v9, %v924_v7  ;;  %v929_v11 = vmul.f32 %v1257_v9, %v925_v8 }
 0x142   : > { %vm930_vm0 = vcmp.ge.f32.partialorder %v928_v10, 0.0  ;;  %vm931_vm1 = vcmp.ge.f32.partialorder %v929_v11, 0.0  ;;  %v932_v12 = vmul.f32 0.2, %v928_v10  ;;  %v933_v13 = vmul.f32 0.2, %v929_v11 }
 0x144   : > { %v934_v14 = vsel %vm930_vm0, %v928_v10, %v932_v12  ;;  %v935_v15 = vsel %vm931_vm1, %v929_v11, %v933_v13 }
 0x145   : > { %v1094_v16 = vpack.c.bf16 %v935_v15, %v934_v14 }
 0x147   : > { %1095 = vst [vmem:[%s170_s28] sm:$0xff] %v1094_v16  }
 0x148 PF: > { %s13_s12 = sadd.s32 1, %s1264_s12  }
 0x149   : > { %p10_p4 = scmp.ge.s32.totalorder %s13_s12, 4  }
 0x14b   :  { %12 = sbr.rel (!%p10_p4) target bundleno = 1 (0x1), region = 62 }

// kernel: discriminator_forward.8
= control target key start
LH: loop header
LB: loop body
LE: loop exit
PB: predicated region body
PF: predicated region fallthrough
CT: control target
= control target key end

     0   :  { %s3021_s12 = smov 0   ;;  %s3912_s0 = inlined_call_operand.vmem [shape: bf16[2,9,2048], index: 0, kind: input, shape index: {}]   ;;  %s3913_s1 = inlined_call_operand.vmem [shape: bf16[2048,256], index: 1, kind: input, shape index: {}]   ;;  %s3914_s2 = inlined_call_operand.vmem [shape: f32[1,256], index: 2, kind: input, shape index: {}]   ;;  %s3915_s3 = inlined_call_operand.vmem [shape: bf16[2,9,256], index: 3, kind: output, shape index: {}]  }
   0x1 LB: > { %s2308_s13 = sadd.s32 4294967295, %s2999_s12   ;;  %p2312_p0 = scmp.ge.s32.totalorder %s2999_s12, 1  ;;  %s2999_s12 = sphi %s3021_s12, %s13_s12  }
   0x2   : > { %p137_p1 = scmp.lt.s32.totalorder %s2999_s12, 3 }
   0x4   : > { %p138_p2 = pnand %p2312_p0, %p137_p1 }
   0x5   : > { %p161_p3 = scmp.lt.s32.totalorder (!%p138_p2), %s2308_s13, 1 }
   0x6   : > { %141 = sbr.rel (%p138_p2) target bundleno = 519 (0x207), region = 32 }
   0xb   : > { %v2605_v0 = vld [vmem:[%s3913_s1 + $0x74] ss:$8 sps:$4 sm:$0xff]   ;;  %v2609_v2 = vld [vmem:[%s3913_s1 + $0x70] ss:$8 sps:$4 sm:$0xff]   ;;  %v2611_v4 = vld [vmem:[%s3913_s1 + $0x64] ss:$8 sps:$4 sm:$0xff]  }
   0xc   : > { %v2607_v1 = vld [vmem:[%s3913_s1 + $0x174] ss:$8 sps:$4 sm:$0xff]   ;;  %1815 = vmatprep.subr.bf16.mxu0 %v2605_v0  ;;  %v2610_v3 = vld [vmem:[%s3913_s1 + $0x170] ss:$8 sps:$4 sm:$0xff]   ;;  %v2613_v5 = vld [vmem:[%s3913_s1 + $0x164] ss:$8 sps:$4 sm:$0xff]  }
   0xd   : > { %1858 = vmatprep.subr.bf16.mxu1 %v2607_v1  ;;  %1816 = vmatpush1.bf16.msra.mxu0 %v2609_v2  ;;  %v2615_v6 = vld [vmem:[%s3913_s1 + $0x60] ss:$8 sps:$4 sm:$0xff]   ;;  %v2617_v8 = vld [vmem:[%s3913_s1 + $0x54] ss:$8 sps:$4 sm:$0xff]   ;;  %v2621_v10 = vld [vmem:[%s3913_s1 + $0x50] ss:$8 sps:$4 sm:$0xff]  }
   0xe   : > { %1859 = vmatpush1.bf16.msra.mxu1 %v2610_v3  ;;  %1817 = vmatprep.subr.bf16.mxu0 %v2611_v4  ;;  %v2616_v7 = vld [vmem:[%s3913_s1 + $0x160] ss:$8 sps:$4 sm:$0xff]   ;;  %v2619_v9 = vld [vmem:[%s3913_s1 + $0x154] ss:$8 sps:$4 sm:$0xff]   ;;  %v2622_v11 = vld [vmem:[%s3913_s1 + $0x150] ss:$8 sps:$4 sm:$0xff]  }
   0xf   : > { %1860 = vmatprep.subr.bf16.mxu1 %v2613_v5  ;;  %v2623_v12 = vld [vmem:[%s3913_s1 + $0x44] ss:$8 sps:$4 sm:$0xff]   ;;  %v2627_v14 = vld [vmem:[%s3913_s1 + $0x40] ss:$8 sps:$4 sm:$0xff]   ;;  %v2629_v16 = vld [vmem:[%s3913_s1 + $0x34] ss:$8 sps:$4 sm:$0xff]  }
  0x10   : > { %v2625_v13 = vld [vmem:[%s3913_s1 + $0x144] ss:$8 sps:$4 sm:$0xff]   ;;  %v2628_v15 = vld [vmem:[%s3913_s1 + $0x140] ss:$8 sps:$4 sm:$0xff]   ;;  %v2631_v17 = vld [vmem:[%s3913_s1 + $0x134] ss:$8 sps:$4 sm:$0xff]  }
  0x11   : > { %1818 = vmatpush1.bf16.msra.mxu0 %v2615_v6  ;;  %v2633_v18 = vld [vmem:[%s3913_s1 + $0x30] ss:$8 sps:$4 sm:$0xff]   ;;  %v2635_v20 = vld [vmem:[%s3913_s1 + $0x24] ss:$8 sps:$4 sm:$0xff]   ;;  %v2639_v22 = vld [vmem:[%s3913_s1 + $0x20] ss:$8 sps:$4 sm:$0xff]  }
  0x12   : > { %1861 = vmatpush1.bf16.msra.mxu1 %v2616_v7  ;;  %1819 = vmatprep.subr.bf16.mxu0 %v2617_v8  ;;  %v2634_v19 = vld [vmem:[%s3913_s1 + $0x130] ss:$8 sps:$4 sm:$0xff]   ;;  %v2637_v21 = vld [vmem:[%s3913_s1 + $0x124] ss:$8 sps:$4 sm:$0xff]   ;;  %v2640_v23 = vld [vmem:[%s3913_s1 + $0x120] ss:$8 sps:$4 sm:$0xff]  }
  0x13   : > { %1862 = vmatprep.subr.bf16.mxu1 %v2619_v9  ;;  %v2641_v24 = vld [vmem:[%s3913_s1 + $0x14] ss:$8 sps:$4 sm:$0xff]   ;;  %v2645_v26 = vld [vmem:[%s3913_s1 + $0x10] ss:$8 sps:$4 sm:$0xff]   ;;  %v2647_v28 = vld [vmem:[%s3913_s1 + $0x4] ss:$8 sps:$4 sm:$0xff]  }
  0x14   : > { %v2643_v25 = vld [vmem:[%s3913_s1 + $0x114] ss:$8 sps:$4 sm:$0xff]   ;;  %v2646_v27 = vld [vmem:[%s3913_s1 + $0x110] ss:$8 sps:$4 sm:$0xff]   ;;  %v2649_v29 = vld [vmem:[%s3913_s1 + $0x104] ss:$8 sps:$4 sm:$0xff]  }
  0x15   : > { %1820 = vmatpush1.bf16.msra.mxu0 %v2621_v10  ;;  %v2651_v30 = vld [vmem:[%s3913_s1] ss:$8 sps:$4 sm:$0xff]   ;;  %v2653_v32 = vld [vmem:[%s3913_s1 + $0xf4] ss:$8 sps:$4 sm:$0xff]   ;;  %v2657_v34 = vld [vmem:[%s3913_s1 + $0xf0] ss:$8 sps:$4 sm:$0xff]  }
  0x16   : > { %1863 = vmatpush1.bf16.msra.mxu1 %v2622_v11  ;;  %1821 = vmatprep.subr.bf16.mxu0 %v2623_v12  ;;  %v2652_v31 = vld [vmem:[%s3913_s1 + $0x100] ss:$8 sps:$4 sm:$0xff]   ;;  %v2655_v33 = vld [vmem:[%s3913_s1 + $0x1f4] ss:$8 sps:$4 sm:$0xff]   ;;  %v2658_v35 = vld [vmem:[%s3913_s1 + $0x1f0] ss:$8 sps:$4 sm:$0xff]  }
  0x17   : > { %1864 = vmatprep.subr.bf16.mxu1 %v2625_v13  ;;  %v2659_v36 = vld [vmem:[%s3913_s1 + $0xe4] ss:$8 sps:$4 sm:$0xff]   ;;  %s3921_s13 = smov (!%p161_p3, %s2308_s13), 1  ;;  %v2663_v38 = vld [vmem:[%s3913_s1 + $0xe0] ss:$8 sps:$4 sm:$0xff]   ;;  %vm2159_vm0 = vcmask 1040384  }
  0x18   : > { %v2661_v37 = vld [vmem:[%s3913_s1 + $0x1e4] ss:$8 sps:$4 sm:$0xff]   ;;  %v2664_v39 = vld [vmem:[%s3913_s1 + $0x1e0] ss:$8 sps:$4 sm:$0xff]   ;;  %v2665_v40 = vld [vmem:[%s3913_s1 + $0xd4] ss:$8 sps:$4 sm:$0xff]  }
  0x19   : > { %1822 = vmatpush1.bf16.msra.mxu0 %v2627_v14  ;;  %s2593_s21 = sshll.u32 %s3921_s13, 7  ;;  %v2667_v41 = vld [vmem:[%s3913_s1 + $0x1d4] ss:$8 sps:$4 sm:$0xff]   ;;  %v2669_v42 = vld [vmem:[%s3913_s1 + $0xd0] ss:$8 sps:$4 sm:$0xff]   ;;  %vm2246_vm2 = vcmask 1044484  }
  0x1a   : > { %1865 = vmatpush1.bf16.msra.mxu1 %v2628_v15  ;;  %1823 = vmatprep.subr.bf16.mxu0 %v2629_v16  ;;  %v2670_v43 = vld [vmem:[%s3913_s1 + $0x1d0] ss:$8 sps:$4 sm:$0xff]   ;;  %s3171_s30 = scalar_lea.vmem %s3912_s0, %s2593_s21  ;;  %v2671_v44 = vld [vmem:[%s3913_s1 + $0xc4] ss:$8 sps:$4 sm:$0xff]   ;;  %v2675_v46 = vld [vmem:[%s3913_s1 + $0xc0] ss:$8 sps:$4 sm:$0xff]  }
  0x1b   : > { %1866 = vmatprep.subr.bf16.mxu1 %v2631_v17  ;;  %v2673_v45 = vld [vmem:[%s3913_s1 + $0x1c4] ss:$8 sps:$4 sm:$0xff]   ;;  %v2676_v47 = vld [vmem:[%s3913_s1 + $0x1c0] ss:$8 sps:$4 sm:$0xff]   ;;  %v2677_v52 = vld [vmem:[%s3913_s1 + $0xb4] ss:$8 sps:$4 sm:$0xff]  }
  0x1c   : > { %v428_v48 = vld [vmem:[%s3171_s30] sm:$0xff]  ;;  %v429_v50 = vld [vmem:[%s3171_s30 + $0x8] sm:$0xff]  ;;  %v2679_v54 = vld [vmem:[%s3913_s1 + $0x1b4] ss:$8 sps:$4 sm:$0xff]   ;;  %vm2244_vm1 = vsmask.f32 256 }
  0x1d   : > { %1824 = vmatpush1.bf16.msra.mxu0 %v2633_v18  ;;  %v436_v49 = vld [vmem:[%s3171_s30 + $0x40] sm:$0x11]  ;;  %v437_v51 = vld [vmem:[%s3171_s30 + $0x48] sm:$0x11]  ;;  %v2681_v56 = vld [vmem:[%s3913_s1 + $0xb0] ss:$8 sps:$4 sm:$0xff]  }
  0x1e   : > { %1867 = vmatpush1.bf16.msra.mxu1 %v2634_v19  ;;  %1825 = vmatprep.subr.bf16.mxu0 %v2635_v20  ;;  %v2318_v53 = vcombine.high %v428_v48, %v436_v49  ;;  %v2320_v55 = vcombine.high %v429_v50, %v437_v51  ;;  %v2682_v57 = vld [vmem:[%s3913_s1 + $0x1b0] ss:$8 sps:$4 sm:$0xff]   ;;  %v2683_v58 = vld [vmem:[%s3913_s1 + $0xa4] ss:$8 sps:$4 sm:$0xff]   ;;  %v2687_v60 = vld [vmem:[%s3913_s1 + $0xa0] ss:$8 sps:$4 sm:$0xff]   ;;  %v2317_v8 = vcombine.low %v428_v48, %v436_v49 }
  0x1f   : > { %1868 = vmatprep.subr.bf16.mxu1 %v2637_v21  ;;  %v2685_v59 = vld [vmem:[%s3913_s1 + $0x1a4] ss:$8 sps:$4 sm:$0xff]   ;;  %v2688_v61 = vld [vmem:[%s3913_s1 + $0x1a0] ss:$8 sps:$4 sm:$0xff]   ;;  %v2689_v62 = vld [vmem:[%s3913_s1 + $0x94] ss:$8 sps:$4 sm:$0xff]   ;;  %v2319_v9 = vcombine.low %v429_v50, %v437_v51 }
  0x20   : > { %1847 = vmatprep.mubr.bf16.mxu0 %v2318_v53  ;;  %1890 = vmatprep.mubr.bf16.mxu1 %v2320_v55  ;;  %v2691_v63 = vld [vmem:[%s3913_s1 + $0x194] ss:$8 sps:$4 sm:$0xff]   ;;  %v2693_v0 = vld [vmem:[%s3913_s1 + $0x90] ss:$8 sps:$4 sm:$0xff]   ;;  %v2695_v2 = vld [vmem:[%s3913_s1 + $0x84] ss:$8 sps:$4 sm:$0xff]  }
  0x21   : > { %1826 = vmatpush1.bf16.msra.mxu0 %v2639_v22  ;;  %v2694_v1 = vld [vmem:[%s3913_s1 + $0x190] ss:$8 sps:$4 sm:$0xff]   ;;  %v2697_v3 = vld [vmem:[%s3913_s1 + $0x184] ss:$8 sps:$4 sm:$0xff]   ;;  %v2699_v4 = vld [vmem:[%s3913_s1 + $0x80] ss:$8 sps:$4 sm:$0xff]  }
  0x22   : > { %1869 = vmatpush1.bf16.msra.mxu1 %v2640_v23  ;;  %1827 = vmatprep.subr.bf16.mxu0 %v2641_v24  ;;  %v2700_v5 = vld [vmem:[%s3913_s1 + $0x180] ss:$8 sps:$4 sm:$0xff]   ;;  %v2703_v6 = vld [vmem:[%s3913_s1 + $0x274] ss:$8 sps:$4 sm:$0xff]   ;;  %v2701_v10 = vld [vmem:[%s3913_s1 + $0x270] ss:$8 sps:$4 sm:$0xff]  }
  0x23   : > { %1870 = vmatprep.subr.bf16.mxu1 %v2643_v25  ;;  %v2706_v7 = vld [vmem:[%s3913_s1 + $0x374] ss:$8 sps:$4 sm:$0xff]   ;;  %v2704_v11 = vld [vmem:[%s3913_s1 + $0x370] ss:$8 sps:$4 sm:$0xff]   ;;  %v2709_v12 = vld [vmem:[%s3913_s1 + $0x264] ss:$8 sps:$4 sm:$0xff]  }
  0x24   : > { %v2712_v13 = vld [vmem:[%s3913_s1 + $0x364] ss:$8 sps:$4 sm:$0xff]   ;;  %v2707_v14 = vld [vmem:[%s3913_s1 + $0x260] ss:$8 sps:$4 sm:$0xff]   ;;  %v2715_v16 = vld [vmem:[%s3913_s1 + $0x254] ss:$8 sps:$4 sm:$0xff]  }
  0x25   : > { %1828 = vmatpush1.bf16.msra.mxu0 %v2645_v26  ;;  %v2710_v15 = vld [vmem:[%s3913_s1 + $0x360] ss:$8 sps:$4 sm:$0xff]   ;;  %v2718_v17 = vld [vmem:[%s3913_s1 + $0x354] ss:$8 sps:$4 sm:$0xff]   ;;  %v2713_v18 = vld [vmem:[%s3913_s1 + $0x250] ss:$8 sps:$4 sm:$0xff]  }
  0x26   : > { %1871 = vmatpush1.bf16.msra.mxu1 %v2646_v27  ;;  %1829 = vmatprep.subr.bf16.mxu0 %v2647_v28  ;;  %v2716_v19 = vld [vmem:[%s3913_s1 + $0x350] ss:$8 sps:$4 sm:$0xff]   ;;  %v2721_v20 = vld [vmem:[%s3913_s1 + $0x244] ss:$8 sps:$4 sm:$0xff]   ;;  %v2719_v22 = vld [vmem:[%s3913_s1 + $0x240] ss:$8 sps:$4 sm:$0xff]  }
  0x27   : > { %1872 = vmatprep.subr.bf16.mxu1 %v2649_v29  ;;  %v2724_v21 = vld [vmem:[%s3913_s1 + $0x344] ss:$8 sps:$4 sm:$0xff]   ;;  %v2722_v23 = vld [vmem:[%s3913_s1 + $0x340] ss:$8 sps:$4 sm:$0xff]   ;;  %v2727_v24 = vld [vmem:[%s3913_s1 + $0x234] ss:$8 sps:$4 sm:$0xff]  }
  0x28   : > { %v2730_v25 = vld [vmem:[%s3913_s1 + $0x334] ss:$8 sps:$4 sm:$0xff]   ;;  %v2725_v26 = vld [vmem:[%s3913_s1 + $0x230] ss:$8 sps:$4 sm:$0xff]   ;;  %v2733_v28 = vld [vmem:[%s3913_s1 + $0x224] ss:$8 sps:$4 sm:$0xff]  }
  0x29   : > { %1830 = vmatpush1.bf16.msra.mxu0 %v2651_v30  ;;  %v2728_v27 = vld [vmem:[%s3913_s1 + $0x330] ss:$8 sps:$4 sm:$0xff]   ;;  %v2736_v29 = vld [vmem:[%s3913_s1 + $0x324] ss:$8 sps:$4 sm:$0xff]   ;;  %v2731_v30 = vld [vmem:[%s3913_s1 + $0x220] ss:$8 sps:$4 sm:$0xff]  }
  0x2a   : > { %1873 = vmatpush1.bf16.msra.mxu1 %v2652_v31  ;;  %1831 = vmatprep.subr.bf16.mxu0 %v2653_v32  ;;  %v2734_v31 = vld [vmem:[%s3913_s1 + $0x320] ss:$8 sps:$4 sm:$0xff]   ;;  %v2739_v32 = vld [vmem:[%s3913_s1 + $0x214] ss:$8 sps:$4 sm:$0xff]   ;;  %v2749_v48 = vld [vmem:[%s3913_s1 + $0x2f0] ss:$8 sps:$4 sm:$0xff]  }
  0x2b   : > { %1874 = vmatprep.subr.bf16.mxu1 %v2655_v33  ;;  %v2742_v33 = vld [vmem:[%s3913_s1 + $0x314] ss:$8 sps:$4 sm:$0xff]   ;;  %v2752_v49 = vld [vmem:[%s3913_s1 + $0x3f0] ss:$8 sps:$4 sm:$0xff]   ;;  %v2757_v50 = vld [vmem:[%s3913_s1 + $0x2e4] ss:$8 sps:$4 sm:$0xff]  }
  0x2c   : > { %v2760_v51 = vld [vmem:[%s3913_s1 + $0x3e4] ss:$8 sps:$4 sm:$0xff]   ;;  %v2758_v53 = vld [vmem:[%s3913_s1 + $0x3e0] ss:$8 sps:$4 sm:$0xff]   ;;  %v2766_v55 = vld [vmem:[%s3913_s1 + $0x3d4] ss:$8 sps:$4 sm:$0xff]  }
  0x2d   : > { %1832 = vmatpush2.bf16.msra.mxu0 %v2657_v34  ;;  %v2737_v34 = vld [vmem:[%s3913_s1 + $0x210] ss:$8 sps:$4 sm:$0xff]   ;;  %vm2247_vm3 = vsmask.f32 4352  ;;  %s2594_s19 = sshll.u32 %s3921_s13, 4  ;;  %vm3894_vm4 = vmand %vm2159_vm0, %vm2244_vm1 }
  0x2e   : > { %1875 = vmatpush2.bf16.msra.mxu1 %v2658_v35  ;;  %1833 = vmatprep.subr.bf16.mxu0 %v2659_v36  ;;  %v2740_v35 = vld [vmem:[%s3913_s1 + $0x310] ss:$8 sps:$4 sm:$0xff]   ;;  %vm3898_vm7 = vmand %vm2246_vm2, %vm2247_vm3  ;;  %s170_s21 = scalar_lea.vmem %s3915_s3, %s2594_s19 }
  0x2f   : > { %1876 = vmatprep.subr.bf16.mxu1 %v2661_v37  ;;  %v3322_v36 = vld [vmem:[%s3171_s30 + $0x10] sm:$0xff]  ;;  %vm2249_vm10 = vmor %vm3898_vm7, %vm3894_vm4 }
  0x30   : > { %v3325_v37 = vld [vmem:[%s3171_s30 + $0x50] sm:$0x11] }
  0x31   : > { %1834 = vmatpush2.bf16.msra.mxu0 %v2663_v38  ;;  %v3328_v38 = vld [vmem:[%s3171_s30 + $0x18] sm:$0xff] }
  0x32   : > { %1877 = vmatpush2.bf16.msra.mxu1 %v2664_v39  ;;  %1835 = vmatprep.subr.bf16.mxu0 %v2665_v40  ;;  %v3331_v39 = vld [vmem:[%s3171_s30 + $0x58] sm:$0x11]  ;;  %v2745_v40 = vld [vmem:[%s3913_s1 + $0x204] ss:$8 sps:$4 sm:$0xff]  }
  0x33   : > { %1878 = vmatprep.subr.bf16.mxu1 %v2667_v41  ;;  %v2322_v41 = vcombine.high %v3322_v36, %v3325_v37 }
  0x35   : > { %1836 = vmatpush2.bf16.msra.mxu0 %v2669_v42  ;;  %v2748_v42 = vld [vmem:[%s3913_s1 + $0x304] ss:$8 sps:$4 sm:$0xff]  }
  0x36   : > { %1879 = vmatpush2.bf16.msra.mxu1 %v2670_v43  ;;  %1837 = vmatprep.subr.bf16.mxu0 %v2671_v44  ;;  %v2324_v43 = vcombine.high %v3328_v38, %v3331_v39  ;;  %v2743_v44 = vld [vmem:[%s3913_s1 + $0x200] ss:$8 sps:$4 sm:$0xff]  }
  0x37   : > { %1880 = vmatprep.subr.bf16.mxu1 %v2673_v45  ;;  %v2746_v45 = vld [vmem:[%s3913_s1 + $0x300] ss:$8 sps:$4 sm:$0xff]  }
  0x39   : > { %1838 = vmatpush2.bf16.msra.mxu0 %v2675_v46  ;;  %v2751_v46 = vld [vmem:[%s3913_s1 + $0x2f4] ss:$8 sps:$4 sm:$0xff]  }
  0x3a   : > { %1881 = vmatpush2.bf16.msra.mxu1 %v2676_v47  ;;  %1839 = vmatprep.subr.bf16.mxu0 %v2677_v52  ;;  %v2754_v47 = vld [vmem:[%s3913_s1 + $0x3f4] ss:$8 sps:$4 sm:$0xff]   ;;  %v2755_v52 = vld [vmem:[%s3913_s1 + $0x2e0] ss:$8 sps:$4 sm:$0xff]  }
  0x3b   : > { %1882 = vmatprep.subr.bf16.mxu1 %v2679_v54  ;;  %v2763_v54 = vld [vmem:[%s3913_s1 + $0x2d4] ss:$8 sps:$4 sm:$0xff]  }
  0x3d   : > { %1840 = vmatpush2.bf16.msra.mxu0 %v2681_v56  ;;  %v2761_v56 = vld [vmem:[%s3913_s1 + $0x2d0] ss:$8 sps:$4 sm:$0xff]  }
  0x3e   : > { %1883 = vmatpush2.bf16.msra.mxu1 %v2682_v57  ;;  %1841 = vmatprep.subr.bf16.mxu0 %v2683_v58  ;;  %v2764_v57 = vld [vmem:[%s3913_s1 + $0x3d0] ss:$8 sps:$4 sm:$0xff]   ;;  %v2769_v58 = vld [vmem:[%s3913_s1 + $0x2c4] ss:$8 sps:$4 sm:$0xff]  }
  0x3f   : > { %1884 = vmatprep.subr.bf16.mxu1 %v2685_v59  ;;  %v2772_v59 = vld [vmem:[%s3913_s1 + $0x3c4] ss:$8 sps:$4 sm:$0xff]  }
  0x41   : > { %1842 = vmatpush2.bf16.msra.mxu0 %v2687_v60  ;;  %v2767_v60 = vld [vmem:[%s3913_s1 + $0x2c0] ss:$8 sps:$4 sm:$0xff]  }
  0x42   : > { %1885 = vmatpush2.bf16.msra.mxu1 %v2688_v61  ;;  %1843 = vmatprep.subr.bf16.mxu0 %v2689_v62  ;;  %v2770_v61 = vld [vmem:[%s3913_s1 + $0x3c0] ss:$8 sps:$4 sm:$0xff]   ;;  %v2775_v62 = vld [vmem:[%s3913_s1 + $0x2b4] ss:$8 sps:$4 sm:$0xff]  }
  0x43   : > { %1886 = vmatprep.subr.bf16.mxu1 %v2691_v63  ;;  %v2778_v63 = vld [vmem:[%s3913_s1 + $0x3b4] ss:$8 sps:$4 sm:$0xff]  }
  0x45   : > { %1844 = vmatpush2.bf16.msra.mxu0 %v2693_v0  ;;  %v2773_v0 = vld [vmem:[%s3913_s1 + $0x2b0] ss:$8 sps:$4 sm:$0xff]  }
  0x46   : > { %1887 = vmatpush2.bf16.msra.mxu1 %v2694_v1  ;;  %1845 = vmatprep.subr.bf16.mxu0 %v2695_v2  ;;  %v2776_v1 = vld [vmem:[%s3913_s1 + $0x3b0] ss:$8 sps:$4 sm:$0xff]   ;;  %v2781_v2 = vld [vmem:[%s3913_s1 + $0x2a4] ss:$8 sps:$4 sm:$0xff]  }
  0x47   : > { %1888 = vmatprep.subr.bf16.mxu1 %v2697_v3  ;;  %v2784_v3 = vld [vmem:[%s3913_s1 + $0x3a4] ss:$8 sps:$4 sm:$0xff]  }
  0x49   : > { %1846 = vmatpush2.bf16.msra.mxu0 %v2699_v4  ;;  %v2779_v4 = vld [vmem:[%s3913_s1 + $0x2a0] ss:$8 sps:$4 sm:$0xff]  }
  0x4a   : > { %1889 = vmatpush2.bf16.msra.mxu1 %v2700_v5  ;;  %1901 = vmatprep.subr.bf16.mxu0 %v2703_v6  ;;  %v2782_v5 = vld [vmem:[%s3913_s1 + $0x3a0] ss:$8 sps:$4 sm:$0xff]   ;;  %v2787_v6 = vld [vmem:[%s3913_s1 + $0x294] ss:$8 sps:$4 sm:$0xff]  }
  0x4b   : > { %1944 = vmatprep.subr.bf16.mxu1 %v2706_v7  ;;  %v2790_v7 = vld [vmem:[%s3913_s1 + $0x394] ss:$8 sps:$4 sm:$0xff]  }
  0x4c   : > { %1848 = vmatmul.mubr.bf16.vlgmr.msra.gmra.mxu0 %v2317_v8  ;;  %v2785_v8 = vld [vmem:[%s3913_s1 + $0x290] ss:$8 sps:$4 sm:$0xff]  }
  0x4d   : > { %1891 = vmatmul.mubr.bf16.vlgmr.msra.gmra.mxu1 %v2319_v9  ;;  %1902 = vmatpush1.bf16.msra.mxu0 %v2701_v10  ;;  %v2788_v9 = vld [vmem:[%s3913_s1 + $0x390] ss:$8 sps:$4 sm:$0xff]   ;;  %v2793_v10 = vld [vmem:[%s3913_s1 + $0x284] ss:$8 sps:$4 sm:$0xff]  }
  0x4e   : > { %1945 = vmatpush1.bf16.msra.mxu1 %v2704_v11  ;;  %1903 = vmatprep.subr.bf16.mxu0 %v2709_v12  ;;  %v2796_v11 = vld [vmem:[%s3913_s1 + $0x384] ss:$8 sps:$4 sm:$0xff]   ;;  %v2791_v12 = vld [vmem:[%s3913_s1 + $0x280] ss:$8 sps:$4 sm:$0xff]  }
  0x4f   : > { %1946 = vmatprep.subr.bf16.mxu1 %v2712_v13  ;;  %1933 = vmatprep.mubr.bf16.mxu0 %v2322_v41  ;;  %v2794_v13 = vld [vmem:[%s3913_s1 + $0x380] ss:$8 sps:$4 sm:$0xff]   ;;  %v2824_v41 = vld [vmem:[%s3913_s1 + $0x530] ss:$8 sps:$4 sm:$0xff]  }
  0x50   : > { %1976 = vmatprep.mubr.bf16.mxu1 %v2324_v43  ;;  %v2832_v43 = vld [vmem:[%s3913_s1 + $0x524] ss:$8 sps:$4 sm:$0xff]  }
  0x51   : > { %1904 = vmatpush1.bf16.msra.mxu0 %v2707_v14  ;;  %v2799_v14 = vld [vmem:[%s3913_s1 + $0x474] ss:$8 sps:$4 sm:$0xff]  }
  0x52   : > { %1947 = vmatpush1.bf16.msra.mxu1 %v2710_v15  ;;  %1905 = vmatprep.subr.bf16.mxu0 %v2715_v16  ;;  %v2802_v15 = vld [vmem:[%s3913_s1 + $0x574] ss:$8 sps:$4 sm:$0xff]   ;;  %v2321_v16 = vcombine.low %v3322_v36, %v3325_v37  ;;  %v2815_v36 = vld [vmem:[%s3913_s1 + $0x440] ss:$8 sps:$4 sm:$0xff]  }
  0x53   : > { %1948 = vmatprep.subr.bf16.mxu1 %v2718_v17  ;;  %v2323_v17 = vcombine.low %v3328_v38, %v3331_v39  ;;  %v2818_v37 = vld [vmem:[%s3913_s1 + $0x540] ss:$8 sps:$4 sm:$0xff]   ;;  %v2823_v38 = vld [vmem:[%s3913_s1 + $0x434] ss:$8 sps:$4 sm:$0xff]  }
  0x54   : > { %v2826_v39 = vld [vmem:[%s3913_s1 + $0x534] ss:$8 sps:$4 sm:$0xff]  }
  0x55   : > { %1906 = vmatpush1.bf16.msra.mxu0 %v2713_v18  ;;  %v2797_v18 = vld [vmem:[%s3913_s1 + $0x470] ss:$8 sps:$4 sm:$0xff]  }
  0x56   : > { %1949 = vmatpush1.bf16.msra.mxu1 %v2716_v19  ;;  %1907 = vmatprep.subr.bf16.mxu0 %v2721_v20  ;;  %v2800_v19 = vld [vmem:[%s3913_s1 + $0x570] ss:$8 sps:$4 sm:$0xff]   ;;  %v2805_v20 = vld [vmem:[%s3913_s1 + $0x464] ss:$8 sps:$4 sm:$0xff]  }
  0x57   : > { %1950 = vmatprep.subr.bf16.mxu1 %v2724_v21  ;;  %v2808_v21 = vld [vmem:[%s3913_s1 + $0x564] ss:$8 sps:$4 sm:$0xff]  }
  0x59   : > { %1908 = vmatpush1.bf16.msra.mxu0 %v2719_v22  ;;  %v2803_v22 = vld [vmem:[%s3913_s1 + $0x460] ss:$8 sps:$4 sm:$0xff]  }
  0x5a   : > { %1951 = vmatpush1.bf16.msra.mxu1 %v2722_v23  ;;  %1909 = vmatprep.subr.bf16.mxu0 %v2727_v24  ;;  %v2806_v23 = vld [vmem:[%s3913_s1 + $0x560] ss:$8 sps:$4 sm:$0xff]  }
  0x5b   : > { %1952 = vmatprep.subr.bf16.mxu1 %v2730_v25  ;;  %v3474_v24 = vld [vmem:[%s3171_s30 + $0x20] sm:$0xff] }
  0x5c   : > { %v3477_v25 = vld [vmem:[%s3171_s30 + $0x60] sm:$0x11] }
  0x5d   : > { %1910 = vmatpush1.bf16.msra.mxu0 %v2725_v26  ;;  %v3480_v26 = vld [vmem:[%s3171_s30 + $0x28] sm:$0xff] }
  0x5e   : > { %1953 = vmatpush1.bf16.msra.mxu1 %v2728_v27  ;;  %1911 = vmatprep.subr.bf16.mxu0 %v2733_v28  ;;  %v3483_v27 = vld [vmem:[%s3171_s30 + $0x68] sm:$0x11]  ;;  %v2811_v28 = vld [vmem:[%s3913_s1 + $0x454] ss:$8 sps:$4 sm:$0xff]  }
  0x5f   : > { %1954 = vmatprep.subr.bf16.mxu1 %v2736_v29  ;;  %v2326_v29 = vcombine.high %v3474_v24, %v3477_v25 }
  0x61   : > { %1912 = vmatpush1.bf16.msra.mxu0 %v2731_v30  ;;  %v2814_v30 = vld [vmem:[%s3913_s1 + $0x554] ss:$8 sps:$4 sm:$0xff]  }
  0x62   : > { %1955 = vmatpush1.bf16.msra.mxu1 %v2734_v31  ;;  %1913 = vmatprep.subr.bf16.mxu0 %v2739_v32  ;;  %v2328_v31 = vcombine.high %v3480_v26, %v3483_v27  ;;  %v2809_v32 = vld [vmem:[%s3913_s1 + $0x450] ss:$8 sps:$4 sm:$0xff]  }
  0x63   : > { %1956 = vmatprep.subr.bf16.mxu1 %v2742_v33  ;;  %v2812_v33 = vld [vmem:[%s3913_s1 + $0x550] ss:$8 sps:$4 sm:$0xff]  }
  0x65   : > { %1914 = vmatpush1.bf16.msra.mxu0 %v2737_v34  ;;  %v2817_v34 = vld [vmem:[%s3913_s1 + $0x444] ss:$8 sps:$4 sm:$0xff]  }
  0x66   : > { %1957 = vmatpush1.bf16.msra.mxu1 %v2740_v35  ;;  %1915 = vmatprep.subr.bf16.mxu0 %v2745_v40  ;;  %v2820_v35 = vld [vmem:[%s3913_s1 + $0x544] ss:$8 sps:$4 sm:$0xff]   ;;  %v2821_v40 = vld [vmem:[%s3913_s1 + $0x430] ss:$8 sps:$4 sm:$0xff]  }
  0x67   : > { %1958 = vmatprep.subr.bf16.mxu1 %v2748_v42  ;;  %v2829_v42 = vld [vmem:[%s3913_s1 + $0x424] ss:$8 sps:$4 sm:$0xff]  }
  0x69   : > { %1916 = vmatpush1.bf16.msra.mxu0 %v2743_v44  ;;  %v2827_v44 = vld [vmem:[%s3913_s1 + $0x420] ss:$8 sps:$4 sm:$0xff]  }
  0x6a   : > { %1959 = vmatpush1.bf16.msra.mxu1 %v2746_v45  ;;  %1917 = vmatprep.subr.bf16.mxu0 %v2751_v46  ;;  %v2830_v45 = vld [vmem:[%s3913_s1 + $0x520] ss:$8 sps:$4 sm:$0xff]   ;;  %v2835_v46 = vld [vmem:[%s3913_s1 + $0x414] ss:$8 sps:$4 sm:$0xff]  }
  0x6b   : > { %1960 = vmatprep.subr.bf16.mxu1 %v2754_v47  ;;  %v2838_v47 = vld [vmem:[%s3913_s1 + $0x514] ss:$8 sps:$4 sm:$0xff]  }
  0x6d   : > { %1918 = vmatpush2.bf16.msra.mxu0 %v2749_v48  ;;  %v2833_v48 = vld [vmem:[%s3913_s1 + $0x410] ss:$8 sps:$4 sm:$0xff]  }
  0x6e   : > { %1961 = vmatpush2.bf16.msra.mxu1 %v2752_v49  ;;  %1919 = vmatprep.subr.bf16.mxu0 %v2757_v50  ;;  %v2836_v49 = vld [vmem:[%s3913_s1 + $0x510] ss:$8 sps:$4 sm:$0xff]   ;;  %v2841_v50 = vld [vmem:[%s3913_s1 + $0x404] ss:$8 sps:$4 sm:$0xff]  }
  0x6f   : > { %1962 = vmatprep.subr.bf16.mxu1 %v2760_v51  ;;  %v2844_v51 = vld [vmem:[%s3913_s1 + $0x504] ss:$8 sps:$4 sm:$0xff]  }
  0x71   : > { %1920 = vmatpush2.bf16.msra.mxu0 %v2755_v52  ;;  %v2839_v52 = vld [vmem:[%s3913_s1 + $0x400] ss:$8 sps:$4 sm:$0xff]  }
  0x72   : > { %1963 = vmatpush2.bf16.msra.mxu1 %v2758_v53  ;;  %1921 = vmatprep.subr.bf16.mxu0 %v2763_v54  ;;  %v2842_v53 = vld [vmem:[%s3913_s1 + $0x500] ss:$8 sps:$4 sm:$0xff]   ;;  %v2847_v54 = vld [vmem:[%s3913_s1 + $0x4f4] ss:$8 sps:$4 sm:$0xff]  }
  0x73   : > { %1964 = vmatprep.subr.bf16.mxu1 %v2766_v55  ;;  %v2850_v55 = vld [vmem:[%s3913_s1 + $0x5f4] ss:$8 sps:$4 sm:$0xff]  }
  0x75   : > { %1922 = vmatpush2.bf16.msra.mxu0 %v2761_v56  ;;  %v2845_v56 = vld [vmem:[%s3913_s1 + $0x4f0] ss:$8 sps:$4 sm:$0xff]  }
  0x76   : > { %1965 = vmatpush2.bf16.msra.mxu1 %v2764_v57  ;;  %1923 = vmatprep.subr.bf16.mxu0 %v2769_v58  ;;  %v2848_v57 = vld [vmem:[%s3913_s1 + $0x5f0] ss:$8 sps:$4 sm:$0xff]   ;;  %v2853_v58 = vld [vmem:[%s3913_s1 + $0x4e4] ss:$8 sps:$4 sm:$0xff]  }
  0x77   : > { %1966 = vmatprep.subr.bf16.mxu1 %v2772_v59  ;;  %v2856_v59 = vld [vmem:[%s3913_s1 + $0x5e4] ss:$8 sps:$4 sm:$0xff]  }
  0x79   : > { %1924 = vmatpush2.bf16.msra.mxu0 %v2767_v60  ;;  %v2851_v60 = vld [vmem:[%s3913_s1 + $0x4e0] ss:$8 sps:$4 sm:$0xff]  }
  0x7a   : > { %1967 = vmatpush2.bf16.msra.mxu1 %v2770_v61  ;;  %1925 = vmatprep.subr.bf16.mxu0 %v2775_v62  ;;  %v2854_v61 = vld [vmem:[%s3913_s1 + $0x5e0] ss:$8 sps:$4 sm:$0xff]   ;;  %v2859_v62 = vld [vmem:[%s3913_s1 + $0x4d4] ss:$8 sps:$4 sm:$0xff]  }
  0x7b   : > { %1968 = vmatprep.subr.bf16.mxu1 %v2778_v63  ;;  %v2862_v63 = vld [vmem:[%s3913_s1 + $0x5d4] ss:$8 sps:$4 sm:$0xff]  }
  0x7d   : > { %1926 = vmatpush2.bf16.msra.mxu0 %v2773_v0  ;;  %v2857_v0 = vld [vmem:[%s3913_s1 + $0x4d0] ss:$8 sps:$4 sm:$0xff]  }
  0x7e   : > { %1969 = vmatpush2.bf16.msra.mxu1 %v2776_v1  ;;  %1927 = vmatprep.subr.bf16.mxu0 %v2781_v2  ;;  %v2860_v1 = vld [vmem:[%s3913_s1 + $0x5d0] ss:$8 sps:$4 sm:$0xff]   ;;  %v2865_v2 = vld [vmem:[%s3913_s1 + $0x4c4] ss:$8 sps:$4 sm:$0xff]  }
  0x7f   : > { %1970 = vmatprep.subr.bf16.mxu1 %v2784_v3  ;;  %v2868_v3 = vld [vmem:[%s3913_s1 + $0x5c4] ss:$8 sps:$4 sm:$0xff]  }
  0x81   : > { %1928 = vmatpush2.bf16.msra.mxu0 %v2779_v4  ;;  %v2863_v4 = vld [vmem:[%s3913_s1 + $0x4c0] ss:$8 sps:$4 sm:$0xff]  }
  0x82   : > { %1971 = vmatpush2.bf16.msra.mxu1 %v2782_v5  ;;  %1929 = vmatprep.subr.bf16.mxu0 %v2787_v6  ;;  %v2866_v5 = vld [vmem:[%s3913_s1 + $0x5c0] ss:$8 sps:$4 sm:$0xff]   ;;  %v2871_v6 = vld [vmem:[%s3913_s1 + $0x4b4] ss:$8 sps:$4 sm:$0xff]  }
  0x83   : > { %1972 = vmatprep.subr.bf16.mxu1 %v2790_v7  ;;  %v2874_v7 = vld [vmem:[%s3913_s1 + $0x5b4] ss:$8 sps:$4 sm:$0xff]  }
  0x85   : > { %1930 = vmatpush2.bf16.msra.mxu0 %v2785_v8  ;;  %v2869_v8 = vld [vmem:[%s3913_s1 + $0x4b0] ss:$8 sps:$4 sm:$0xff]  }
  0x86   : > { %1973 = vmatpush2.bf16.msra.mxu1 %v2788_v9  ;;  %1931 = vmatprep.subr.bf16.mxu0 %v2793_v10  ;;  %v2872_v9 = vld [vmem:[%s3913_s1 + $0x5b0] ss:$8 sps:$4 sm:$0xff]   ;;  %v2877_v10 = vld [vmem:[%s3913_s1 + $0x4a4] ss:$8 sps:$4 sm:$0xff]  }
  0x87   : > { %1974 = vmatprep.subr.bf16.mxu1 %v2796_v11  ;;  %v2880_v11 = vld [vmem:[%s3913_s1 + $0x5a4] ss:$8 sps:$4 sm:$0xff]  }
  0x89   : > { %1932 = vmatpush2.bf16.msra.mxu0 %v2791_v12  ;;  %v2875_v12 = vld [vmem:[%s3913_s1 + $0x4a0] ss:$8 sps:$4 sm:$0xff]  }
  0x8a   : > { %1975 = vmatpush2.bf16.msra.mxu1 %v2794_v13  ;;  %1987 = vmatprep.subr.bf16.mxu0 %v2799_v14  ;;  %v2878_v13 = vld [vmem:[%s3913_s1 + $0x5a0] ss:$8 sps:$4 sm:$0xff]   ;;  %v2883_v14 = vld [vmem:[%s3913_s1 + $0x494] ss:$8 sps:$4 sm:$0xff]  }
  0x8b   : > { %2030 = vmatprep.subr.bf16.mxu1 %v2802_v15  ;;  %v2886_v15 = vld [vmem:[%s3913_s1 + $0x594] ss:$8 sps:$4 sm:$0xff]  }
  0x8c   : > { %1934 = vmatmul.mubr.bf16.vlgmr.msra.gmra.mxu0 %v2321_v16  ;;  %v2881_v16 = vld [vmem:[%s3913_s1 + $0x490] ss:$8 sps:$4 sm:$0xff]  }
  0x8d   : > { %1977 = vmatmul.mubr.bf16.vlgmr.msra.gmra.mxu1 %v2323_v17  ;;  %1988 = vmatpush1.bf16.msra.mxu0 %v2797_v18  ;;  %v2884_v17 = vld [vmem:[%s3913_s1 + $0x590] ss:$8 sps:$4 sm:$0xff]   ;;  %v2889_v18 = vld [vmem:[%s3913_s1 + $0x484] ss:$8 sps:$4 sm:$0xff]  }
  0x8e   : > { %2031 = vmatpush1.bf16.msra.mxu1 %v2800_v19  ;;  %1989 = vmatprep.subr.bf16.mxu0 %v2805_v20  ;;  %v2892_v19 = vld [vmem:[%s3913_s1 + $0x584] ss:$8 sps:$4 sm:$0xff]   ;;  %v2887_v20 = vld [vmem:[%s3913_s1 + $0x480] ss:$8 sps:$4 sm:$0xff]  }
  0x8f   : > { %2032 = vmatprep.subr.bf16.mxu1 %v2808_v21  ;;  %2019 = vmatprep.mubr.bf16.mxu0 %v2326_v29  ;;  %v2890_v21 = vld [vmem:[%s3913_s1 + $0x580] ss:$8 sps:$4 sm:$0xff]   ;;  %v2325_v29 = vcombine.low %v3474_v24, %v3477_v25  ;;  %v2901_v24 = vld [vmem:[%s3913_s1 + $0x664] ss:$8 sps:$4 sm:$0xff]  }
  0x90   : > { %2062 = vmatprep.mubr.bf16.mxu1 %v2328_v31  ;;  %v3671_v31 = vld [vmem:[%s3171_s30 + $0x70] sm:$0x11]  ;;  %v2904_v25 = vld [vmem:[%s3913_s1 + $0x764] ss:$8 sps:$4 sm:$0xff]  }
  0x91   : > { %1990 = vmatpush1.bf16.msra.mxu0 %v2803_v22  ;;  %v2895_v22 = vld [vmem:[%s3913_s1 + $0x674] ss:$8 sps:$4 sm:$0xff]  }
  0x92   : > { %2033 = vmatpush1.bf16.msra.mxu1 %v2806_v23  ;;  %1991 = vmatprep.subr.bf16.mxu0 %v2811_v28  ;;  %v2898_v23 = vld [vmem:[%s3913_s1 + $0x774] ss:$8 sps:$4 sm:$0xff]  }
  0x93   : > { %2034 = vmatprep.subr.bf16.mxu1 %v2814_v30  ;;  %v3664_v28 = vld [vmem:[%s3171_s30 + $0x30] sm:$0xff]  ;;  %v2327_v30 = vcombine.low %v3480_v26, %v3483_v27 }
  0x94   : > { %v2330_v26 = vcombine.high %v3664_v28, %v3671_v31 }
  0x95   : > { %1992 = vmatpush1.bf16.msra.mxu0 %v2809_v32  ;;  %v3674_v32 = vld [vmem:[%s3171_s30 + $0x38] sm:$0xff] }
  0x96   : > { %2035 = vmatpush1.bf16.msra.mxu1 %v2812_v33  ;;  %1993 = vmatprep.subr.bf16.mxu0 %v2817_v34  ;;  %v3677_v33 = vld [vmem:[%s3171_s30 + $0x78] sm:$0x11] }
  0x97   : > { %2036 = vmatprep.subr.bf16.mxu1 %v2820_v35  ;;  %v2893_v34 = vld [vmem:[%s3913_s1 + $0x670] ss:$8 sps:$4 sm:$0xff]   ;;  %v2332_v27 = vcombine.high %v3674_v32, %v3677_v33 }
  0x98   : > { %v2896_v35 = vld [vmem:[%s3913_s1 + $0x770] ss:$8 sps:$4 sm:$0xff]  }
  0x99   : > { %1994 = vmatpush1.bf16.msra.mxu0 %v2815_v36  ;;  %v2899_v36 = vld [vmem:[%s3913_s1 + $0x660] ss:$8 sps:$4 sm:$0xff]  }
  0x9a   : > { %2037 = vmatpush1.bf16.msra.mxu1 %v2818_v37  ;;  %1995 = vmatprep.subr.bf16.mxu0 %v2823_v38  ;;  %v2902_v37 = vld [vmem:[%s3913_s1 + $0x760] ss:$8 sps:$4 sm:$0xff]   ;;  %v2907_v38 = vld [vmem:[%s3913_s1 + $0x654] ss:$8 sps:$4 sm:$0xff]  }
  0x9b   : > { %2038 = vmatprep.subr.bf16.mxu1 %v2826_v39  ;;  %v2910_v39 = vld [vmem:[%s3913_s1 + $0x754] ss:$8 sps:$4 sm:$0xff]  }
  0x9d   : > { %1996 = vmatpush1.bf16.msra.mxu0 %v2821_v40  ;;  %v2905_v40 = vld [vmem:[%s3913_s1 + $0x650] ss:$8 sps:$4 sm:$0xff]  }
  0x9e   : > { %2039 = vmatpush1.bf16.msra.mxu1 %v2824_v41  ;;  %1997 = vmatprep.subr.bf16.mxu0 %v2829_v42  ;;  %v2908_v41 = vld [vmem:[%s3913_s1 + $0x750] ss:$8 sps:$4 sm:$0xff]   ;;  %v2913_v42 = vld [vmem:[%s3913_s1 + $0x644] ss:$8 sps:$4 sm:$0xff]  }
  0x9f   : > { %2040 = vmatprep.subr.bf16.mxu1 %v2832_v43  ;;  %v2916_v43 = vld [vmem:[%s3913_s1 + $0x744] ss:$8 sps:$4 sm:$0xff]  }
  0xa1   : > { %1998 = vmatpush1.bf16.msra.mxu0 %v2827_v44  ;;  %v2911_v44 = vld [vmem:[%s3913_s1 + $0x640] ss:$8 sps:$4 sm:$0xff]  }
  0xa2   : > { %2041 = vmatpush1.bf16.msra.mxu1 %v2830_v45  ;;  %1999 = vmatprep.subr.bf16.mxu0 %v2835_v46  ;;  %v2914_v45 = vld [vmem:[%s3913_s1 + $0x740] ss:$8 sps:$4 sm:$0xff]   ;;  %v2919_v46 = vld [vmem:[%s3913_s1 + $0x634] ss:$8 sps:$4 sm:$0xff]  }
  0xa3   : > { %2042 = vmatprep.subr.bf16.mxu1 %v2838_v47  ;;  %v2922_v47 = vld [vmem:[%s3913_s1 + $0x734] ss:$8 sps:$4 sm:$0xff]  }
  0xa5   : > { %2000 = vmatpush1.bf16.msra.mxu0 %v2833_v48  ;;  %v2917_v48 = vld [vmem:[%s3913_s1 + $0x630] ss:$8 sps:$4 sm:$0xff]  }
  0xa6   : > { %2043 = vmatpush1.bf16.msra.mxu1 %v2836_v49  ;;  %2001 = vmatprep.subr.bf16.mxu0 %v2841_v50  ;;  %v2920_v49 = vld [vmem:[%s3913_s1 + $0x730] ss:$8 sps:$4 sm:$0xff]   ;;  %v2925_v50 = vld [vmem:[%s3913_s1 + $0x624] ss:$8 sps:$4 sm:$0xff]  }
  0xa7   : > { %2044 = vmatprep.subr.bf16.mxu1 %v2844_v51  ;;  %v2928_v51 = vld [vmem:[%s3913_s1 + $0x724] ss:$8 sps:$4 sm:$0xff]  }
  0xa9   : > { %2002 = vmatpush1.bf16.msra.mxu0 %v2839_v52  ;;  %v2923_v52 = vld [vmem:[%s3913_s1 + $0x620] ss:$8 sps:$4 sm:$0xff]  }
  0xaa   : > { %2045 = vmatpush1.bf16.msra.mxu1 %v2842_v53  ;;  %2003 = vmatprep.subr.bf16.mxu0 %v2847_v54  ;;  %v2926_v53 = vld [vmem:[%s3913_s1 + $0x720] ss:$8 sps:$4 sm:$0xff]   ;;  %v2931_v54 = vld [vmem:[%s3913_s1 + $0x614] ss:$8 sps:$4 sm:$0xff]  }
  0xab   : > { %2046 = vmatprep.subr.bf16.mxu1 %v2850_v55  ;;  %v2934_v55 = vld [vmem:[%s3913_s1 + $0x714] ss:$8 sps:$4 sm:$0xff]  }
  0xad   : > { %2004 = vmatpush2.bf16.msra.mxu0 %v2845_v56  ;;  %v2929_v56 = vld [vmem:[%s3913_s1 + $0x610] ss:$8 sps:$4 sm:$0xff]  }
  0xae   : > { %2047 = vmatpush2.bf16.msra.mxu1 %v2848_v57  ;;  %2005 = vmatprep.subr.bf16.mxu0 %v2853_v58  ;;  %v2932_v57 = vld [vmem:[%s3913_s1 + $0x710] ss:$8 sps:$4 sm:$0xff]   ;;  %v2937_v58 = vld [vmem:[%s3913_s1 + $0x604] ss:$8 sps:$4 sm:$0xff]  }
  0xaf   : > { %2048 = vmatprep.subr.bf16.mxu1 %v2856_v59  ;;  %v2940_v59 = vld [vmem:[%s3913_s1 + $0x704] ss:$8 sps:$4 sm:$0xff]  }
  0xb1   : > { %2006 = vmatpush2.bf16.msra.mxu0 %v2851_v60  ;;  %v2935_v60 = vld [vmem:[%s3913_s1 + $0x600] ss:$8 sps:$4 sm:$0xff]  }
  0xb2   : > { %2049 = vmatpush2.bf16.msra.mxu1 %v2854_v61  ;;  %2007 = vmatprep.subr.bf16.mxu0 %v2859_v62  ;;  %v2938_v61 = vld [vmem:[%s3913_s1 + $0x700] ss:$8 sps:$4 sm:$0xff]   ;;  %v2943_v62 = vld [vmem:[%s3913_s1 + $0x6f4] ss:$8 sps:$4 sm:$0xff]  }
  0xb3   : > { %2050 = vmatprep.subr.bf16.mxu1 %v2862_v63  ;;  %v2946_v63 = vld [vmem:[%s3913_s1 + $0x7f4] ss:$8 sps:$4 sm:$0xff]  }
  0xb5   : > { %2008 = vmatpush2.bf16.msra.mxu0 %v2857_v0  ;;  %v2941_v0 = vld [vmem:[%s3913_s1 + $0x6f0] ss:$8 sps:$4 sm:$0xff]  }
  0xb6   : > { %2051 = vmatpush2.bf16.msra.mxu1 %v2860_v1  ;;  %2009 = vmatprep.subr.bf16.mxu0 %v2865_v2  ;;  %v2944_v1 = vld [vmem:[%s3913_s1 + $0x7f0] ss:$8 sps:$4 sm:$0xff]   ;;  %v2949_v2 = vld [vmem:[%s3913_s1 + $0x6e4] ss:$8 sps:$4 sm:$0xff]  }
  0xb7   : > { %2052 = vmatprep.subr.bf16.mxu1 %v2868_v3  ;;  %v2952_v3 = vld [vmem:[%s3913_s1 + $0x7e4] ss:$8 sps:$4 sm:$0xff]  }
  0xb9   : > { %2010 = vmatpush2.bf16.msra.mxu0 %v2863_v4  ;;  %v2947_v4 = vld [vmem:[%s3913_s1 + $0x6e0] ss:$8 sps:$4 sm:$0xff]  }
  0xba   : > { %2053 = vmatpush2.bf16.msra.mxu1 %v2866_v5  ;;  %2011 = vmatprep.subr.bf16.mxu0 %v2871_v6  ;;  %v2950_v5 = vld [vmem:[%s3913_s1 + $0x7e0] ss:$8 sps:$4 sm:$0xff]   ;;  %v2955_v6 = vld [vmem:[%s3913_s1 + $0x6d4] ss:$8 sps:$4 sm:$0xff]  }
  0xbb   : > { %2054 = vmatprep.subr.bf16.mxu1 %v2874_v7  ;;  %v2958_v7 = vld [vmem:[%s3913_s1 + $0x7d4] ss:$8 sps:$4 sm:$0xff]  }
  0xbd   : > { %2012 = vmatpush2.bf16.msra.mxu0 %v2869_v8  ;;  %v2953_v8 = vld [vmem:[%s3913_s1 + $0x6d0] ss:$8 sps:$4 sm:$0xff]  }
  0xbe   : > { %2055 = vmatpush2.bf16.msra.mxu1 %v2872_v9  ;;  %2013 = vmatprep.subr.bf16.mxu0 %v2877_v10  ;;  %v2956_v9 = vld [vmem:[%s3913_s1 + $0x7d0] ss:$8 sps:$4 sm:$0xff]   ;;  %v2961_v10 = vld [vmem:[%s3913_s1 + $0x6c4] ss:$8 sps:$4 sm:$0xff]  }
  0xbf   : > { %2056 = vmatprep.subr.bf16.mxu1 %v2880_v11  ;;  %v2964_v11 = vld [vmem:[%s3913_s1 + $0x7c4] ss:$8 sps:$4 sm:$0xff]  }
  0xc1   : > { %2014 = vmatpush2.bf16.msra.mxu0 %v2875_v12  ;;  %v2959_v12 = vld [vmem:[%s3913_s1 + $0x6c0] ss:$8 sps:$4 sm:$0xff]  }
  0xc2   : > { %2057 = vmatpush2.bf16.msra.mxu1 %v2878_v13  ;;  %2015 = vmatprep.subr.bf16.mxu0 %v2883_v14  ;;  %v2962_v13 = vld [vmem:[%s3913_s1 + $0x7c0] ss:$8 sps:$4 sm:$0xff]   ;;  %v2967_v14 = vld [vmem:[%s3913_s1 + $0x6b4] ss:$8 sps:$4 sm:$0xff]  }
  0xc3   : > { %2058 = vmatprep.subr.bf16.mxu1 %v2886_v15  ;;  %v2970_v15 = vld [vmem:[%s3913_s1 + $0x7b4] ss:$8 sps:$4 sm:$0xff]  }
  0xc5   : > { %2016 = vmatpush2.bf16.msra.mxu0 %v2881_v16  ;;  %v2965_v16 = vld [vmem:[%s3913_s1 + $0x6b0] ss:$8 sps:$4 sm:$0xff]  }
  0xc6   : > { %2059 = vmatpush2.bf16.msra.mxu1 %v2884_v17  ;;  %2017 = vmatprep.subr.bf16.mxu0 %v2889_v18  ;;  %v2968_v17 = vld [vmem:[%s3913_s1 + $0x7b0] ss:$8 sps:$4 sm:$0xff]   ;;  %v2973_v18 = vld [vmem:[%s3913_s1 + $0x6a4] ss:$8 sps:$4 sm:$0xff]  }
  0xc7   : > { %2060 = vmatprep.subr.bf16.mxu1 %v2892_v19  ;;  %v2976_v19 = vld [vmem:[%s3913_s1 + $0x7a4] ss:$8 sps:$4 sm:$0xff]  }
  0xc9   : > { %2018 = vmatpush2.bf16.msra.mxu0 %v2887_v20  ;;  %v2971_v20 = vld [vmem:[%s3913_s1 + $0x6a0] ss:$8 sps:$4 sm:$0xff]  }
  0xca   : > { %2061 = vmatpush2.bf16.msra.mxu1 %v2890_v21  ;;  %2073 = vmatprep.subr.bf16.mxu0 %v2895_v22  ;;  %v2974_v21 = vld [vmem:[%s3913_s1 + $0x7a0] ss:$8 sps:$4 sm:$0xff]   ;;  %v2979_v22 = vld [vmem:[%s3913_s1 + $0x694] ss:$8 sps:$4 sm:$0xff]  }
  0xcb   : > { %2116 = vmatprep.subr.bf16.mxu1 %v2898_v23  ;;  %v2982_v23 = vld [vmem:[%s3913_s1 + $0x794] ss:$8 sps:$4 sm:$0xff]  }
  0xcc   : > { %2020 = vmatmul.mubr.bf16.vlgmr.msra.gmra.mxu0 %v2325_v29  ;;  %v2977_v29 = vld [vmem:[%s3913_s1 + $0x690] ss:$8 sps:$4 sm:$0xff]  }
  0xcd   : > { %2063 = vmatmul.mubr.bf16.vlgmr.msra.gmra.mxu1 %v2327_v30  ;;  %2074 = vmatpush1.bf16.msra.mxu0 %v2893_v34  ;;  %v2980_v30 = vld [vmem:[%s3913_s1 + $0x790] ss:$8 sps:$4 sm:$0xff]   ;;  %v2985_v34 = vld [vmem:[%s3913_s1 + $0x684] ss:$8 sps:$4 sm:$0xff]  }
  0xce   : > { %2117 = vmatpush1.bf16.msra.mxu1 %v2896_v35  ;;  %2075 = vmatprep.subr.bf16.mxu0 %v2901_v24  ;;  %v2988_v35 = vld [vmem:[%s3913_s1 + $0x784] ss:$8 sps:$4 sm:$0xff]   ;;  %v2983_v24 = vld [vmem:[%s3913_s1 + $0x680] ss:$8 sps:$4 sm:$0xff]  }
  0xcf   : > { %2118 = vmatprep.subr.bf16.mxu1 %v2904_v25  ;;  %2105 = vmatprep.mubr.bf16.mxu0 %v2330_v26  ;;  %v2986_v25 = vld [vmem:[%s3913_s1 + $0x780] ss:$8 sps:$4 sm:$0xff]   ;;  %v2329_v26 = vcombine.low %v3664_v28, %v3671_v31 }
  0xd0   : > { %2148 = vmatprep.mubr.bf16.mxu1 %v2332_v27  ;;  %v2331_v27 = vcombine.low %v3674_v32, %v3677_v33  ;;  %v427_v32 = vld [vmem:[%s3914_s2] sm:$0x3] }
  0xd1   : > { %2076 = vmatpush1.bf16.msra.mxu0 %v2899_v36 }
  0xd2   : > { %2119 = vmatpush1.bf16.msra.mxu1 %v2902_v37  ;;  %2077 = vmatprep.subr.bf16.mxu0 %v2907_v38 }
  0xd3   : > { %2120 = vmatprep.subr.bf16.mxu1 %v2910_v39 }
  0xd5   : > { %2078 = vmatpush1.bf16.msra.mxu0 %v2905_v40 }
  0xd6   : > { %2121 = vmatpush1.bf16.msra.mxu1 %v2908_v41  ;;  %2079 = vmatprep.subr.bf16.mxu0 %v2913_v42  ;;  %v445_v42 = vlaneseq }
  0xd7   : > { %2122 = vmatprep.subr.bf16.mxu1 %v2916_v43 }
  0xd9   : > { %2080 = vmatpush1.bf16.msra.mxu0 %v2911_v44 }
  0xda   : > { %2123 = vmatpush1.bf16.msra.mxu1 %v2914_v45  ;;  %2081 = vmatprep.subr.bf16.mxu0 %v2919_v46  ;;  %v446_v45 = vshrl.u32 %v445_v42, 7 }
  0xdb   : > { %2124 = vmatprep.subr.bf16.mxu1 %v2922_v47 }
  0xdc   : > { %v447_v28 = vsub.s32 0, %v446_v45  ;;  %v451_v33 = vsub.s32 1, %v446_v45 }
  0xdd   : > { %2082 = vmatpush1.bf16.msra.mxu0 %v2917_v48 }
  0xde   : > { %2125 = vmatpush1.bf16.msra.mxu1 %v2920_v49  ;;  %2083 = vmatprep.subr.bf16.mxu0 %v2925_v50  ;;  %v448_v49 = vrot.slane %v427_v32, %v447_v28 }
  0xdf   : > { %2126 = vmatprep.subr.bf16.mxu1 %v2928_v51 }
  0xe1   : > { %2084 = vmatpush1.bf16.msra.mxu0 %v2923_v52  ;;  %v452_v52 = vrot.slane %v427_v32, %v451_v33 }
  0xe2   : > { %2127 = vmatpush1.bf16.msra.mxu1 %v2926_v53  ;;  %2085 = vmatprep.subr.bf16.mxu0 %v2931_v54 }
  0xe3   : > { %2128 = vmatprep.subr.bf16.mxu1 %v2934_v55 }
  0xe5   : > { %2086 = vmatpush1.bf16.msra.mxu0 %v2929_v56 }
  0xe6   : > { %2129 = vmatpush1.bf16.msra.mxu1 %v2932_v57  ;;  %2087 = vmatprep.subr.bf16.mxu0 %v2937_v58 }
  0xe7   : > { %2130 = vmatprep.subr.bf16.mxu1 %v2940_v59 }
  0xe9   : > { %2088 = vmatpush1.bf16.msra.mxu0 %v2935_v60 }
  0xea   : > { %2131 = vmatpush1.bf16.msra.mxu1 %v2938_v61  ;;  %2089 = vmatprep.subr.bf16.mxu0 %v2943_v62 }
  0xeb   : > { %2132 = vmatprep.subr.bf16.mxu1 %v2946_v63 }
  0xed   : > { %2090 = vmatpush2.bf16.msra.mxu0 %v2941_v0 }
  0xee   : > { %2133 = vmatpush2.bf16.msra.mxu1 %v2944_v1  ;;  %2091 = vmatprep.subr.bf16.mxu0 %v2949_v2 }
  0xef   : > { %2134 = vmatprep.subr.bf16.mxu1 %v2952_v3 }
  0xf1   : > { %2092 = vmatpush2.bf16.msra.mxu0 %v2947_v4 }
  0xf2   : > { %2135 = vmatpush2.bf16.msra.mxu1 %v2950_v5  ;;  %2093 = vmatprep.subr.bf16.mxu0 %v2955_v6 }
  0xf3   : > { %2136 = vmatprep.subr.bf16.mxu1 %v2958_v7 }
  0xf5   : > { %2094 = vmatpush2.bf16.msra.mxu0 %v2953_v8 }
  0xf6   : > { %2137 = vmatpush2.bf16.msra.mxu1 %v2956_v9  ;;  %2095 = vmatprep.subr.bf16.mxu0 %v2961_v10 }
  0xf7   : > { %2138 = vmatprep.subr.bf16.mxu1 %v2964_v11 }
  0xf9   : > { %2096 = vmatpush2.bf16.msra.mxu0 %v2959_v12 }
  0xfa   : > { %2139 = vmatpush2.bf16.msra.mxu1 %v2962_v13  ;;  %2097 = vmatprep.subr.bf16.mxu0 %v2967_v14 }
  0xfb   : > { %2140 = vmatprep.subr.bf16.mxu1 %v2970_v15 }
  0xfd   : > { %2098 = vmatpush2.bf16.msra.mxu0 %v2965_v16 }
  0xfe   : > { %2141 = vmatpush2.bf16.msra.mxu1 %v2968_v17  ;;  %2099 = vmatprep.subr.bf16.mxu0 %v2973_v18 }
  0xff   : > { %2142 = vmatprep.subr.bf16.mxu1 %v2976_v19 }
 0x101   : > { %2100 = vmatpush2.bf16.msra.mxu0 %v2971_v20 }
 0x102   : > { %2143 = vmatpush2.bf16.msra.mxu1 %v2974_v21  ;;  %2101 = vmatprep.subr.bf16.mxu0 %v2979_v22 }
 0x103   : > { %2144 = vmatprep.subr.bf16.mxu1 %v2982_v23 }
 0x105   : > { %2102 = vmatpush2.bf16.msra.mxu0 %v2977_v29 }
 0x106   : > { %2145 = vmatpush2.bf16.msra.mxu1 %v2980_v30  ;;  %2103 = vmatprep.subr.bf16.mxu0 %v2985_v34 }
 0x107   : > { %2146 = vmatprep.subr.bf16.mxu1 %v2988_v35 }
 0x109   : > { %2104 = vmatpush2.bf16.msra.mxu0 %v2983_v24 }
 0x10a   : > { %2147 = vmatpush2.bf16.msra.mxu1 %v2986_v25 }
 0x10c   : > { %2106 = vmatmul.mubr.bf16.vlgmr.msra.gmra.mxu0 %v2329_v26  ;;  %v1849_v36 = vpop.f32.mrf.mxu0 }
 0x10d   : > { %2149 = vmatmul.mubr.bf16.vlgmr.msra.gmra.mxu1 %v2331_v27  ;;  %v1892_v37 = vpop.f32.mrf.mxu1  ;;  %v1850_v53 = vadd.f32 %v1849_v36, %v448_v49 }
 0x10e   : > { %v1851_v38 = vpop.f32.mrf.mxu0 }
 0x10f   : > { %v1894_v39 = vpop.f32.mrf.mxu1  ;;  %v1852_v56 = vadd.f32 %v1851_v38, %v452_v52  ;;  %v1893_v60 = vadd.f32 %v1892_v37, %v1850_v53 }
 0x110   : > { %v1853_v40 = vpop.f32.mrf.mxu0 }
 0x111   : > { %v1896_v41 = vpop.f32.mrf.mxu1  ;;  %v1854_v59 = vadd.f32 %v1853_v40, %v448_v49  ;;  %v1895_v62 = vadd.f32 %v1894_v39, %v1852_v56 }
 0x112   : > { %v1855_v43 = vpop.f32.mrf.mxu0 }
 0x113   : > { %v1898_v44 = vpop.f32.mrf.mxu1  ;;  %v1856_v61 = vadd.f32 %v1855_v43, %v452_v52  ;;  %v1897_v2 = vadd.f32 %v1896_v41, %v1854_v59 }
 0x115   : > { %v1899_v4 = vadd.f32 %v1898_v44, %v1856_v61 }
 0x14c   : > { %v1935_v46 = vpop.f32.mrf.mxu0 }
 0x14d   : > { %v1978_v47 = vpop.f32.mrf.mxu1  ;;  %v1936_v63 = vadd.f32 %v1935_v46, %v1893_v60 }
 0x14e   : > { %v1937_v31 = vpop.f32.mrf.mxu0 }
 0x14f   : > { %v1980_v48 = vpop.f32.mrf.mxu1  ;;  %v1938_v3 = vadd.f32 %v1937_v31, %v1895_v62  ;;  %v1979_v6 = vadd.f32 %v1978_v47, %v1936_v63 }
 0x150   : > { %v1939_v50 = vpop.f32.mrf.mxu0 }
 0x151   : > { %v1982_v51 = vpop.f32.mrf.mxu1  ;;  %v1940_v5 = vadd.f32 %v1939_v50, %v1897_v2  ;;  %v1981_v10 = vadd.f32 %v1980_v48, %v1938_v3 }
 0x152   : > { %v1941_v54 = vpop.f32.mrf.mxu0 }
 0x153   : > { %v1984_v55 = vpop.f32.mrf.mxu1  ;;  %v1942_v9 = vadd.f32 %v1941_v54, %v1899_v4  ;;  %v1983_v12 = vadd.f32 %v1982_v51, %v1940_v5 }
 0x155   : > { %v1985_v16 = vadd.f32 %v1984_v55, %v1942_v9 }
 0x18c   : > { %v2021_v57 = vpop.f32.mrf.mxu0 }
 0x18d   : > { %v2064_v58 = vpop.f32.mrf.mxu1  ;;  %v2022_v11 = vadd.f32 %v2021_v57, %v1979_v6 }
 0x18e   : > { %v2023_v0 = vpop.f32.mrf.mxu0 }
 0x18f   : > { %v2066_v1 = vpop.f32.mrf.mxu1  ;;  %v2024_v13 = vadd.f32 %v2023_v0, %v1981_v10  ;;  %v2065_v18 = vadd.f32 %v2064_v58, %v2022_v11 }
 0x190   : > { %v2025_v7 = vpop.f32.mrf.mxu0 }
 0x191   : > { %v2068_v8 = vpop.f32.mrf.mxu1  ;;  %v2026_v17 = vadd.f32 %v2025_v7, %v1983_v12  ;;  %v2067_v22 = vadd.f32 %v2066_v1, %v2024_v13 }
 0x192   : > { %v2027_v14 = vpop.f32.mrf.mxu0 }
 0x193   : > { %v2070_v15 = vpop.f32.mrf.mxu1  ;;  %v2028_v21 = vadd.f32 %v2027_v14, %v1985_v16  ;;  %v2069_v34 = vadd.f32 %v2068_v8, %v2026_v17 }
 0x195   : > { %v2071_v26 = vadd.f32 %v2070_v15, %v2028_v21 }
 0x1cc   : > { %v2107_v19 = vpop.f32.mrf.mxu0 }
 0x1cd   : > { %v2150_v20 = vpop.f32.mrf.mxu1  ;;  %v2108_v23 = vadd.f32 %v2107_v19, %v2065_v18 }
 0x1ce   : > { %v2109_v29 = vpop.f32.mrf.mxu0 }
 0x1cf   : > { %v2152_v30 = vpop.f32.mrf.mxu1  ;;  %v2110_v35 = vadd.f32 %v2109_v29, %v2067_v22  ;;  %v2151_v36 = vadd.f32 %v2150_v20, %v2108_v23 }
 0x1d0   : > { %v2111_v24 = vpop.f32.mrf.mxu0 }
 0x1d1   : > { %v2154_v25 = vpop.f32.mrf.mxu1  ;;  %v2112_v27 = vadd.f32 %v2111_v24, %v2069_v34  ;;  %v3876_v40 = vadd.f32 %v2152_v30, %v2110_v35  ;;  %v2178_v45 = vmul.f32 %v2151_v36, %v2151_v36 }
 0x1d2   : > { %v2113_v37 = vpop.f32.mrf.mxu0 }
 0x1d3   : > { %v2155_v38 = vadd.f32 %v2154_v25, %v2112_v27  ;;  %v2114_v39 = vadd.f32 %v2113_v37, %v2071_v26  ;;  %v2156_v41 = vpop.f32.mrf.mxu1  ;;  %v2179_v48 = vmul.f32 %v3876_v40, %v3876_v40 }
 0x1d5   : > { %v2160_v42 = vsel %vm2159_vm0, %v2155_v38, 0.0  ;;  %v2180_v43 = vmul.f32 %v2155_v38, %v2155_v38  ;;  %v3879_v44 = vadd.f32 %v2156_v41, %v2114_v39 }
 0x1d6   : > { %v2161_v46 = vadd.f32 %v2160_v42, %v2151_v36 }
 0x1d7   : > { %v2182_v47 = vsel %vm2159_vm0, %v2180_v43, 0.0  ;;  %v2168_v28 = vsel %vm2159_vm0, %v3879_v44, 0.0  ;;  %v2181_v31 = vmul.f32 %v3879_v44, %v3879_v44 }
 0x1d8   : > { %v2162_v32 = vrot.slane %v2161_v46, 4  ;;  %v2183_v33 = vadd.f32 %v2182_v47, %v2178_v45  ;;  %v2169_v49 = vadd.f32 %v2168_v28, %v3876_v40  ;;  %v2250_v47 = vld [vmem:[%s170_s21 + $0x8] sm:$0x11] }
 0x1d9   : > { %v2190_v50 = vsel %vm2159_vm0, %v2181_v31, 0.0 }
 0x1da   : > { %v2163_v51 = vadd.f32 %v2162_v32, %v2161_v46  ;;  %v2184_v52 = vrot.slane %v2183_v33, 4  ;;  %v2170_v53 = vrot.slane %v2169_v49, 4  ;;  %v2191_v54 = vadd.f32 %v2190_v50, %v2179_v48 }
 0x1dc   : > { %v2164_v55 = vrot.slane %v2163_v51, 2  ;;  %v2185_v56 = vadd.f32 %v2184_v52, %v2183_v33  ;;  %v2171_v57 = vadd.f32 %v2170_v53, %v2169_v49  ;;  %v2192_v58 = vrot.slane %v2191_v54, 4 }
 0x1de   : > { %v2165_v59 = vadd.f32 %v2164_v55, %v2163_v51  ;;  %v2186_v60 = vrot.slane %v2185_v56, 2  ;;  %v2172_v61 = vrot.slane %v2171_v57, 2  ;;  %v2193_v62 = vadd.f32 %v2192_v58, %v2191_v54 }
 0x1e0   : > { %v2166_v63 = vrot.slane %v2165_v59, 1  ;;  %v2187_v0 = vadd.f32 %v2186_v60, %v2185_v56  ;;  %v2173_v1 = vadd.f32 %v2172_v61, %v2171_v57  ;;  %v2194_v2 = vrot.slane %v2193_v62, 2 }
 0x1e2   : > { %v2167_v3 = vadd.f32 %v2166_v63, %v2165_v59  ;;  %v2188_v4 = vrot.slane %v2187_v0, 1  ;;  %v2174_v5 = vrot.slane %v2173_v1, 1  ;;  %v2195_v6 = vadd.f32 %v2194_v2, %v2193_v62 }
 0x1e4   : > { %v2176_v7 = vmul.f32 0.11111111, %v2167_v3  ;;  %v2189_v8 = vadd.f32 %v2188_v4, %v2187_v0  ;;  %v2175_v9 = vadd.f32 %v2174_v5, %v2173_v1  ;;  %v2196_v10 = vrot.slane %v2195_v6, 1 }
 0x1e6   : > { %v2198_v11 = vmul.f32 0.11111111, %v2189_v8  ;;  %v2200_v12 = vmul.f32 %v2176_v7, %v2176_v7  ;;  %v2177_v13 = vmul.f32 0.11111111, %v2175_v9  ;;  %v2197_v14 = vadd.f32 %v2196_v10, %v2195_v6 }
 0x1e7   : > { %v2206_v23 = vsub.f32 %v2151_v36, %v2176_v7  ;;  %v2208_v29 = vsub.f32 %v2155_v38, %v2176_v7 }
 0x1e8   : > { %v2202_v15 = vsub.f32 %v2198_v11, %v2200_v12  ;;  %v2199_v16 = vmul.f32 0.11111111, %v2197_v14  ;;  %v2201_v17 = vmul.f32 %v2177_v13, %v2177_v13  ;;  %v2207_v24 = vsub.f32 %v3876_v40, %v2177_v13 }
 0x1e9   : > { %v2209_v25 = vsub.f32 %v3879_v44, %v2177_v13 }
 0x1ea   : > { %v2204_v18 = vmax.f32 %v2202_v15, 0.0  ;;  %v2203_v19 = vsub.f32 %v2199_v16, %v2201_v17 }
 0x1ec   : > { %v2210_v20 = vadd.f32 1e-05, %v2204_v18  ;;  %v2205_v21 = vmax.f32 %v2203_v19, 0.0 }
 0x1ee   : > { %2989 = vrsqrt.f32 %v2210_v20  ;;  %v2211_v22 = vadd.f32 1e-05, %v2205_v21 }
 0x1f0   : > { %2991 = vrsqrt.f32 %v2211_v22 }
 0x1fb   : > { %v2990_v30 = vpop.eup %2989 }
 0x1fc   : > { %v2214_v34 = vmul.f32 %v2990_v30, %v2206_v23  ;;  %v2216_v35 = vmul.f32 %v2990_v30, %v2208_v29 }
 0x1fd   : > { %v2992_v26 = vpop.eup %2991 }
 0x1fe   : > { %v2222_v27 = vmul.f32 0.2, %v2214_v34  ;;  %v2224_v37 = vmul.f32 0.2, %v2216_v35  ;;  %v2215_v36 = vmul.f32 %v2992_v26, %v2207_v24  ;;  %v2217_v38 = vmul.f32 %v2992_v26, %v2209_v25 }
 0x1ff   : > { %vm2218_vm5 = vcmp.ge.f32.partialorder %v2214_v34, 0.0  ;;  %vm2220_vm6 = vcmp.ge.f32.partialorder %v2216_v35, 0.0 }
 0x200   : > { %vm2219_vm8 = vcmp.ge.f32.partialorder %v2215_v36, 0.0  ;;  %vm2221_vm9 = vcmp.ge.f32.partialorder %v2217_v38, 0.0  ;;  %v2223_v40 = vmul.f32 0.2, %v2215_v36  ;;  %v2225_v42 = vmul.f32 0.2, %v2217_v38 }
 0x201   : > { %v2226_v43 = vsel %vm2218_vm5, %v2214_v34, %v2222_v27  ;;  %v2228_v44 = vsel %vm2220_vm6, %v2216_v35, %v2224_v37 }
 0x202   : > { %v2227_v45 = vsel %vm2219_vm8, %v2215_v36, %v2223_v40  ;;  %v2229_v46 = vsel %vm2221_vm9, %v2217_v38, %v2225_v42 }
 0x203   : > { %v2595_v28 = vpack.c.bf16 %v2227_v45, %v2226_v43  ;;  %v2596_v31 = vpack.c.bf16 %v2229_v46, %v2228_v44 }
 0x205   : > { %2242 = vst [vmem:[%s170_s21] sm:$0xff] %v2595_v28  ;;  %v2251_v48 = vsel %vm2249_vm10, %v2596_v31, %v2250_v47 }
 0x206   : > { %2252 = vst [vmem:[%s170_s21 + $0x8] sm:$0x11] %v2251_v48 }
 0x207 PF: > { %s13_s12 = sadd.s32 1, %s2999_s12  }
 0x208   : > { %p10_p4 = scmp.ge.s32.totalorder %s13_s12, 4  }
 0x20a   :  { %12 = sbr.rel (!%p10_p4) target bundleno = 1 (0x1), region = 62 }

// kernel: discriminator_forward.9
= control target key start
LH: loop header
LB: loop body
LE: loop exit
PB: predicated region body
PF: predicated region fallthrough
CT: control target
= control target key end

     0   :  { %s4617_s1 = inlined_call_operand.vmem [shape: bf16[4096,128], index: 1, kind: input, shape index: {}]   ;;  %s4618_s0 = inlined_call_operand.vmem [shape: bf16[8,4096], index: 0, kind: input, shape index: {}]   ;;  %s4619_s2 = inlined_call_operand.vmem [shape: f32[1,128], index: 2, kind: input, shape index: {}]   ;;  %s4620_s3 = inlined_call_operand.vmem [shape: f32[8,128], index: 3, kind: output, shape index: {}]  }
   0x1   :  { %v3484_v0 = vld [vmem:[%s4617_s1 + $0x78] sm:$0xff]   ;;  %v3488_v4 = vld [vmem:[%s4617_s1 + $0x70] sm:$0xff]   ;;  %v3492_v8 = vld [vmem:[%s4617_s1 + $0x68] sm:$0xff]  }
   0x2   :  { %v3485_v1 = vld [vmem:[%s4617_s1 + $0xf8] sm:$0xff]   ;;  %3132 = vmatprep.subr.bf16.mxu0 %v3484_v0  ;;  %v3489_v5 = vld [vmem:[%s4617_s1 + $0xf0] sm:$0xff]   ;;  %v3493_v9 = vld [vmem:[%s4617_s1 + $0xe8] sm:$0xff]  }
   0x3   :  { %v3486_v2 = vld [vmem:[%s4617_s1 + $0x38] sm:$0xff]   ;;  %3154 = vmatprep.subr.bf16.mxu1 %v3485_v1  ;;  %v3490_v6 = vld [vmem:[%s4617_s1 + $0x30] sm:$0xff]   ;;  %v3494_v10 = vld [vmem:[%s4617_s1 + $0x28] sm:$0xff]  }
   0x4   :  { %v3487_v3 = vld [vmem:[%s4617_s1 + $0xb8] sm:$0xff]   ;;  %3133 = vmatpush3.bf16.msra.mxu0 %v3486_v2  ;;  %v3491_v7 = vld [vmem:[%s4617_s1 + $0xb0] sm:$0xff]   ;;  %v3495_v11 = vld [vmem:[%s4617_s1 + $0xa8] sm:$0xff]  }
   0x5   :  { %3155 = vmatpush3.bf16.msra.mxu1 %v3487_v3  ;;  %3134 = vmatprep.subr.bf16.mxu0 %v3488_v4  ;;  %v3496_v12 = vld [vmem:[%s4617_s1 + $0x60] sm:$0xff]   ;;  %v3500_v16 = vld [vmem:[%s4617_s1 + $0x58] sm:$0xff]   ;;  %v3504_v20 = vld [vmem:[%s4617_s1 + $0x50] sm:$0xff]  }
   0x6   :  { %3156 = vmatprep.subr.bf16.mxu1 %v3489_v5  ;;  %v3497_v13 = vld [vmem:[%s4617_s1 + $0xe0] sm:$0xff]   ;;  %v3501_v17 = vld [vmem:[%s4617_s1 + $0xd8] sm:$0xff]   ;;  %v3505_v21 = vld [vmem:[%s4617_s1 + $0xd0] sm:$0xff]  }
   0x7   :  { %v3498_v14 = vld [vmem:[%s4617_s1 + $0x20] sm:$0xff]   ;;  %v3502_v18 = vld [vmem:[%s4617_s1 + $0x18] sm:$0xff]   ;;  %v3506_v22 = vld [vmem:[%s4617_s1 + $0x10] sm:$0xff]  }
   0x8   :  { %3135 = vmatpush3.bf16.msra.mxu0 %v3490_v6  ;;  %v3499_v15 = vld [vmem:[%s4617_s1 + $0xa0] sm:$0xff]   ;;  %v3503_v19 = vld [vmem:[%s4617_s1 + $0x98] sm:$0xff]   ;;  %v3507_v23 = vld [vmem:[%s4617_s1 + $0x90] sm:$0xff]  }
   0x9   :  { %3157 = vmatpush3.bf16.msra.mxu1 %v3491_v7  ;;  %3136 = vmatprep.subr.bf16.mxu0 %v3492_v8  ;;  %v3508_v24 = vld [vmem:[%s4617_s1 + $0x48] sm:$0xff]   ;;  %v3512_v28 = vld [vmem:[%s4617_s1 + $0x40] sm:$0xff]   ;;  %v3520_v38 = vld [vmem:[%s4617_s1 + $0x178] sm:$0xff]  }
   0xa   :  { %3158 = vmatprep.subr.bf16.mxu1 %v3493_v9  ;;  %v3509_v25 = vld [vmem:[%s4617_s1 + $0xc8] sm:$0xff]   ;;  %v3513_v29 = vld [vmem:[%s4617_s1 + $0xc0] sm:$0xff]   ;;  %v3521_v39 = vld [vmem:[%s4617_s1 + $0x1f8] sm:$0xff]  }
   0xb   :  { %v3510_v26 = vld [vmem:[%s4617_s1 + $0x8] sm:$0xff]   ;;  %v3514_v30 = vld [vmem:[%s4617_s1] sm:$0xff]   ;;  %v3522_v40 = vld [vmem:[%s4617_s1 + $0x138] sm:$0xff]  }
   0xc   :  { %3137 = vmatpush3.bf16.msra.mxu0 %v3494_v10  ;;  %v3511_v27 = vld [vmem:[%s4617_s1 + $0x88] sm:$0xff]   ;;  %v3515_v31 = vld [vmem:[%s4617_s1 + $0x80] sm:$0xff]   ;;  %v3523_v41 = vld [vmem:[%s4617_s1 + $0x1b8] sm:$0xff]  }
   0xd   :  { %3159 = vmatpush3.bf16.msra.mxu1 %v3495_v11  ;;  %3138 = vmatprep.subr.bf16.mxu0 %v3496_v12  ;;  %v15_v32 = vld [vmem:[%s4618_s0] sm:$0xff]  ;;  %v16_v33 = vld [vmem:[%s4618_s0 + $0x8] sm:$0xff]  ;;  %v3524_v42 = vld [vmem:[%s4617_s1 + $0x170] sm:$0xff]  }
   0xe   :  { %3160 = vmatprep.subr.bf16.mxu1 %v3497_v13  ;;  %v2844_v34 = vcombine.low %v15_v32, %v15_v32  ;;  %v2845_v35 = vcombine.high %v15_v32, %v15_v32  ;;  %v2846_v36 = vcombine.low %v16_v33, %v16_v33  ;;  %v2847_v37 = vcombine.high %v16_v33, %v16_v33  ;;  %v3525_v43 = vld [vmem:[%s4617_s1 + $0x1f0] sm:$0xff]   ;;  %v3528_v46 = vld [vmem:[%s4617_s1 + $0x168] sm:$0xff]   ;;  %v3532_v50 = vld [vmem:[%s4617_s1 + $0x160] sm:$0xff]  }
   0xf   :  { %v3526_v44 = vld [vmem:[%s4617_s1 + $0x130] sm:$0xff]   ;;  %v3529_v47 = vld [vmem:[%s4617_s1 + $0x1e8] sm:$0xff]   ;;  %v3533_v51 = vld [vmem:[%s4617_s1 + $0x1e0] sm:$0xff]  }
  0x10   :  { %3139 = vmatpush3.bf16.msra.mxu0 %v3498_v14  ;;  %2230 = vmatprep.mubr.bf16.mxu0 %v2845_v35  ;;  %v3527_v45 = vld [vmem:[%s4617_s1 + $0x1b0] sm:$0xff]   ;;  %v3530_v48 = vld [vmem:[%s4617_s1 + $0x128] sm:$0xff]   ;;  %v3534_v52 = vld [vmem:[%s4617_s1 + $0x120] sm:$0xff]  }
  0x11   :  { %3161 = vmatpush3.bf16.msra.mxu1 %v3499_v15  ;;  %3140 = vmatprep.subr.bf16.mxu0 %v3500_v16  ;;  %v3531_v49 = vld [vmem:[%s4617_s1 + $0x1a8] sm:$0xff]   ;;  %v3535_v53 = vld [vmem:[%s4617_s1 + $0x1a0] sm:$0xff]   ;;  %v3536_v54 = vld [vmem:[%s4617_s1 + $0x158] sm:$0xff]  }
  0x12   :  { %3162 = vmatprep.subr.bf16.mxu1 %v3501_v17  ;;  %2270 = vmatprep.mubr.bf16.mxu1 %v2847_v37  ;;  %v3537_v55 = vld [vmem:[%s4617_s1 + $0x1d8] sm:$0xff]   ;;  %v3540_v58 = vld [vmem:[%s4617_s1 + $0x150] sm:$0xff]   ;;  %v3544_v62 = vld [vmem:[%s4617_s1 + $0x148] sm:$0xff]  }
  0x13   :  { %v3538_v56 = vld [vmem:[%s4617_s1 + $0x118] sm:$0xff]   ;;  %v3541_v59 = vld [vmem:[%s4617_s1 + $0x1d0] sm:$0xff]   ;;  %v3545_v63 = vld [vmem:[%s4617_s1 + $0x1c8] sm:$0xff]  }
  0x14   :  { %3141 = vmatpush3.bf16.msra.mxu0 %v3502_v18  ;;  %v3539_v57 = vld [vmem:[%s4617_s1 + $0x198] sm:$0xff]   ;;  %v3542_v60 = vld [vmem:[%s4617_s1 + $0x110] sm:$0xff]   ;;  %v3546_v0 = vld [vmem:[%s4617_s1 + $0x108] sm:$0xff]  }
  0x15   :  { %3163 = vmatpush3.bf16.msra.mxu1 %v3503_v19  ;;  %3142 = vmatprep.subr.bf16.mxu0 %v3504_v20  ;;  %v3543_v61 = vld [vmem:[%s4617_s1 + $0x190] sm:$0xff]   ;;  %v3547_v1 = vld [vmem:[%s4617_s1 + $0x188] sm:$0xff]   ;;  %v3548_v2 = vld [vmem:[%s4617_s1 + $0x140] sm:$0xff]  }
  0x16   :  { %3164 = vmatprep.subr.bf16.mxu1 %v3505_v21  ;;  %v3549_v3 = vld [vmem:[%s4617_s1 + $0x1c0] sm:$0xff]   ;;  %v17_v6 = vld [vmem:[%s4618_s0 + $0x10] sm:$0xff]  ;;  %v18_v9 = vld [vmem:[%s4618_s0 + $0x18] sm:$0xff] }
  0x17   :  { %v3550_v4 = vld [vmem:[%s4617_s1 + $0x100] sm:$0xff]   ;;  %v2848_v7 = vcombine.low %v17_v6, %v17_v6  ;;  %v2849_v8 = vcombine.high %v17_v6, %v17_v6  ;;  %v2850_v10 = vcombine.low %v18_v9, %v18_v9  ;;  %v2851_v11 = vcombine.high %v18_v9, %v18_v9  ;;  %v3556_v12 = vld [vmem:[%s4617_s1 + $0x278] sm:$0xff]   ;;  %v3560_v16 = vld [vmem:[%s4617_s1 + $0x270] sm:$0xff]  }
  0x18   :  { %3143 = vmatpush3.bf16.msra.mxu0 %v3506_v22  ;;  %v3551_v5 = vld [vmem:[%s4617_s1 + $0x180] sm:$0xff]   ;;  %v3557_v13 = vld [vmem:[%s4617_s1 + $0x2f8] sm:$0xff]   ;;  %v3561_v17 = vld [vmem:[%s4617_s1 + $0x2f0] sm:$0xff]  }
  0x19   :  { %3165 = vmatpush3.bf16.msra.mxu1 %v3507_v23  ;;  %3144 = vmatprep.subr.bf16.mxu0 %v3508_v24  ;;  %v3558_v14 = vld [vmem:[%s4617_s1 + $0x238] sm:$0xff]   ;;  %v3562_v18 = vld [vmem:[%s4617_s1 + $0x230] sm:$0xff]   ;;  %v3564_v20 = vld [vmem:[%s4617_s1 + $0x268] sm:$0xff]  }
  0x1a   :  { %3166 = vmatprep.subr.bf16.mxu1 %v3509_v25  ;;  %v3559_v15 = vld [vmem:[%s4617_s1 + $0x2b8] sm:$0xff]   ;;  %v3563_v19 = vld [vmem:[%s4617_s1 + $0x2b0] sm:$0xff]   ;;  %v3565_v21 = vld [vmem:[%s4617_s1 + $0x2e8] sm:$0xff]  }
  0x1b   :  { %v3566_v22 = vld [vmem:[%s4617_s1 + $0x228] sm:$0xff]   ;;  %v3568_v24 = vld [vmem:[%s4617_s1 + $0x260] sm:$0xff]   ;;  %v3576_v32 = vld [vmem:[%s4617_s1 + $0x250] sm:$0xff]  }
  0x1c   :  { %3145 = vmatpush3.bf16.msra.mxu0 %v3510_v26  ;;  %v3567_v23 = vld [vmem:[%s4617_s1 + $0x2a8] sm:$0xff]   ;;  %v3569_v25 = vld [vmem:[%s4617_s1 + $0x2e0] sm:$0xff]   ;;  %v3577_v33 = vld [vmem:[%s4617_s1 + $0x2d0] sm:$0xff]  }
  0x1d   :  { %3167 = vmatpush3.bf16.msra.mxu1 %v3511_v27  ;;  %3146 = vmatprep.subr.bf16.mxu0 %v3512_v28  ;;  %v3570_v26 = vld [vmem:[%s4617_s1 + $0x220] sm:$0xff]   ;;  %v3572_v28 = vld [vmem:[%s4617_s1 + $0x258] sm:$0xff]   ;;  %v3579_v35 = vld [vmem:[%s4617_s1 + $0x290] sm:$0xff]  }
  0x1e   :  { %3168 = vmatprep.subr.bf16.mxu1 %v3513_v29  ;;  %v3571_v27 = vld [vmem:[%s4617_s1 + $0x2a0] sm:$0xff]   ;;  %v3573_v29 = vld [vmem:[%s4617_s1 + $0x2d8] sm:$0xff]   ;;  %v3581_v37 = vld [vmem:[%s4617_s1 + $0x2c8] sm:$0xff]  }
  0x1f   :  { %v3612_v6 = vld [vmem:[%s4617_s1 + $0x350] sm:$0xff]  }
  0x20   :  { %3147 = vmatpush3.bf16.msra.mxu0 %v3514_v30  ;;  %v3574_v30 = vld [vmem:[%s4617_s1 + $0x218] sm:$0xff]   ;;  %v3615_v9 = vld [vmem:[%s4617_s1 + $0x390] sm:$0xff]  }
  0x21   :  { %3169 = vmatpush3.bf16.msra.mxu1 %v3515_v31  ;;  %3176 = vmatprep.subr.bf16.mxu0 %v3520_v38  ;;  %v3575_v31 = vld [vmem:[%s4617_s1 + $0x298] sm:$0xff]   ;;  %v3582_v38 = vld [vmem:[%s4617_s1 + $0x208] sm:$0xff]  }
  0x22   :  { %3198 = vmatprep.subr.bf16.mxu1 %v3521_v39  ;;  %v3583_v39 = vld [vmem:[%s4617_s1 + $0x288] sm:$0xff]  }
  0x23   :  { %2231 = vmatmul.mubr.bf16.vlgmr.msra.gmra.mxu0 %v2844_v34  ;;  %v3578_v34 = vld [vmem:[%s4617_s1 + $0x210] sm:$0xff]  }
  0x24   :  { %2271 = vmatmul.mubr.bf16.vlgmr.msra.gmra.mxu1 %v2846_v36  ;;  %3177 = vmatpush3.bf16.msra.mxu0 %v3522_v40  ;;  %v3580_v36 = vld [vmem:[%s4617_s1 + $0x248] sm:$0xff]   ;;  %v3584_v40 = vld [vmem:[%s4617_s1 + $0x240] sm:$0xff]  }
  0x25   :  { %3199 = vmatpush3.bf16.msra.mxu1 %v3523_v41  ;;  %3178 = vmatprep.subr.bf16.mxu0 %v3524_v42  ;;  %v3585_v41 = vld [vmem:[%s4617_s1 + $0x2c0] sm:$0xff]  }
  0x26   :  { %3200 = vmatprep.subr.bf16.mxu1 %v3525_v43  ;;  %2310 = vmatprep.mubr.bf16.mxu0 %v2849_v8  ;;  %v3586_v42 = vld [vmem:[%s4617_s1 + $0x200] sm:$0xff]   ;;  %v3614_v8 = vld [vmem:[%s4617_s1 + $0x310] sm:$0xff]  }
  0x27   :  { %2350 = vmatprep.mubr.bf16.mxu1 %v2851_v11  ;;  %v3587_v43 = vld [vmem:[%s4617_s1 + $0x280] sm:$0xff]   ;;  %v3617_v11 = vld [vmem:[%s4617_s1 + $0x3c8] sm:$0xff]  }
  0x28   :  { %3179 = vmatpush3.bf16.msra.mxu0 %v3526_v44  ;;  %v19_v44 = vld [vmem:[%s4618_s0 + $0x20] sm:$0xff] }
  0x29   :  { %3201 = vmatpush3.bf16.msra.mxu1 %v3527_v45  ;;  %3180 = vmatprep.subr.bf16.mxu0 %v3528_v46  ;;  %v20_v45 = vld [vmem:[%s4618_s0 + $0x28] sm:$0xff]  ;;  %v2852_v46 = vcombine.low %v19_v44, %v19_v44 }
  0x2a   :  { %3202 = vmatprep.subr.bf16.mxu1 %v3529_v47  ;;  %v2853_v47 = vcombine.high %v19_v44, %v19_v44  ;;  %v3648_v44 = vld [vmem:[%s4617_s1 + $0x450] sm:$0xff]  }
  0x2c   :  { %3181 = vmatpush3.bf16.msra.mxu0 %v3530_v48  ;;  %v2854_v48 = vcombine.low %v20_v45, %v20_v45 }
  0x2d   :  { %3203 = vmatpush3.bf16.msra.mxu1 %v3531_v49  ;;  %3182 = vmatprep.subr.bf16.mxu0 %v3532_v50  ;;  %v2855_v49 = vcombine.high %v20_v45, %v20_v45  ;;  %v3592_v50 = vld [vmem:[%s4617_s1 + $0x378] sm:$0xff]   ;;  %v3649_v45 = vld [vmem:[%s4617_s1 + $0x4d0] sm:$0xff]  }
  0x2e   :  { %3204 = vmatprep.subr.bf16.mxu1 %v3533_v51  ;;  %v3593_v51 = vld [vmem:[%s4617_s1 + $0x3f8] sm:$0xff]  }
  0x30   :  { %3183 = vmatpush3.bf16.msra.mxu0 %v3534_v52  ;;  %v3594_v52 = vld [vmem:[%s4617_s1 + $0x338] sm:$0xff]  }
  0x31   :  { %3205 = vmatpush3.bf16.msra.mxu1 %v3535_v53  ;;  %3184 = vmatprep.subr.bf16.mxu0 %v3536_v54  ;;  %v3595_v53 = vld [vmem:[%s4617_s1 + $0x3b8] sm:$0xff]   ;;  %v3596_v54 = vld [vmem:[%s4617_s1 + $0x370] sm:$0xff]  }
  0x32   :  { %3206 = vmatprep.subr.bf16.mxu1 %v3537_v55  ;;  %v3597_v55 = vld [vmem:[%s4617_s1 + $0x3f0] sm:$0xff]  }
  0x34   :  { %3185 = vmatpush3.bf16.msra.mxu0 %v3538_v56  ;;  %v3598_v56 = vld [vmem:[%s4617_s1 + $0x330] sm:$0xff]  }
  0x35   :  { %3207 = vmatpush3.bf16.msra.mxu1 %v3539_v57  ;;  %3186 = vmatprep.subr.bf16.mxu0 %v3540_v58  ;;  %v3599_v57 = vld [vmem:[%s4617_s1 + $0x3b0] sm:$0xff]   ;;  %v3600_v58 = vld [vmem:[%s4617_s1 + $0x368] sm:$0xff]  }
  0x36   :  { %3208 = vmatprep.subr.bf16.mxu1 %v3541_v59  ;;  %v3601_v59 = vld [vmem:[%s4617_s1 + $0x3e8] sm:$0xff]  }
  0x38   :  { %3187 = vmatpush3.bf16.msra.mxu0 %v3542_v60  ;;  %v3602_v60 = vld [vmem:[%s4617_s1 + $0x328] sm:$0xff]  }
  0x39   :  { %3209 = vmatpush3.bf16.msra.mxu1 %v3543_v61  ;;  %3188 = vmatprep.subr.bf16.mxu0 %v3544_v62  ;;  %v3603_v61 = vld [vmem:[%s4617_s1 + $0x3a8] sm:$0xff]   ;;  %v3604_v62 = vld [vmem:[%s4617_s1 + $0x360] sm:$0xff]  }
  0x3a   :  { %3210 = vmatprep.subr.bf16.mxu1 %v3545_v63  ;;  %v3605_v63 = vld [vmem:[%s4617_s1 + $0x3e0] sm:$0xff]  }
  0x3c   :  { %3189 = vmatpush3.bf16.msra.mxu0 %v3546_v0  ;;  %v3606_v0 = vld [vmem:[%s4617_s1 + $0x320] sm:$0xff]  }
  0x3d   :  { %3211 = vmatpush3.bf16.msra.mxu1 %v3547_v1  ;;  %3190 = vmatprep.subr.bf16.mxu0 %v3548_v2  ;;  %v3607_v1 = vld [vmem:[%s4617_s1 + $0x3a0] sm:$0xff]   ;;  %v3608_v2 = vld [vmem:[%s4617_s1 + $0x358] sm:$0xff]  }
  0x3e   :  { %3212 = vmatprep.subr.bf16.mxu1 %v3549_v3  ;;  %v3609_v3 = vld [vmem:[%s4617_s1 + $0x3d8] sm:$0xff]  }
  0x40   :  { %3191 = vmatpush3.bf16.msra.mxu0 %v3550_v4  ;;  %v3610_v4 = vld [vmem:[%s4617_s1 + $0x318] sm:$0xff]  }
  0x41   :  { %3213 = vmatpush3.bf16.msra.mxu1 %v3551_v5  ;;  %3220 = vmatprep.subr.bf16.mxu0 %v3556_v12  ;;  %v3611_v5 = vld [vmem:[%s4617_s1 + $0x398] sm:$0xff]   ;;  %v3618_v12 = vld [vmem:[%s4617_s1 + $0x308] sm:$0xff]  }
  0x42   :  { %3242 = vmatprep.subr.bf16.mxu1 %v3557_v13  ;;  %v3619_v13 = vld [vmem:[%s4617_s1 + $0x388] sm:$0xff]  }
  0x43   :  { %2311 = vmatmul.mubr.bf16.vlgmr.msra.gmra.mxu0 %v2848_v7  ;;  %v3613_v7 = vld [vmem:[%s4617_s1 + $0x3d0] sm:$0xff]  }
  0x44   :  { %2351 = vmatmul.mubr.bf16.vlgmr.msra.gmra.mxu1 %v2850_v10  ;;  %3221 = vmatpush3.bf16.msra.mxu0 %v3558_v14  ;;  %v3616_v10 = vld [vmem:[%s4617_s1 + $0x348] sm:$0xff]   ;;  %v3620_v14 = vld [vmem:[%s4617_s1 + $0x340] sm:$0xff]  }
  0x45   :  { %3243 = vmatpush3.bf16.msra.mxu1 %v3559_v15  ;;  %3222 = vmatprep.subr.bf16.mxu0 %v3560_v16  ;;  %v3621_v15 = vld [vmem:[%s4617_s1 + $0x3c0] sm:$0xff]  }
  0x46   :  { %3244 = vmatprep.subr.bf16.mxu1 %v3561_v17  ;;  %2390 = vmatprep.mubr.bf16.mxu0 %v2853_v47  ;;  %v3622_v16 = vld [vmem:[%s4617_s1 + $0x300] sm:$0xff]   ;;  %v3651_v47 = vld [vmem:[%s4617_s1 + $0x490] sm:$0xff]  }
  0x47   :  { %2430 = vmatprep.mubr.bf16.mxu1 %v2855_v49  ;;  %v3623_v17 = vld [vmem:[%s4617_s1 + $0x380] sm:$0xff]   ;;  %v3653_v49 = vld [vmem:[%s4617_s1 + $0x4c8] sm:$0xff]  }
  0x48   :  { %3223 = vmatpush3.bf16.msra.mxu0 %v3562_v18  ;;  %v21_v18 = vld [vmem:[%s4618_s0 + $0x30] sm:$0xff] }
  0x49   :  { %3245 = vmatpush3.bf16.msra.mxu1 %v3563_v19  ;;  %3224 = vmatprep.subr.bf16.mxu0 %v3564_v20  ;;  %v22_v19 = vld [vmem:[%s4618_s0 + $0x38] sm:$0xff]  ;;  %v2856_v20 = vcombine.low %v21_v18, %v21_v18 }
  0x4a   :  { %3246 = vmatprep.subr.bf16.mxu1 %v3565_v21  ;;  %v2857_v21 = vcombine.high %v21_v18, %v21_v18  ;;  %v3684_v18 = vld [vmem:[%s4617_s1 + $0x550] sm:$0xff]  }
  0x4c   :  { %3225 = vmatpush3.bf16.msra.mxu0 %v3566_v22  ;;  %v2858_v22 = vcombine.low %v22_v19, %v22_v19 }
  0x4d   :  { %3247 = vmatpush3.bf16.msra.mxu1 %v3567_v23  ;;  %3226 = vmatprep.subr.bf16.mxu0 %v3568_v24  ;;  %v3628_v23 = vld [vmem:[%s4617_s1 + $0x478] sm:$0xff]   ;;  %v2859_v24 = vcombine.high %v22_v19, %v22_v19  ;;  %v3685_v19 = vld [vmem:[%s4617_s1 + $0x5d0] sm:$0xff]  }
  0x4e   :  { %3248 = vmatprep.subr.bf16.mxu1 %v3569_v25  ;;  %v3629_v25 = vld [vmem:[%s4617_s1 + $0x4f8] sm:$0xff]  }
  0x50   :  { %3227 = vmatpush3.bf16.msra.mxu0 %v3570_v26  ;;  %v3630_v26 = vld [vmem:[%s4617_s1 + $0x438] sm:$0xff]  }
  0x51   :  { %3249 = vmatpush3.bf16.msra.mxu1 %v3571_v27  ;;  %3228 = vmatprep.subr.bf16.mxu0 %v3572_v28  ;;  %v3631_v27 = vld [vmem:[%s4617_s1 + $0x4b8] sm:$0xff]   ;;  %v3632_v28 = vld [vmem:[%s4617_s1 + $0x470] sm:$0xff]  }
  0x52   :  { %3250 = vmatprep.subr.bf16.mxu1 %v3573_v29  ;;  %v3633_v29 = vld [vmem:[%s4617_s1 + $0x4f0] sm:$0xff]  }
  0x54   :  { %3229 = vmatpush3.bf16.msra.mxu0 %v3574_v30  ;;  %v3634_v30 = vld [vmem:[%s4617_s1 + $0x430] sm:$0xff]  }
  0x55   :  { %3251 = vmatpush3.bf16.msra.mxu1 %v3575_v31  ;;  %3230 = vmatprep.subr.bf16.mxu0 %v3576_v32  ;;  %v3635_v31 = vld [vmem:[%s4617_s1 + $0x4b0] sm:$0xff]   ;;  %v3636_v32 = vld [vmem:[%s4617_s1 + $0x468] sm:$0xff]  }
  0x56   :  { %3252 = vmatprep.subr.bf16.mxu1 %v3577_v33  ;;  %v3637_v33 = vld [vmem:[%s4617_s1 + $0x4e8] sm:$0xff]  }
  0x58   :  { %3231 = vmatpush3.bf16.msra.mxu0 %v3578_v34  ;;  %v3638_v34 = vld [vmem:[%s4617_s1 + $0x428] sm:$0xff]  }
  0x59   :  { %3253 = vmatpush3.bf16.msra.mxu1 %v3579_v35  ;;  %3232 = vmatprep.subr.bf16.mxu0 %v3580_v36  ;;  %v3639_v35 = vld [vmem:[%s4617_s1 + $0x4a8] sm:$0xff]   ;;  %v3640_v36 = vld [vmem:[%s4617_s1 + $0x460] sm:$0xff]  }
  0x5a   :  { %3254 = vmatprep.subr.bf16.mxu1 %v3581_v37  ;;  %v3641_v37 = vld [vmem:[%s4617_s1 + $0x4e0] sm:$0xff]  }
  0x5c   :  { %3233 = vmatpush3.bf16.msra.mxu0 %v3582_v38  ;;  %v3642_v38 = vld [vmem:[%s4617_s1 + $0x420] sm:$0xff]  }
  0x5d   :  { %3255 = vmatpush3.bf16.msra.mxu1 %v3583_v39  ;;  %3234 = vmatprep.subr.bf16.mxu0 %v3584_v40  ;;  %v3643_v39 = vld [vmem:[%s4617_s1 + $0x4a0] sm:$0xff]   ;;  %v3644_v40 = vld [vmem:[%s4617_s1 + $0x458] sm:$0xff]  }
  0x5e   :  { %3256 = vmatprep.subr.bf16.mxu1 %v3585_v41  ;;  %v3645_v41 = vld [vmem:[%s4617_s1 + $0x4d8] sm:$0xff]  }
  0x60   :  { %3235 = vmatpush3.bf16.msra.mxu0 %v3586_v42  ;;  %v3646_v42 = vld [vmem:[%s4617_s1 + $0x418] sm:$0xff]  }
  0x61   :  { %3257 = vmatpush3.bf16.msra.mxu1 %v3587_v43  ;;  %3264 = vmatprep.subr.bf16.mxu0 %v3592_v50  ;;  %v3647_v43 = vld [vmem:[%s4617_s1 + $0x498] sm:$0xff]   ;;  %v3654_v50 = vld [vmem:[%s4617_s1 + $0x408] sm:$0xff]  }
  0x62   :  { %3286 = vmatprep.subr.bf16.mxu1 %v3593_v51  ;;  %v3655_v51 = vld [vmem:[%s4617_s1 + $0x488] sm:$0xff]  }
  0x63   :  { %2391 = vmatmul.mubr.bf16.vlgmr.msra.gmra.mxu0 %v2852_v46  ;;  %v3650_v46 = vld [vmem:[%s4617_s1 + $0x410] sm:$0xff]  }
  0x64   :  { %2431 = vmatmul.mubr.bf16.vlgmr.msra.gmra.mxu1 %v2854_v48  ;;  %3265 = vmatpush3.bf16.msra.mxu0 %v3594_v52  ;;  %v3652_v48 = vld [vmem:[%s4617_s1 + $0x448] sm:$0xff]   ;;  %v3656_v52 = vld [vmem:[%s4617_s1 + $0x440] sm:$0xff]  }
  0x65   :  { %3287 = vmatpush3.bf16.msra.mxu1 %v3595_v53  ;;  %3266 = vmatprep.subr.bf16.mxu0 %v3596_v54  ;;  %v3657_v53 = vld [vmem:[%s4617_s1 + $0x4c0] sm:$0xff]  }
  0x66   :  { %3288 = vmatprep.subr.bf16.mxu1 %v3597_v55  ;;  %2470 = vmatprep.mubr.bf16.mxu0 %v2857_v21  ;;  %v3658_v54 = vld [vmem:[%s4617_s1 + $0x400] sm:$0xff]   ;;  %v3687_v21 = vld [vmem:[%s4617_s1 + $0x590] sm:$0xff]  }
  0x67   :  { %2510 = vmatprep.mubr.bf16.mxu1 %v2859_v24  ;;  %v3659_v55 = vld [vmem:[%s4617_s1 + $0x480] sm:$0xff]   ;;  %v3690_v24 = vld [vmem:[%s4617_s1 + $0x508] sm:$0xff]  }
  0x68   :  { %3267 = vmatpush3.bf16.msra.mxu0 %v3598_v56  ;;  %v23_v56 = vld [vmem:[%s4618_s0 + $0x40] sm:$0xff] }
  0x69   :  { %3289 = vmatpush3.bf16.msra.mxu1 %v3599_v57  ;;  %3268 = vmatprep.subr.bf16.mxu0 %v3600_v58  ;;  %v2860_v57 = vcombine.low %v23_v56, %v23_v56  ;;  %v2861_v58 = vcombine.high %v23_v56, %v23_v56  ;;  %v3720_v56 = vld [vmem:[%s4617_s1 + $0x650] sm:$0xff]  }
  0x6a   :  { %3290 = vmatprep.subr.bf16.mxu1 %v3601_v59  ;;  %v24_v59 = vld [vmem:[%s4618_s0 + $0x48] sm:$0xff] }
  0x6c   :  { %3269 = vmatpush3.bf16.msra.mxu0 %v3602_v60  ;;  %v2862_v60 = vcombine.low %v24_v59, %v24_v59 }
  0x6d   :  { %3291 = vmatpush3.bf16.msra.mxu1 %v3603_v61  ;;  %3270 = vmatprep.subr.bf16.mxu0 %v3604_v62  ;;  %v2863_v61 = vcombine.high %v24_v59, %v24_v59  ;;  %v3664_v62 = vld [vmem:[%s4617_s1 + $0x578] sm:$0xff]   ;;  %v3723_v59 = vld [vmem:[%s4617_s1 + $0x690] sm:$0xff]  }
  0x6e   :  { %3292 = vmatprep.subr.bf16.mxu1 %v3605_v63  ;;  %v3665_v63 = vld [vmem:[%s4617_s1 + $0x5f8] sm:$0xff]  }
  0x70   :  { %3271 = vmatpush3.bf16.msra.mxu0 %v3606_v0  ;;  %v3666_v0 = vld [vmem:[%s4617_s1 + $0x538] sm:$0xff]  }
  0x71   :  { %3293 = vmatpush3.bf16.msra.mxu1 %v3607_v1  ;;  %3272 = vmatprep.subr.bf16.mxu0 %v3608_v2  ;;  %v3667_v1 = vld [vmem:[%s4617_s1 + $0x5b8] sm:$0xff]   ;;  %v3668_v2 = vld [vmem:[%s4617_s1 + $0x570] sm:$0xff]  }
  0x72   :  { %3294 = vmatprep.subr.bf16.mxu1 %v3609_v3  ;;  %v3669_v3 = vld [vmem:[%s4617_s1 + $0x5f0] sm:$0xff]  }
  0x74   :  { %3273 = vmatpush3.bf16.msra.mxu0 %v3610_v4  ;;  %v3670_v4 = vld [vmem:[%s4617_s1 + $0x530] sm:$0xff]  }
  0x75   :  { %3295 = vmatpush3.bf16.msra.mxu1 %v3611_v5  ;;  %3274 = vmatprep.subr.bf16.mxu0 %v3612_v6  ;;  %v3671_v5 = vld [vmem:[%s4617_s1 + $0x5b0] sm:$0xff]   ;;  %v3672_v6 = vld [vmem:[%s4617_s1 + $0x568] sm:$0xff]  }
  0x76   :  { %3296 = vmatprep.subr.bf16.mxu1 %v3613_v7  ;;  %v3673_v7 = vld [vmem:[%s4617_s1 + $0x5e8] sm:$0xff]  }
  0x78   :  { %3275 = vmatpush3.bf16.msra.mxu0 %v3614_v8  ;;  %v3674_v8 = vld [vmem:[%s4617_s1 + $0x528] sm:$0xff]  }
  0x79   :  { %3297 = vmatpush3.bf16.msra.mxu1 %v3615_v9  ;;  %3276 = vmatprep.subr.bf16.mxu0 %v3616_v10  ;;  %v3675_v9 = vld [vmem:[%s4617_s1 + $0x5a8] sm:$0xff]   ;;  %v3676_v10 = vld [vmem:[%s4617_s1 + $0x560] sm:$0xff]  }
  0x7a   :  { %3298 = vmatprep.subr.bf16.mxu1 %v3617_v11  ;;  %v3677_v11 = vld [vmem:[%s4617_s1 + $0x5e0] sm:$0xff]  }
  0x7c   :  { %3277 = vmatpush3.bf16.msra.mxu0 %v3618_v12  ;;  %v3678_v12 = vld [vmem:[%s4617_s1 + $0x520] sm:$0xff]  }
  0x7d   :  { %3299 = vmatpush3.bf16.msra.mxu1 %v3619_v13  ;;  %3278 = vmatprep.subr.bf16.mxu0 %v3620_v14  ;;  %v3679_v13 = vld [vmem:[%s4617_s1 + $0x5a0] sm:$0xff]   ;;  %v3680_v14 = vld [vmem:[%s4617_s1 + $0x558] sm:$0xff]  }
  0x7e   :  { %3300 = vmatprep.subr.bf16.mxu1 %v3621_v15  ;;  %v3681_v15 = vld [vmem:[%s4617_s1 + $0x5d8] sm:$0xff]  }
  0x80   :  { %3279 = vmatpush3.bf16.msra.mxu0 %v3622_v16  ;;  %v3682_v16 = vld [vmem:[%s4617_s1 + $0x518] sm:$0xff]  }
  0x81   :  { %3301 = vmatpush3.bf16.msra.mxu1 %v3623_v17  ;;  %3308 = vmatprep.subr.bf16.mxu0 %v3628_v23  ;;  %v3683_v17 = vld [vmem:[%s4617_s1 + $0x598] sm:$0xff]   ;;  %v3689_v23 = vld [vmem:[%s4617_s1 + $0x5c8] sm:$0xff]  }
  0x82   :  { %3330 = vmatprep.subr.bf16.mxu1 %v3629_v25  ;;  %v3691_v25 = vld [vmem:[%s4617_s1 + $0x588] sm:$0xff]  }
  0x83   :  { %2471 = vmatmul.mubr.bf16.vlgmr.msra.gmra.mxu0 %v2856_v20  ;;  %v3686_v20 = vld [vmem:[%s4617_s1 + $0x510] sm:$0xff]  }
  0x84   :  { %2511 = vmatmul.mubr.bf16.vlgmr.msra.gmra.mxu1 %v2858_v22  ;;  %3309 = vmatpush3.bf16.msra.mxu0 %v3630_v26  ;;  %v3688_v22 = vld [vmem:[%s4617_s1 + $0x548] sm:$0xff]   ;;  %v3692_v26 = vld [vmem:[%s4617_s1 + $0x540] sm:$0xff]  }
  0x85   :  { %3331 = vmatpush3.bf16.msra.mxu1 %v3631_v27  ;;  %3310 = vmatprep.subr.bf16.mxu0 %v3632_v28  ;;  %v3693_v27 = vld [vmem:[%s4617_s1 + $0x5c0] sm:$0xff]  }
  0x86   :  { %3332 = vmatprep.subr.bf16.mxu1 %v3633_v29  ;;  %2550 = vmatprep.mubr.bf16.mxu0 %v2861_v58  ;;  %v3694_v28 = vld [vmem:[%s4617_s1 + $0x500] sm:$0xff]   ;;  %v3722_v58 = vld [vmem:[%s4617_s1 + $0x610] sm:$0xff]  }
  0x87   :  { %2590 = vmatprep.mubr.bf16.mxu1 %v2863_v61  ;;  %v3695_v29 = vld [vmem:[%s4617_s1 + $0x580] sm:$0xff]   ;;  %v3725_v61 = vld [vmem:[%s4617_s1 + $0x6c8] sm:$0xff]  }
  0x88   :  { %3311 = vmatpush3.bf16.msra.mxu0 %v3634_v30  ;;  %v25_v30 = vld [vmem:[%s4618_s0 + $0x50] sm:$0xff] }
  0x89   :  { %3333 = vmatpush3.bf16.msra.mxu1 %v3635_v31  ;;  %3312 = vmatprep.subr.bf16.mxu0 %v3636_v32  ;;  %v26_v31 = vld [vmem:[%s4618_s0 + $0x58] sm:$0xff]  ;;  %v2864_v32 = vcombine.low %v25_v30, %v25_v30 }
  0x8a   :  { %3334 = vmatprep.subr.bf16.mxu1 %v3637_v33  ;;  %v2865_v33 = vcombine.high %v25_v30, %v25_v30  ;;  %v3743_v30 = vld [vmem:[%s4617_s1 + $0x7b0] sm:$0xff]  }
  0x8c   :  { %3313 = vmatpush3.bf16.msra.mxu0 %v3638_v34  ;;  %v2866_v34 = vcombine.low %v26_v31, %v26_v31 }
  0x8d   :  { %3335 = vmatpush3.bf16.msra.mxu1 %v3639_v35  ;;  %3314 = vmatprep.subr.bf16.mxu0 %v3640_v36  ;;  %v2867_v35 = vcombine.high %v26_v31, %v26_v31  ;;  %v3700_v36 = vld [vmem:[%s4617_s1 + $0x678] sm:$0xff]   ;;  %v3744_v31 = vld [vmem:[%s4617_s1 + $0x768] sm:$0xff]  }
  0x8e   :  { %3336 = vmatprep.subr.bf16.mxu1 %v3641_v37  ;;  %v3701_v37 = vld [vmem:[%s4617_s1 + $0x6f8] sm:$0xff]  }
  0x90   :  { %3315 = vmatpush3.bf16.msra.mxu0 %v3642_v38  ;;  %v3702_v38 = vld [vmem:[%s4617_s1 + $0x638] sm:$0xff]  }
  0x91   :  { %3337 = vmatpush3.bf16.msra.mxu1 %v3643_v39  ;;  %3316 = vmatprep.subr.bf16.mxu0 %v3644_v40  ;;  %v3703_v39 = vld [vmem:[%s4617_s1 + $0x6b8] sm:$0xff]   ;;  %v3704_v40 = vld [vmem:[%s4617_s1 + $0x670] sm:$0xff]  }
  0x92   :  { %3338 = vmatprep.subr.bf16.mxu1 %v3645_v41  ;;  %v3705_v41 = vld [vmem:[%s4617_s1 + $0x6f0] sm:$0xff]  }
  0x94   :  { %3317 = vmatpush3.bf16.msra.mxu0 %v3646_v42  ;;  %v3706_v42 = vld [vmem:[%s4617_s1 + $0x630] sm:$0xff]  }
  0x95   :  { %3339 = vmatpush3.bf16.msra.mxu1 %v3647_v43  ;;  %3318 = vmatprep.subr.bf16.mxu0 %v3648_v44  ;;  %v3707_v43 = vld [vmem:[%s4617_s1 + $0x6b0] sm:$0xff]   ;;  %v3708_v44 = vld [vmem:[%s4617_s1 + $0x668] sm:$0xff]  }
  0x96   :  { %3340 = vmatprep.subr.bf16.mxu1 %v3649_v45  ;;  %v3709_v45 = vld [vmem:[%s4617_s1 + $0x6e8] sm:$0xff]  }
  0x98   :  { %3319 = vmatpush3.bf16.msra.mxu0 %v3650_v46  ;;  %v3710_v46 = vld [vmem:[%s4617_s1 + $0x628] sm:$0xff]  }
  0x99   :  { %3341 = vmatpush3.bf16.msra.mxu1 %v3651_v47  ;;  %3320 = vmatprep.subr.bf16.mxu0 %v3652_v48  ;;  %v3711_v47 = vld [vmem:[%s4617_s1 + $0x6a8] sm:$0xff]   ;;  %v3712_v48 = vld [vmem:[%s4617_s1 + $0x660] sm:$0xff]  }
  0x9a   :  { %3342 = vmatprep.subr.bf16.mxu1 %v3653_v49  ;;  %v3713_v49 = vld [vmem:[%s4617_s1 + $0x6e0] sm:$0xff]  }
  0x9c   :  { %3321 = vmatpush3.bf16.msra.mxu0 %v3654_v50  ;;  %v3714_v50 = vld [vmem:[%s4617_s1 + $0x620] sm:$0xff]  }
  0x9d   :  { %3343 = vmatpush3.bf16.msra.mxu1 %v3655_v51  ;;  %3322 = vmatprep.subr.bf16.mxu0 %v3656_v52  ;;  %v3715_v51 = vld [vmem:[%s4617_s1 + $0x6a0] sm:$0xff]   ;;  %v3716_v52 = vld [vmem:[%s4617_s1 + $0x658] sm:$0xff]  }
  0x9e   :  { %3344 = vmatprep.subr.bf16.mxu1 %v3657_v53  ;;  %v3717_v53 = vld [vmem:[%s4617_s1 + $0x6d8] sm:$0xff]  }
  0xa0   :  { %3323 = vmatpush3.bf16.msra.mxu0 %v3658_v54  ;;  %v3718_v54 = vld [vmem:[%s4617_s1 + $0x618] sm:$0xff]  }
  0xa1   :  { %3345 = vmatpush3.bf16.msra.mxu1 %v3659_v55  ;;  %3352 = vmatprep.subr.bf16.mxu0 %v3664_v62  ;;  %v3719_v55 = vld [vmem:[%s4617_s1 + $0x698] sm:$0xff]   ;;  %v3726_v62 = vld [vmem:[%s4617_s1 + $0x608] sm:$0xff]  }
  0xa2   :  { %3374 = vmatprep.subr.bf16.mxu1 %v3665_v63  ;;  %v3727_v63 = vld [vmem:[%s4617_s1 + $0x688] sm:$0xff]  }
  0xa3   :  { %2551 = vmatmul.mubr.bf16.vlgmr.msra.gmra.mxu0 %v2860_v57  ;;  %v3721_v57 = vld [vmem:[%s4617_s1 + $0x6d0] sm:$0xff]  }
  0xa4   :  { %2591 = vmatmul.mubr.bf16.vlgmr.msra.gmra.mxu1 %v2862_v60  ;;  %3353 = vmatpush3.bf16.msra.mxu0 %v3666_v0  ;;  %v3724_v60 = vld [vmem:[%s4617_s1 + $0x648] sm:$0xff]   ;;  %v3728_v0 = vld [vmem:[%s4617_s1 + $0x640] sm:$0xff]  }
  0xa5   :  { %3375 = vmatpush3.bf16.msra.mxu1 %v3667_v1  ;;  %3354 = vmatprep.subr.bf16.mxu0 %v3668_v2  ;;  %v3729_v1 = vld [vmem:[%s4617_s1 + $0x6c0] sm:$0xff]  }
  0xa6   :  { %3376 = vmatprep.subr.bf16.mxu1 %v3669_v3  ;;  %2630 = vmatprep.mubr.bf16.mxu0 %v2865_v33  ;;  %v3730_v2 = vld [vmem:[%s4617_s1 + $0x600] sm:$0xff]   ;;  %v3746_v33 = vld [vmem:[%s4617_s1 + $0x728] sm:$0xff]  }
  0xa7   :  { %2670 = vmatprep.mubr.bf16.mxu1 %v2867_v35  ;;  %v3731_v3 = vld [vmem:[%s4617_s1 + $0x680] sm:$0xff]  }
  0xa8   :  { %3355 = vmatpush3.bf16.msra.mxu0 %v3670_v4  ;;  %v27_v4 = vld [vmem:[%s4618_s0 + $0x60] sm:$0xff] }
  0xa9   :  { %3377 = vmatpush3.bf16.msra.mxu1 %v3671_v5  ;;  %3356 = vmatprep.subr.bf16.mxu0 %v3672_v6  ;;  %v28_v5 = vld [vmem:[%s4618_s0 + $0x68] sm:$0xff]  ;;  %v3748_v35 = vld [vmem:[%s4617_s1 + $0x760] sm:$0xff]  }
  0xaa   :  { %3378 = vmatprep.subr.bf16.mxu1 %v3673_v7 }
  0xac   :  { %3357 = vmatpush3.bf16.msra.mxu0 %v3674_v8  ;;  %v2868_v8 = vcombine.low %v27_v4, %v27_v4 }
  0xad   :  { %3379 = vmatpush3.bf16.msra.mxu1 %v3675_v9  ;;  %3358 = vmatprep.subr.bf16.mxu0 %v3676_v10  ;;  %v2869_v9 = vcombine.high %v27_v4, %v27_v4  ;;  %v2870_v10 = vcombine.low %v28_v5, %v28_v5 }
  0xae   :  { %3380 = vmatprep.subr.bf16.mxu1 %v3677_v11  ;;  %v3736_v11 = vld [vmem:[%s4617_s1 + $0x778] sm:$0xff]  }
  0xb0   :  { %3359 = vmatpush3.bf16.msra.mxu0 %v3678_v12  ;;  %v2871_v12 = vcombine.high %v28_v5, %v28_v5 }
  0xb1   :  { %3381 = vmatpush3.bf16.msra.mxu1 %v3679_v13  ;;  %3360 = vmatprep.subr.bf16.mxu0 %v3680_v14  ;;  %v3737_v13 = vld [vmem:[%s4617_s1 + $0x7f8] sm:$0xff]  }
  0xb2   :  { %3382 = vmatprep.subr.bf16.mxu1 %v3681_v15 }
  0xb4   :  { %3361 = vmatpush3.bf16.msra.mxu0 %v3682_v16  ;;  %v3738_v16 = vld [vmem:[%s4617_s1 + $0x738] sm:$0xff]  }
  0xb5   :  { %3383 = vmatpush3.bf16.msra.mxu1 %v3683_v17  ;;  %3362 = vmatprep.subr.bf16.mxu0 %v3684_v18 }
  0xb6   :  { %3384 = vmatprep.subr.bf16.mxu1 %v3685_v19  ;;  %v3739_v19 = vld [vmem:[%s4617_s1 + $0x7b8] sm:$0xff]  }
  0xb8   :  { %3363 = vmatpush3.bf16.msra.mxu0 %v3686_v20  ;;  %v2843_v20 = vld [vmem:[%s4619_s2] ss:$0 sm:$0xff] }
  0xb9   :  { %3385 = vmatpush3.bf16.msra.mxu1 %v3687_v21  ;;  %3364 = vmatprep.subr.bf16.mxu0 %v3688_v22 }
  0xba   :  { %3386 = vmatprep.subr.bf16.mxu1 %v3689_v23 }
  0xbc   :  { %3365 = vmatpush3.bf16.msra.mxu0 %v3690_v24  ;;  %v3740_v24 = vld [vmem:[%s4617_s1 + $0x770] sm:$0xff]  }
  0xbd   :  { %3387 = vmatpush3.bf16.msra.mxu1 %v3691_v25  ;;  %3366 = vmatprep.subr.bf16.mxu0 %v3692_v26  ;;  %v3741_v25 = vld [vmem:[%s4617_s1 + $0x7f0] sm:$0xff]  }
  0xbe   :  { %3388 = vmatprep.subr.bf16.mxu1 %v3693_v27 }
  0xc0   :  { %3367 = vmatpush3.bf16.msra.mxu0 %v3694_v28 }
  0xc1   :  { %3389 = vmatpush3.bf16.msra.mxu1 %v3695_v29  ;;  %3396 = vmatprep.subr.bf16.mxu0 %v3700_v36  ;;  %v3742_v29 = vld [vmem:[%s4617_s1 + $0x730] sm:$0xff]   ;;  %v3749_v36 = vld [vmem:[%s4617_s1 + $0x7e0] sm:$0xff]  }
  0xc2   :  { %3418 = vmatprep.subr.bf16.mxu1 %v3701_v37  ;;  %v3750_v37 = vld [vmem:[%s4617_s1 + $0x720] sm:$0xff]  }
  0xc3   :  { %2631 = vmatmul.mubr.bf16.vlgmr.msra.gmra.mxu0 %v2864_v32  ;;  %v3745_v32 = vld [vmem:[%s4617_s1 + $0x7e8] sm:$0xff]  }
  0xc4   :  { %2671 = vmatmul.mubr.bf16.vlgmr.msra.gmra.mxu1 %v2866_v34  ;;  %3397 = vmatpush3.bf16.msra.mxu0 %v3702_v38  ;;  %v3747_v34 = vld [vmem:[%s4617_s1 + $0x7a8] sm:$0xff]   ;;  %v3751_v38 = vld [vmem:[%s4617_s1 + $0x7a0] sm:$0xff]  }
  0xc5   :  { %3419 = vmatpush3.bf16.msra.mxu1 %v3703_v39  ;;  %3398 = vmatprep.subr.bf16.mxu0 %v3704_v40  ;;  %v3752_v39 = vld [vmem:[%s4617_s1 + $0x758] sm:$0xff]  }
  0xc6   :  { %3420 = vmatprep.subr.bf16.mxu1 %v3705_v41  ;;  %2710 = vmatprep.mubr.bf16.mxu0 %v2869_v9  ;;  %v3753_v40 = vld [vmem:[%s4617_s1 + $0x7d8] sm:$0xff]  }
  0xc7   :  { %2750 = vmatprep.mubr.bf16.mxu1 %v2871_v12  ;;  %v3754_v41 = vld [vmem:[%s4617_s1 + $0x718] sm:$0xff]  }
  0xc8   :  { %3399 = vmatpush3.bf16.msra.mxu0 %v3706_v42  ;;  %v3755_v42 = vld [vmem:[%s4617_s1 + $0x798] sm:$0xff]  }
  0xc9   :  { %3421 = vmatpush3.bf16.msra.mxu1 %v3707_v43  ;;  %3400 = vmatprep.subr.bf16.mxu0 %v3708_v44  ;;  %v3756_v43 = vld [vmem:[%s4617_s1 + $0x750] sm:$0xff]  }
  0xca   :  { %3422 = vmatprep.subr.bf16.mxu1 %v3709_v45  ;;  %v3757_v44 = vld [vmem:[%s4617_s1 + $0x7d0] sm:$0xff]  }
  0xcb   :  { %v3758_v45 = vld [vmem:[%s4617_s1 + $0x710] sm:$0xff]  }
  0xcc   :  { %3401 = vmatpush3.bf16.msra.mxu0 %v3710_v46  ;;  %v3759_v46 = vld [vmem:[%s4617_s1 + $0x790] sm:$0xff]  }
  0xcd   :  { %3423 = vmatpush3.bf16.msra.mxu1 %v3711_v47  ;;  %3402 = vmatprep.subr.bf16.mxu0 %v3712_v48  ;;  %v3760_v47 = vld [vmem:[%s4617_s1 + $0x748] sm:$0xff]  }
  0xce   :  { %3424 = vmatprep.subr.bf16.mxu1 %v3713_v49  ;;  %v3761_v48 = vld [vmem:[%s4617_s1 + $0x7c8] sm:$0xff]  }
  0xcf   :  { %v3762_v49 = vld [vmem:[%s4617_s1 + $0x708] sm:$0xff]  }
  0xd0   :  { %3403 = vmatpush3.bf16.msra.mxu0 %v3714_v50  ;;  %v3763_v50 = vld [vmem:[%s4617_s1 + $0x788] sm:$0xff]  }
  0xd1   :  { %3425 = vmatpush3.bf16.msra.mxu1 %v3715_v51  ;;  %3404 = vmatprep.subr.bf16.mxu0 %v3716_v52  ;;  %v3764_v51 = vld [vmem:[%s4617_s1 + $0x740] sm:$0xff]  }
  0xd2   :  { %3426 = vmatprep.subr.bf16.mxu1 %v3717_v53  ;;  %v3765_v52 = vld [vmem:[%s4617_s1 + $0x7c0] sm:$0xff]  }
  0xd3   :  { %v3766_v53 = vld [vmem:[%s4617_s1 + $0x700] sm:$0xff]  }
  0xd4   :  { %3405 = vmatpush3.bf16.msra.mxu0 %v3718_v54  ;;  %v3767_v54 = vld [vmem:[%s4617_s1 + $0x780] sm:$0xff]  }
  0xd5   :  { %3427 = vmatpush3.bf16.msra.mxu1 %v3719_v55  ;;  %3406 = vmatprep.subr.bf16.mxu0 %v3720_v56  ;;  %v29_v55 = vld [vmem:[%s4618_s0 + $0x70] sm:$0xff]  ;;  %v30_v56 = vld [vmem:[%s4618_s0 + $0x78] sm:$0xff] }
  0xd6   :  { %3428 = vmatprep.subr.bf16.mxu1 %v3721_v57 }
  0xd8   :  { %3407 = vmatpush3.bf16.msra.mxu0 %v3722_v58 }
  0xd9   :  { %3429 = vmatpush3.bf16.msra.mxu1 %v3723_v59  ;;  %3408 = vmatprep.subr.bf16.mxu0 %v3724_v60  ;;  %v2872_v59 = vcombine.low %v29_v55, %v29_v55  ;;  %v2873_v60 = vcombine.high %v29_v55, %v29_v55 }
  0xda   :  { %3430 = vmatprep.subr.bf16.mxu1 %v3725_v61  ;;  %v2874_v61 = vcombine.low %v30_v56, %v30_v56 }
  0xdc   :  { %3409 = vmatpush3.bf16.msra.mxu0 %v3726_v62  ;;  %v2875_v62 = vcombine.high %v30_v56, %v30_v56 }
  0xdd   :  { %3431 = vmatpush3.bf16.msra.mxu1 %v3727_v63  ;;  %3410 = vmatprep.subr.bf16.mxu0 %v3728_v0 }
  0xde   :  { %3432 = vmatprep.subr.bf16.mxu1 %v3729_v1 }
  0xe0   :  { %3411 = vmatpush3.bf16.msra.mxu0 %v3730_v2 }
  0xe1   :  { %3433 = vmatpush3.bf16.msra.mxu1 %v3731_v3  ;;  %3440 = vmatprep.subr.bf16.mxu0 %v3736_v11 }
  0xe2   :  { %3462 = vmatprep.subr.bf16.mxu1 %v3737_v13 }
  0xe3   :  { %v3148_v6 = vpop.f32.mrf.mxu0  ;;  %2711 = vmatmul.mubr.bf16.vlgmr.msra.gmra.mxu0 %v2868_v8 }
  0xe4   :  { %v3170_v7 = vpop.f32.mrf.mxu1  ;;  %2751 = vmatmul.mubr.bf16.vlgmr.msra.gmra.mxu1 %v2870_v10  ;;  %3441 = vmatpush3.bf16.msra.mxu0 %v3738_v16 }
  0xe5   :  { %v3149_v14 = vpop.f32.mrf.mxu0  ;;  %3463 = vmatpush3.bf16.msra.mxu1 %v3739_v19  ;;  %3442 = vmatprep.subr.bf16.mxu0 %v3740_v24 }
  0xe6   :  { %v3171_v15 = vpop.f32.mrf.mxu1  ;;  %v3150_v17 = vadd.f32 %v3149_v14, %v3148_v6  ;;  %3464 = vmatprep.subr.bf16.mxu1 %v3741_v25  ;;  %2790 = vmatprep.mubr.bf16.mxu0 %v2873_v60 }
  0xe7   :  { %v3172_v18 = vadd.f32 %v3171_v15, %v3170_v7  ;;  %v3151_v21 = vpop.f32.mrf.mxu0  ;;  %2830 = vmatprep.mubr.bf16.mxu1 %v2875_v62 }
  0xe8   :  { %v3173_v22 = vpop.f32.mrf.mxu1  ;;  %v2233_v23 = vadd.f32 %v3150_v17, %v2843_v20  ;;  %3443 = vmatpush3.bf16.msra.mxu0 %v3742_v29 }
  0xe9   :  { %v3152_v26 = vpop.f32.mrf.mxu0  ;;  %3465 = vmatpush3.bf16.msra.mxu1 %v3743_v30  ;;  %3444 = vmatprep.subr.bf16.mxu0 %v3744_v31 }
  0xea   :  { %v3174_v27 = vpop.f32.mrf.mxu1  ;;  %v4527_v28 = vadd.f32 %v3172_v18, %v2233_v23  ;;  %3466 = vmatprep.subr.bf16.mxu1 %v3745_v32 }
  0xec   :  { %3445 = vmatpush3.bf16.msra.mxu0 %v3746_v33 }
  0xed   :  { %3467 = vmatpush3.bf16.msra.mxu1 %v3747_v34  ;;  %3446 = vmatprep.subr.bf16.mxu0 %v3748_v35 }
  0xee   :  { %3468 = vmatprep.subr.bf16.mxu1 %v3749_v36 }
  0xf0   :  { %3447 = vmatpush3.bf16.msra.mxu0 %v3750_v37 }
  0xf1   :  { %3469 = vmatpush3.bf16.msra.mxu1 %v3751_v38  ;;  %3448 = vmatprep.subr.bf16.mxu0 %v3752_v39 }
  0xf2   :  { %3470 = vmatprep.subr.bf16.mxu1 %v3753_v40 }
  0xf4   :  { %3449 = vmatpush3.bf16.msra.mxu0 %v3754_v41 }
  0xf5   :  { %3471 = vmatpush3.bf16.msra.mxu1 %v3755_v42  ;;  %3450 = vmatprep.subr.bf16.mxu0 %v3756_v43 }
  0xf6   :  { %3472 = vmatprep.subr.bf16.mxu1 %v3757_v44 }
  0xf8   :  { %3451 = vmatpush3.bf16.msra.mxu0 %v3758_v45 }
  0xf9   :  { %3473 = vmatpush3.bf16.msra.mxu1 %v3759_v46  ;;  %3452 = vmatprep.subr.bf16.mxu0 %v3760_v47 }
  0xfa   :  { %3474 = vmatprep.subr.bf16.mxu1 %v3761_v48 }
  0xfc   :  { %3453 = vmatpush3.bf16.msra.mxu0 %v3762_v49 }
  0xfd   :  { %3475 = vmatpush3.bf16.msra.mxu1 %v3763_v50  ;;  %3454 = vmatprep.subr.bf16.mxu0 %v3764_v51 }
  0xfe   :  { %3476 = vmatprep.subr.bf16.mxu1 %v3765_v52 }
 0x100   :  { %3455 = vmatpush3.bf16.msra.mxu0 %v3766_v53 }
 0x101   :  { %3477 = vmatpush3.bf16.msra.mxu1 %v3767_v54 }
 0x103   :  { %v3192_v57 = vpop.f32.mrf.mxu0  ;;  %2791 = vmatmul.mubr.bf16.vlgmr.msra.gmra.mxu0 %v2872_v59 }
 0x104   :  { %v3214_v58 = vpop.f32.mrf.mxu1  ;;  %2831 = vmatmul.mubr.bf16.vlgmr.msra.gmra.mxu1 %v2874_v61 }
 0x105   :  { %v3193_v63 = vpop.f32.mrf.mxu0 }
 0x106   :  { %v3215_v0 = vpop.f32.mrf.mxu1  ;;  %v3194_v1 = vadd.f32 %v3193_v63, %v3192_v57 }
 0x107   :  { %v3216_v2 = vadd.f32 %v3215_v0, %v3214_v58  ;;  %v3195_v3 = vpop.f32.mrf.mxu0 }
 0x108   :  { %v3217_v4 = vpop.f32.mrf.mxu1  ;;  %v2313_v5 = vadd.f32 %v3194_v1, %v4527_v28 }
 0x109   :  { %v3196_v6 = vpop.f32.mrf.mxu0 }
 0x10a   :  { %v3218_v7 = vpop.f32.mrf.mxu1  ;;  %v2353_v8 = vadd.f32 %v3216_v2, %v2313_v5 }
 0x123   :  { %v3236_v9 = vpop.f32.mrf.mxu0 }
 0x124   :  { %v3258_v10 = vpop.f32.mrf.mxu1 }
 0x125   :  { %v3237_v11 = vpop.f32.mrf.mxu0 }
 0x126   :  { %v3238_v12 = vadd.f32 %v3237_v11, %v3236_v9  ;;  %v3259_v13 = vpop.f32.mrf.mxu1 }
 0x127   :  { %v3260_v14 = vadd.f32 %v3259_v13, %v3258_v10  ;;  %v3239_v15 = vpop.f32.mrf.mxu0 }
 0x128   :  { %v2393_v16 = vadd.f32 %v3238_v12, %v2353_v8  ;;  %v3261_v17 = vpop.f32.mrf.mxu1 }
 0x129   :  { %v3240_v18 = vpop.f32.mrf.mxu0 }
 0x12a   :  { %v2433_v19 = vadd.f32 %v3260_v14, %v2393_v16  ;;  %v3262_v20 = vpop.f32.mrf.mxu1 }
 0x143   :  { %v3280_v21 = vpop.f32.mrf.mxu0 }
 0x144   :  { %v3302_v22 = vpop.f32.mrf.mxu1 }
 0x145   :  { %v3281_v23 = vpop.f32.mrf.mxu0 }
 0x146   :  { %v3282_v24 = vadd.f32 %v3281_v23, %v3280_v21  ;;  %v3303_v25 = vpop.f32.mrf.mxu1 }
 0x147   :  { %v3304_v26 = vadd.f32 %v3303_v25, %v3302_v22  ;;  %v3283_v27 = vpop.f32.mrf.mxu0 }
 0x148   :  { %v2473_v28 = vadd.f32 %v3282_v24, %v2433_v19  ;;  %v3305_v29 = vpop.f32.mrf.mxu1 }
 0x149   :  { %v3284_v30 = vpop.f32.mrf.mxu0 }
 0x14a   :  { %v2513_v31 = vadd.f32 %v3304_v26, %v2473_v28  ;;  %v3306_v32 = vpop.f32.mrf.mxu1 }
 0x163   :  { %v3324_v33 = vpop.f32.mrf.mxu0 }
 0x164   :  { %v3346_v34 = vpop.f32.mrf.mxu1 }
 0x165   :  { %v3325_v35 = vpop.f32.mrf.mxu0 }
 0x166   :  { %v3347_v36 = vpop.f32.mrf.mxu1  ;;  %v3326_v37 = vadd.f32 %v3325_v35, %v3324_v33 }
 0x167   :  { %v3348_v38 = vadd.f32 %v3347_v36, %v3346_v34  ;;  %v3327_v39 = vpop.f32.mrf.mxu0 }
 0x168   :  { %v3349_v40 = vpop.f32.mrf.mxu1  ;;  %v2553_v41 = vadd.f32 %v3326_v37, %v2513_v31 }
 0x169   :  { %v3328_v42 = vpop.f32.mrf.mxu0 }
 0x16a   :  { %v3350_v43 = vpop.f32.mrf.mxu1  ;;  %v2593_v44 = vadd.f32 %v3348_v38, %v2553_v41 }
 0x183   :  { %v3368_v45 = vpop.f32.mrf.mxu0 }
 0x184   :  { %v3390_v46 = vpop.f32.mrf.mxu1 }
 0x185   :  { %v3369_v47 = vpop.f32.mrf.mxu0 }
 0x186   :  { %v3391_v48 = vpop.f32.mrf.mxu1  ;;  %v3370_v61 = vadd.f32 %v3369_v47, %v3368_v45 }
 0x187   :  { %v3371_v49 = vpop.f32.mrf.mxu0  ;;  %v3392_v63 = vadd.f32 %v3391_v48, %v3390_v46 }
 0x188   :  { %v3393_v50 = vpop.f32.mrf.mxu1  ;;  %v2633_v62 = vadd.f32 %v3370_v61, %v2593_v44 }
 0x189   :  { %v3372_v51 = vpop.f32.mrf.mxu0 }
 0x18a   :  { %v3394_v52 = vpop.f32.mrf.mxu1  ;;  %v2673_v1 = vadd.f32 %v3392_v63, %v2633_v62 }
 0x1a3   :  { %v3412_v53 = vpop.f32.mrf.mxu0 }
 0x1a4   :  { %v3434_v54 = vpop.f32.mrf.mxu1 }
 0x1a5   :  { %v3413_v55 = vpop.f32.mrf.mxu0 }
 0x1a6   :  { %v3435_v56 = vpop.f32.mrf.mxu1  ;;  %v3414_v0 = vadd.f32 %v3413_v55, %v3412_v53 }
 0x1a7   :  { %v3415_v57 = vpop.f32.mrf.mxu0  ;;  %v3436_v3 = vadd.f32 %v3435_v56, %v3434_v54 }
 0x1a8   :  { %v3437_v58 = vpop.f32.mrf.mxu1  ;;  %v2713_v2 = vadd.f32 %v3414_v0, %v2673_v1 }
 0x1a9   :  { %v3416_v59 = vpop.f32.mrf.mxu0 }
 0x1aa   :  { %v3438_v60 = vpop.f32.mrf.mxu1  ;;  %v2753_v7 = vadd.f32 %v3436_v3, %v2713_v2 }
 0x1c3   :  { %v3456_v4 = vpop.f32.mrf.mxu0 }
 0x1c4   :  { %v3478_v5 = vpop.f32.mrf.mxu1 }
 0x1c5   :  { %v3457_v6 = vpop.f32.mrf.mxu0 }
 0x1c6   :  { %v3458_v8 = vadd.f32 %v3457_v6, %v3456_v4  ;;  %v3479_v9 = vpop.f32.mrf.mxu1 }
 0x1c7   :  { %v3459_v10 = vpop.f32.mrf.mxu0  ;;  %v3480_v12 = vadd.f32 %v3479_v9, %v3478_v5 }
 0x1c8   :  { %v2793_v11 = vadd.f32 %v3458_v8, %v2753_v7  ;;  %v3481_v13 = vpop.f32.mrf.mxu1 }
 0x1c9   :  { %v3460_v14 = vpop.f32.mrf.mxu0 }
 0x1ca   :  { %v2833_v15 = vadd.f32 %v3480_v12, %v2793_v11  ;;  %v3482_v16 = vpop.f32.mrf.mxu1 }
 0x1cc   :  { %2838 = vst [vmem:[%s4620_s3] sm:$0xff] %v2833_v15 }

</bundles_post_ra>
